<compile_context>
chip_gen: v5e
topology: v5e:2x2
jax: 0.10.0
libtpu: 0.0.40
codegen_flags: <defaults>
</compile_context>

<pallas_src>
import functools

import jax
import jax.numpy as jnp
from jax.experimental import pallas as pl
from jax.experimental.pallas import tpu as pltpu


def _round_up(x, m):
    return ((x + m - 1) // m) * m


def _tile(dim, unit, single_cap, multi_tile):
    """Return (tile, padded_dim). One tile if it fits under single_cap, else fixed tile."""
    p = _round_up(dim, unit)
    if p <= single_cap:
        return p, p
    return multi_tile, _round_up(dim, multi_tile)


# ---------------------------------------------------------------------------
# Matmul kernels with fused bias + activation epilogue
# ---------------------------------------------------------------------------
def _apply_act(y, act):
    if act == "relu":
        return jnp.maximum(y, 0.0)
    if act == "leaky":
        return jnp.where(y >= 0, y, 0.01 * y)
    return y


def _matmul_bias_act_onek_kernel(a_ref, b_ref, bias_ref, o_ref, *, act):
    # Whole K reduction in one MXU pass: no scratch, no K grid.
    y = jnp.dot(a_ref[...], b_ref[...], preferred_element_type=jnp.float32)
    y = _apply_act(y + bias_ref[...], act)
    o_ref[...] = y.astype(o_ref.dtype)


def _matmul_bias_act_kernel(a_ref, b_ref, bias_ref, o_ref, acc_ref, *, act):
    k = pl.program_id(2)

    @pl.when(k == 0)
    def _():
        acc_ref[...] = jnp.zeros_like(acc_ref)

    acc_ref[...] += jnp.dot(a_ref[...], b_ref[...],
                            preferred_element_type=jnp.float32)

    @pl.when(k == pl.num_programs(2) - 1)
    def _():
        y = _apply_act(acc_ref[...] + bias_ref[...], act)
        o_ref[...] = y.astype(o_ref.dtype)


def matmul_bias_act(a, b, bias, act="none", out_dtype=jnp.float32):
    """(M,K) @ (K,N) + bias with fused activation.

    bf16 operands on the MXU, f32 accumulation.  Inputs are zero-padded to tile
    multiples (lane-dense stores); padding is sliced away afterwards.
    """
    M, K = a.shape
    N = b.shape[1]

    tm, Mp = _tile(M, 8, 512, 256)
    tk, Kp = _tile(K, 128, 1024, 512)
    tn, Np = _tile(N, 128, 512, 256)

    a_p = a.astype(jnp.bfloat16)
    if (Mp, Kp) != (M, K):
        a_p = jnp.pad(a_p, ((0, Mp - M), (0, Kp - K)))
    b_p = b.astype(jnp.bfloat16)
    if (Kp, Np) != (K, N):
        b_p = jnp.pad(b_p, ((0, Kp - K), (0, Np - N)))
    bias_p = bias.reshape(1, N).astype(jnp.float32)
    if Np != N:
        bias_p = jnp.pad(bias_p, ((0, 0), (0, Np - N)))

    nk = Kp // tk
    if nk == 1:
        out = pl.pallas_call(
            functools.partial(_matmul_bias_act_onek_kernel, act=act),
            out_shape=jax.ShapeDtypeStruct((Mp, Np), out_dtype),
            grid=(Mp // tm, Np // tn),
            in_specs=[
                pl.BlockSpec((tm, Kp), lambda i, j: (i, 0)),
                pl.BlockSpec((Kp, tn), lambda i, j: (0, j)),
                pl.BlockSpec((1, tn), lambda i, j: (0, j)),
            ],
            out_specs=pl.BlockSpec((tm, tn), lambda i, j: (i, j)),
            compiler_params=pltpu.CompilerParams(
                dimension_semantics=("parallel", "parallel")),
        )(a_p, b_p, bias_p)
    else:
        out = pl.pallas_call(
            functools.partial(_matmul_bias_act_kernel, act=act),
            out_shape=jax.ShapeDtypeStruct((Mp, Np), out_dtype),
            grid=(Mp // tm, Np // tn, nk),
            in_specs=[
                pl.BlockSpec((tm, tk), lambda i, j, k: (i, k)),
                pl.BlockSpec((tk, tn), lambda i, j, k: (k, j)),
                pl.BlockSpec((1, tn), lambda i, j, k: (0, j)),
            ],
            out_specs=pl.BlockSpec((tm, tn), lambda i, j, k: (i, j)),
            scratch_shapes=[pltpu.VMEM((tm, tn), jnp.float32)],
            compiler_params=pltpu.CompilerParams(
                dimension_semantics=("parallel", "parallel", "arbitrary")),
        )(a_p, b_p, bias_p)

    if (Mp, Np) != (M, N):
        out = out[:M, :N]
    return out


# ---------------------------------------------------------------------------
# Conv building blocks (im2col glue in JAX, matmul+bias+act in Pallas)
# ---------------------------------------------------------------------------
def conv2d_act(x, w, b, act="relu", out_dtype=jnp.float32):
    """3x3 conv, reflect padding=1, stride 1, fused bias + activation.

    x: (N,H,W,Cin) NHWC; w: (3,3,Cin,Cout); b: (Cout,).
    """
    N, H, W, C = x.shape
    KH, KW, _, Cout = w.shape
    pad = KH // 2
    xp = jnp.pad(x, ((0, 0), (pad, pad), (pad, pad), (0, 0)), mode="reflect")
    patches = [xp[:, kh:kh + H, kw:kw + W, :]
               for kh in range(KH) for kw in range(KW)]
    a = jnp.concatenate(patches, axis=-1).reshape(N * H * W, KH * KW * C)
    out = matmul_bias_act(a, w.reshape(KH * KW * C, Cout), b,
                          act=act, out_dtype=out_dtype)
    return out.reshape(N, H, W, Cout)


def conv_transpose_2x2(x, w, b):
    """ConvTranspose2d(kernel=2, stride=2).  x: (N,H,W,Cin), w: (Cin,2,2,Cout)."""
    N, H, W, Cin = x.shape
    Cout = w.shape[-1]
    a = x.reshape(N * H * W, Cin)
    y = matmul_bias_act(a, w.reshape(Cin, 4 * Cout), jnp.tile(b, 4),
                        act="none", out_dtype=jnp.bfloat16)
    # columns are (kh, kw, cout) major->minor: interleave into a 2x upsampled image
    y = y.reshape(N, H, W, 2, 2, Cout).transpose(0, 1, 3, 2, 4, 5)
    return y.reshape(N, 2 * H, 2 * W, Cout)


# ---------------------------------------------------------------------------
# Up module forward (matches the PyTorch `Up` with default DoubleConv)
# ---------------------------------------------------------------------------
def up_forward(x1_nchw, x2_nchw, params):
    x1 = jnp.transpose(x1_nchw, (0, 2, 3, 1)).astype(jnp.bfloat16)   # NCHW -> NHWC
    x2 = jnp.transpose(x2_nchw, (0, 2, 3, 1)).astype(jnp.bfloat16)

    # self.up = ConvTranspose2d(in_ch, in_ch // 2, kernel_size=2, stride=2)
    x1u = conv_transpose_2x2(x1, params["up_w"], params["up_b"])

    # F.pad to match x2's spatial size
    dy = x2.shape[1] - x1u.shape[1]
    dx = x2.shape[2] - x1u.shape[2]
    if dy != 0 or dx != 0:
        x1u = jnp.pad(x1u, ((0, 0), (dy // 2, dy - dy // 2),
                            (dx // 2, dx - dx // 2), (0, 0)))

    # torch.cat([x2, x1], dim=1)  -> channel concat in NHWC
    xcat = jnp.concatenate([x2, x1u], axis=-1)

    # DoubleConv(in_ch, out_ch): Conv3x3 reflect + ReLU, Conv3x3 reflect + ReLU
    y = conv2d_act(xcat, params["w1"], params["b1"], act="relu",
                   out_dtype=jnp.bfloat16)
    y = conv2d_act(y, params["w2"], params["b2"], act="relu",
                   out_dtype=jnp.float32)

    return jnp.transpose(y, (0, 3, 1, 2))                            # NHWC -> NCHW


# ---------------------------------------------------------------------------
# Deterministic parameter initialization (shapes follow Up.__init__)
# ---------------------------------------------------------------------------
def init_params(key, in_channels, out_channels):
    k = jax.random.split(key, 6)
    up_cout = in_channels // 2
    up_w = 0.05 * jax.random.normal(k[0], (in_channels, 2, 2, up_cout), jnp.float32)
    up_b = 0.05 * jax.random.normal(k[1], (up_cout,), jnp.float32)
    # DoubleConv(in_channels, out_channels): mid_channels defaults to out_channels
    w1 = 0.05 * jax.random.normal(k[2], (3, 3, in_channels, out_channels), jnp.float32)
    b1 = 0.05 * jax.random.normal(k[3], (out_channels,), jnp.float32)
    w2 = 0.05 * jax.random.normal(k[4], (3, 3, out_channels, out_channels), jnp.float32)
    b2 = 0.05 * jax.random.normal(k[5], (out_channels,), jnp.float32)
    return {"up_w": up_w, "up_b": up_b, "w1": w1, "b1": b1, "w2": w2, "b2": b2}


# ---------------------------------------------------------------------------
if __name__ == "__main__":
    # Up(in_channels=64, out_channels=32); x1 is the deep feature map, x2 the
    # skip connection at 2x spatial resolution with in_channels//2 channels.
    N, Cin, Cout = 2, 64, 32
    H1, W1 = 8, 8
    key = jax.random.PRNGKey(0)
    k1, k2, kp = jax.random.split(key, 3)
    x1 = jax.random.normal(k1, (N, Cin, H1, W1), jnp.float32)
    x2 = jax.random.normal(k2, (N, Cin // 2, 2 * H1, 2 * W1), jnp.float32)
    params = init_params(kp, Cin, Cout)

    fwd = jax.jit(up_forward)
    out = fwd(x1, x2, params)
    jax.block_until_ready(out)
    assert out.shape == (N, Cout, 2 * H1, 2 * W1), out.shape
    print("KERNEL_OK")
</pallas_src>

<mosaic_0001>
module attributes {stable_mosaic.version = 11 : i64} {
  func.func @_matmul_bias_act_onek_kernel(%arg0: i32, %arg1: i32, %arg2: memref<128x128xbf16, #tpu.memory_space<vmem>>, %arg3: memref<128x128xbf16, #tpu.memory_space<vmem>>, %arg4: memref<1x128xf32, #tpu.memory_space<vmem>>, %arg5: memref<128x128xbf16, #tpu.memory_space<vmem>>) attributes {dimension_semantics = [#tpu.dimension_semantics<parallel>, #tpu.dimension_semantics<parallel>], iteration_bounds = array<i64: 1, 1>, scalar_prefetch = 0 : i64, scratch_operands = 0 : i64, tpu.core_type = #tpu.core_type<tc>, window_params = [{transform_indices = @transform_0, window_bounds = array<i64: 128, 128>}, {transform_indices = @transform_1, window_bounds = array<i64: 128, 128>}, {transform_indices = @transform_2, window_bounds = array<i64: 1, 128>}, {transform_indices = @transform_3, window_bounds = array<i64: 128, 128>}]} {
    %c0 = arith.constant 0 : index
    %c0_0 = arith.constant 0 : index
    %0 = vector.load %arg2[%c0, %c0_0] : memref<128x128xbf16, #tpu.memory_space<vmem>>, vector<128x128xbf16>
    %c0_1 = arith.constant 0 : index
    %c0_2 = arith.constant 0 : index
    %1 = vector.load %arg3[%c0_1, %c0_2] : memref<128x128xbf16, #tpu.memory_space<vmem>>, vector<128x128xbf16>
    %cst = arith.constant dense<0.000000e+00> : vector<128x128xf32>
    %2 = tpu.matmul %0, %1, %cst {dimension_numbers = #tpu.dot_dimension_numbers<[1], [0], [0], [1], [0, 0, 1, 1], [], []>} : vector<128x128xbf16>, vector<128x128xbf16>, vector<128x128xf32> -> vector<128x128xf32>
    %c0_3 = arith.constant 0 : index
    %c0_4 = arith.constant 0 : index
    %3 = vector.load %arg4[%c0_3, %c0_4] : memref<1x128xf32, #tpu.memory_space<vmem>>, vector<1x128xf32>
    %4 = vector.broadcast %3 : vector<1x128xf32> to vector<128x128xf32>
    %5 = arith.addf %2, %4 : vector<128x128xf32>
    %6 = arith.truncf %5 : vector<128x128xf32> to vector<128x128xbf16>
    %c0_5 = arith.constant 0 : index
    %c0_6 = arith.constant 0 : index
    %7 = vector.load %arg5[%c0_5, %c0_6] : memref<128x128xbf16, #tpu.memory_space<vmem>>, vector<128x128xbf16>
    tpu.vector_store %arg5[%c0_5, %c0_6], %6 {strides = array<i32>} : memref<128x128xbf16, #tpu.memory_space<vmem>>, vector<128x128xbf16>,
    return
  }
  func.func @transform_0(%arg0: i32, %arg1: i32) -> (i32, i32) {
    %c0_i32 = arith.constant 0 : i32
    %c0_i32_0 = arith.constant 0 : i32
    return %arg0, %c0_i32 : i32, i32
  }
  func.func @transform_1(%arg0: i32, %arg1: i32) -> (i32, i32) {
    %c0_i32 = arith.constant 0 : i32
    %c0_i32_0 = arith.constant 0 : i32
    return %c0_i32, %arg1 : i32, i32
  }
  func.func @transform_2(%arg0: i32, %arg1: i32) -> (i32, i32) {
    %c0_i32 = arith.constant 0 : i32
    %c0_i32_0 = arith.constant 0 : i32
    return %c0_i32, %arg1 : i32, i32
  }
  func.func @transform_3(%arg0: i32, %arg1: i32) -> (i32, i32) {
    %c0_i32 = arith.constant 0 : i32
    return %arg0, %arg1 : i32, i32
  }
}

module attributes {stable_mosaic.version = 11 : i64} {
  func.func @_matmul_bias_act_onek_kernel(%arg0: i32, %arg1: i32, %arg2: memref<512x640xbf16, #tpu.memory_space<vmem>>, %arg3: memref<640x128xbf16, #tpu.memory_space<vmem>>, %arg4: memref<1x128xf32, #tpu.memory_space<vmem>>, %arg5: memref<512x128xbf16, #tpu.memory_space<vmem>>) attributes {dimension_semantics = [#tpu.dimension_semantics<parallel>, #tpu.dimension_semantics<parallel>], iteration_bounds = array<i64: 1, 1>, scalar_prefetch = 0 : i64, scratch_operands = 0 : i64, tpu.core_type = #tpu.core_type<tc>, window_params = [{transform_indices = @transform_0, window_bounds = array<i64: 512, 640>}, {transform_indices = @transform_1, window_bounds = array<i64: 640, 128>}, {transform_indices = @transform_2, window_bounds = array<i64: 1, 128>}, {transform_indices = @transform_3, window_bounds = array<i64: 512, 128>}]} {
    %c0 = arith.constant 0 : index
    %c0_0 = arith.constant 0 : index
    %0 = vector.load %arg2[%c0, %c0_0] : memref<512x640xbf16, #tpu.memory_space<vmem>>, vector<512x640xbf16>
    %c0_1 = arith.constant 0 : index
    %c0_2 = arith.constant 0 : index
    %1 = vector.load %arg3[%c0_1, %c0_2] : memref<640x128xbf16, #tpu.memory_space<vmem>>, vector<640x128xbf16>
    %cst = arith.constant dense<0.000000e+00> : vector<512x128xf32>
    %2 = tpu.matmul %0, %1, %cst {dimension_numbers = #tpu.dot_dimension_numbers<[1], [0], [0], [1], [0, 0, 1, 1], [], []>} : vector<512x640xbf16>, vector<640x128xbf16>, vector<512x128xf32> -> vector<512x128xf32>
    %c0_3 = arith.constant 0 : index
    %c0_4 = arith.constant 0 : index
    %3 = vector.load %arg4[%c0_3, %c0_4] : memref<1x128xf32, #tpu.memory_space<vmem>>, vector<1x128xf32>
    %4 = vector.broadcast %3 : vector<1x128xf32> to vector<512x128xf32>
    %5 = arith.addf %2, %4 : vector<512x128xf32>
    %cst_5 = arith.constant 0.000000e+00 : f32
    %6 = vector.broadcast %cst_5 : f32 to vector<512x128xf32>
    %7 = arith.maximumf %5, %6 : vector<512x128xf32>
    %8 = arith.truncf %7 : vector<512x128xf32> to vector<512x128xbf16>
    %c0_6 = arith.constant 0 : index
    %c0_7 = arith.constant 0 : index
    %9 = vector.load %arg5[%c0_6, %c0_7] : memref<512x128xbf16, #tpu.memory_space<vmem>>, vector<512x128xbf16>
    tpu.vector_store %arg5[%c0_6, %c0_7], %8 {strides = array<i32>} : memref<512x128xbf16, #tpu.memory_space<vmem>>, vector<512x128xbf16>,
    return
  }
  func.func @transform_0(%arg0: i32, %arg1: i32) -> (i32, i32) {
    %c0_i32 = arith.constant 0 : i32
    %c0_i32_0 = arith.constant 0 : i32
    return %arg0, %c0_i32 : i32, i32
  }
  func.func @transform_1(%arg0: i32, %arg1: i32) -> (i32, i32) {
    %c0_i32 = arith.constant 0 : i32
    %c0_i32_0 = arith.constant 0 : i32
    return %c0_i32, %arg1 : i32, i32
  }
  func.func @transform_2(%arg0: i32, %arg1: i32) -> (i32, i32) {
    %c0_i32 = arith.constant 0 : i32
    %c0_i32_0 = arith.constant 0 : i32
    return %c0_i32, %arg1 : i32, i32
  }
  func.func @transform_3(%arg0: i32, %arg1: i32) -> (i32, i32) {
    %c0_i32 = arith.constant 0 : i32
    return %arg0, %arg1 : i32, i32
  }
}

module attributes {stable_mosaic.version = 11 : i64} {
  func.func @_matmul_bias_act_onek_kernel(%arg0: i32, %arg1: i32, %arg2: memref<512x384xbf16, #tpu.memory_space<vmem>>, %arg3: memref<384x128xbf16, #tpu.memory_space<vmem>>, %arg4: memref<1x128xf32, #tpu.memory_space<vmem>>, %arg5: memref<512x128xf32, #tpu.memory_space<vmem>>) attributes {dimension_semantics = [#tpu.dimension_semantics<parallel>, #tpu.dimension_semantics<parallel>], iteration_bounds = array<i64: 1, 1>, scalar_prefetch = 0 : i64, scratch_operands = 0 : i64, tpu.core_type = #tpu.core_type<tc>, window_params = [{transform_indices = @transform_0, window_bounds = array<i64: 512, 384>}, {transform_indices = @transform_1, window_bounds = array<i64: 384, 128>}, {transform_indices = @transform_2, window_bounds = array<i64: 1, 128>}, {transform_indices = @transform_3, window_bounds = array<i64: 512, 128>}]} {
    %c0 = arith.constant 0 : index
    %c0_0 = arith.constant 0 : index
    %0 = vector.load %arg2[%c0, %c0_0] : memref<512x384xbf16, #tpu.memory_space<vmem>>, vector<512x384xbf16>
    %c0_1 = arith.constant 0 : index
    %c0_2 = arith.constant 0 : index
    %1 = vector.load %arg3[%c0_1, %c0_2] : memref<384x128xbf16, #tpu.memory_space<vmem>>, vector<384x128xbf16>
    %cst = arith.constant dense<0.000000e+00> : vector<512x128xf32>
    %2 = tpu.matmul %0, %1, %cst {dimension_numbers = #tpu.dot_dimension_numbers<[1], [0], [0], [1], [0, 0, 1, 1], [], []>} : vector<512x384xbf16>, vector<384x128xbf16>, vector<512x128xf32> -> vector<512x128xf32>
    %c0_3 = arith.constant 0 : index
    %c0_4 = arith.constant 0 : index
    %3 = vector.load %arg4[%c0_3, %c0_4] : memref<1x128xf32, #tpu.memory_space<vmem>>, vector<1x128xf32>
    %4 = vector.broadcast %3 : vector<1x128xf32> to vector<512x128xf32>
    %5 = arith.addf %2, %4 : vector<512x128xf32>
    %cst_5 = arith.constant 0.000000e+00 : f32
    %6 = vector.broadcast %cst_5 : f32 to vector<512x128xf32>
    %7 = arith.maximumf %5, %6 : vector<512x128xf32>
    %c0_6 = arith.constant 0 : index
    %c0_7 = arith.constant 0 : index
    %8 = vector.load %arg5[%c0_6, %c0_7] : memref<512x128xf32, #tpu.memory_space<vmem>>, vector<512x128xf32>
    tpu.vector_store %arg5[%c0_6, %c0_7], %7 {strides = array<i32>} : memref<512x128xf32, #tpu.memory_space<vmem>>, vector<512x128xf32>,
    return
  }
  func.func @transform_0(%arg0: i32, %arg1: i32) -> (i32, i32) {
    %c0_i32 = arith.constant 0 : i32
    %c0_i32_0 = arith.constant 0 : i32
    return %arg0, %c0_i32 : i32, i32
  }
  func.func @transform_1(%arg0: i32, %arg1: i32) -> (i32, i32) {
    %c0_i32 = arith.constant 0 : i32
    %c0_i32_0 = arith.constant 0 : i32
    return %c0_i32, %arg1 : i32, i32
  }
  func.func @transform_2(%arg0: i32, %arg1: i32) -> (i32, i32) {
    %c0_i32 = arith.constant 0 : i32
    %c0_i32_0 = arith.constant 0 : i32
    return %c0_i32, %arg1 : i32, i32
  }
  func.func @transform_3(%arg0: i32, %arg1: i32) -> (i32, i32) {
    %c0_i32 = arith.constant 0 : i32
    return %arg0, %arg1 : i32, i32
  }
}

</mosaic_0001>

<bundles_post_ra>
// kernel: tile.8
= control target key start
LH: loop header
LB: loop body
LE: loop exit
PB: predicated region body
PF: predicated region fallthrough
CT: control target
= control target key end

     0   :  { %s22_s0 = inlined_call_operand.vmem [shape: f32[32], index: 0, kind: input, shape index: {}]   ;;  %s23_s1 = inlined_call_operand.vmem [shape: f32[4,32], index: 1, kind: output, shape index: {}]  }
   0x1   :  { %v4_v0 = vld [vmem:[%s22_s0] ss:$0 sm:$0xff] }
   0x2   :  { %5 = vst [vmem:[%s23_s1] sm:$0xf] %v4_v0 }

// kernel: tile.9
= control target key start
LH: loop header
LB: loop body
LE: loop exit
PB: predicated region body
PF: predicated region fallthrough
CT: control target
= control target key end

     0   :  { %s37_s8 = smov 32   ;;  %s38_s9 = smov 64   ;;  %vm7_vm0 = vcmask 261120   ;;  %vm13_vm1 = vcmask 1048320   ;;  %vm19_vm2 = vcmask 785920   ;;  %vm25_vm3 = vcmask 523520   ;;  %s55_s0 = inlined_call_operand.vmem [shape: f32[4,32], index: 0, kind: input, shape index: {}]   ;;  %s56_s1 = inlined_call_operand.vmem [shape: f32[1,128], index: 1, kind: output, shape index: {}]  }
   0x1   :  { %v4_v0 = vld [vmem:[%s55_s0] sm:$0xf]  ;;  %s36_s0 = smov 96  }
   0x2   :  { %5 = vst [vmem:[#allocation1] sm:$0xf] %v4_v0 }
   0x9   :  { %v10_v1 = vld [vmem:[#allocation1 + $0x3] sm:$0x1]   ;;  %v22_v2 = vld [vmem:[#allocation1 + $0x1] sm:$0x1]   ;;  %v16_v3 = vld [vmem:[#allocation1 + $0x2] sm:$0x1]  }
   0xa   :  { %11 = vrot.lane.b32.xlu0 %v10_v1, %s36_s0  ;;  %23 = vrot.lane.b32.xlu1 %v22_v2, %s37_s8  ;;  %v6_v4 = vld [vmem:[#allocation1] sm:$0x1]  }
   0xb   :  { %8 = vst.msk [vmem:[#allocation0] sm:$0x1] %vm7_vm0, %v6_v4  }
  0x12   :  { %17 = vrot.lane.b32.xlu0 %v16_v3, %s38_s9 }
  0x7c   :  { %v12_v5 = vpop.permute.xlu0 %11   ;;  %v24_v6 = vpop.permute.xlu1 %23  }
  0x7d   :  { %14 = vst.msk [vmem:[#allocation0] sm:$0x1] %vm13_vm1, %v12_v5  }
  0x84   :  { %v18_v7 = vpop.permute.xlu0 %17  }
  0x85   :  { %20 = vst.msk [vmem:[#allocation0] sm:$0x1] %vm19_vm2, %v18_v7  }
  0x86   :  { %26 = vst.msk [vmem:[#allocation0] sm:$0x1] %vm25_vm3, %v24_v6  }
  0x8d   :  { %v29_v8 = vld [vmem:[#allocation0] sm:$0x1] }
  0x8e   :  { %32 = vst [vmem:[%s56_s1] sm:$0x1] %v29_v8 }

// kernel: up_forward.3
= control target key start
LH: loop header
LB: loop body
LE: loop exit
PB: predicated region body
PF: predicated region fallthrough
CT: control target
= control target key end

     0   :  { %s478_s1 = inlined_call_operand.vmem [shape: bf16[128,128], index: 1, kind: input, shape index: {}]   ;;  %s479_s2 = inlined_call_operand.vmem [shape: f32[1,128], index: 2, kind: input, shape index: {}]   ;;  %s480_s0 = inlined_call_operand.vmem [shape: bf16[128,128], index: 0, kind: input, shape index: {}]   ;;  %s481_s3 = inlined_call_operand.vmem [shape: bf16[128,128], index: 3, kind: output, shape index: {}]  }
   0x1   :  { %v310_v0 = vld [vmem:[%s478_s1 + $0x38] sm:$0xff]  ;;  %v309_v1 = vld [vmem:[%s478_s1 + $0x30] sm:$0xff]  ;;  %v308_v2 = vld [vmem:[%s478_s1 + $0x28] sm:$0xff] }
   0x2   :  { %146 = vmatpush.bf16.msra.mxu0 %v310_v0  ;;  %358 = vmatpush.bf16.msra.mxu1 %v310_v0  ;;  %v307_v3 = vld [vmem:[%s478_s1 + $0x20] sm:$0xff]  ;;  %v306_v4 = vld [vmem:[%s478_s1 + $0x18] sm:$0xff]  ;;  %v305_v5 = vld [vmem:[%s478_s1 + $0x10] sm:$0xff] }
   0x3   :  { %359 = vmatpush.bf16.msra.mxu2 %v310_v0  ;;  %360 = vmatpush.bf16.msra.mxu3 %v310_v0  ;;  %v304_v6 = vld [vmem:[%s478_s1 + $0x8] sm:$0xff]  ;;  %v303_v7 = vld [vmem:[%s478_s1] sm:$0xff]  ;;  %v297_v9 = vld [vmem:[%s480_s0 + $0x10] sm:$0xff] }
   0x4   :  { %v295_v8 = vld [vmem:[%s480_s0] sm:$0xff]  ;;  %v301_v11 = vld [vmem:[%s480_s0 + $0x30] sm:$0xff]  ;;  %v296_v12 = vld [vmem:[%s480_s0 + $0x8] sm:$0xff] }
   0x5   :  { %v299_v10 = vld [vmem:[%s480_s0 + $0x20] sm:$0xff]  ;;  %v298_v13 = vld [vmem:[%s480_s0 + $0x18] sm:$0xff]  ;;  %v300_v14 = vld [vmem:[%s480_s0 + $0x28] sm:$0xff] }
   0x6   :  { %147 = vmatpush.bf16.msra.mxu0 %v309_v1  ;;  %361 = vmatpush.bf16.msra.mxu1 %v309_v1  ;;  %v302_v15 = vld [vmem:[%s480_s0 + $0x38] sm:$0xff]  ;;  %v382_v18 = vld [vmem:[%s479_s2] ss:$0 sm:$0xff] }
   0x7   :  { %362 = vmatpush.bf16.msra.mxu2 %v309_v1  ;;  %363 = vmatpush.bf16.msra.mxu3 %v309_v1 }
   0xa   :  { %148 = vmatpush.bf16.msra.mxu0 %v308_v2  ;;  %364 = vmatpush.bf16.msra.mxu1 %v308_v2 }
   0xb   :  { %365 = vmatpush.bf16.msra.mxu2 %v308_v2  ;;  %366 = vmatpush.bf16.msra.mxu3 %v308_v2 }
   0xe   :  { %149 = vmatpush.bf16.msra.mxu0 %v307_v3  ;;  %367 = vmatpush.bf16.msra.mxu1 %v307_v3 }
   0xf   :  { %368 = vmatpush.bf16.msra.mxu2 %v307_v3  ;;  %369 = vmatpush.bf16.msra.mxu3 %v307_v3 }
  0x12   :  { %150 = vmatpush.bf16.msra.mxu0 %v306_v4  ;;  %370 = vmatpush.bf16.msra.mxu1 %v306_v4 }
  0x13   :  { %371 = vmatpush.bf16.msra.mxu2 %v306_v4  ;;  %372 = vmatpush.bf16.msra.mxu3 %v306_v4 }
  0x16   :  { %151 = vmatpush.bf16.msra.mxu0 %v305_v5  ;;  %373 = vmatpush.bf16.msra.mxu1 %v305_v5 }
  0x17   :  { %374 = vmatpush.bf16.msra.mxu2 %v305_v5  ;;  %375 = vmatpush.bf16.msra.mxu3 %v305_v5 }
  0x1a   :  { %152 = vmatpush.bf16.msra.mxu0 %v304_v6  ;;  %376 = vmatpush.bf16.msra.mxu1 %v304_v6 }
  0x1b   :  { %377 = vmatpush.bf16.msra.mxu2 %v304_v6  ;;  %378 = vmatpush.bf16.msra.mxu3 %v304_v6 }
  0x1e   :  { %153 = vmatpush.bf16.msra.mxu0 %v303_v7  ;;  %379 = vmatpush.bf16.msra.mxu1 %v303_v7 }
  0x1f   :  { %380 = vmatpush.bf16.msra.mxu2 %v303_v7  ;;  %381 = vmatpush.bf16.msra.mxu3 %v303_v7 }
  0x21   :  { %154 = vmatmul.bf16.vlgmr.msra.gmra.mxu0 %v295_v8  ;;  %164 = vmatmul.bf16.vlgmr.msra.gmra.mxu1 %v297_v9 }
  0x22   :  { %174 = vmatmul.bf16.vlgmr.msra.gmra.mxu2 %v299_v10  ;;  %184 = vmatmul.bf16.vlgmr.msra.gmra.mxu3 %v301_v11 }
  0x31   :  { %159 = vmatmul.bf16.gmra.mxu0 %v296_v12  ;;  %169 = vmatmul.bf16.gmra.mxu1 %v298_v13 }
  0x32   :  { %179 = vmatmul.bf16.gmra.mxu2 %v300_v14  ;;  %189 = vmatmul.bf16.gmra.mxu3 %v302_v15 }
  0x9e   :  { %v155_v16 = vpop.f32.mrf.mxu0  ;;  %v165_v17 = vpop.f32.mrf.mxu1 }
  0x9f   :  { %v156_v23 = vadd.f32 %v382_v18, %v155_v16  ;;  %v166_v24 = vadd.f32 %v382_v18, %v165_v17 }
  0xa5   :  { %v175_v19 = vpop.f32.mrf.mxu2  ;;  %v185_v20 = vpop.f32.mrf.mxu3 }
  0xa6   :  { %v157_v21 = vpop.f32.mrf.mxu0  ;;  %v167_v22 = vpop.f32.mrf.mxu1  ;;  %v176_v31 = vadd.f32 %v382_v18, %v175_v19  ;;  %v186_v32 = vadd.f32 %v382_v18, %v185_v20 }
  0xa7   :  { %v158_v25 = vadd.f32 %v382_v18, %v157_v21  ;;  %v168_v26 = vadd.f32 %v382_v18, %v167_v22 }
  0xa9   :  { %v314_v27 = vpack.c.bf16 %v158_v25, %v156_v23  ;;  %v324_v28 = vpack.c.bf16 %v168_v26, %v166_v24 }
  0xab   :  { %315 = vst [vmem:[%s481_s3] sm:$0xff] %v314_v27  }
  0xac   :  { %352 = vst [vmem:[%s481_s3 + $0x10] sm:$0xff] %v324_v28  }
  0xad   :  { %v177_v29 = vpop.f32.mrf.mxu2  ;;  %v187_v30 = vpop.f32.mrf.mxu3 }
  0xae   :  { %v178_v33 = vadd.f32 %v382_v18, %v177_v29  ;;  %v188_v34 = vadd.f32 %v382_v18, %v187_v30  ;;  %v160_v35 = vpop.f32.mrf.mxu0  ;;  %v170_v36 = vpop.f32.mrf.mxu1 }
  0xaf   :  { %v161_v43 = vadd.f32 %v382_v18, %v160_v35  ;;  %v171_v44 = vadd.f32 %v382_v18, %v170_v36 }
  0xb0   :  { %v334_v37 = vpack.c.bf16 %v178_v33, %v176_v31  ;;  %v344_v38 = vpack.c.bf16 %v188_v34, %v186_v32 }
  0xb2   :  { %354 = vst [vmem:[%s481_s3 + $0x20] sm:$0xff] %v334_v37  }
  0xb3   :  { %356 = vst [vmem:[%s481_s3 + $0x30] sm:$0xff] %v344_v38  }
  0xb5   :  { %v180_v39 = vpop.f32.mrf.mxu2  ;;  %v190_v40 = vpop.f32.mrf.mxu3 }
  0xb6   :  { %v162_v41 = vpop.f32.mrf.mxu0  ;;  %v172_v42 = vpop.f32.mrf.mxu1  ;;  %v181_v51 = vadd.f32 %v382_v18, %v180_v39  ;;  %v191_v52 = vadd.f32 %v382_v18, %v190_v40 }
  0xb7   :  { %v163_v45 = vadd.f32 %v382_v18, %v162_v41  ;;  %v173_v46 = vadd.f32 %v382_v18, %v172_v42 }
  0xb9   :  { %v319_v47 = vpack.c.bf16 %v163_v45, %v161_v43  ;;  %v329_v48 = vpack.c.bf16 %v173_v46, %v171_v44 }
  0xbb   :  { %351 = vst [vmem:[%s481_s3 + $0x8] sm:$0xff] %v319_v47  }
  0xbc   :  { %353 = vst [vmem:[%s481_s3 + $0x18] sm:$0xff] %v329_v48  }
  0xbd   :  { %v182_v49 = vpop.f32.mrf.mxu2  ;;  %v192_v50 = vpop.f32.mrf.mxu3 }
  0xbe   :  { %v183_v53 = vadd.f32 %v382_v18, %v182_v49  ;;  %v193_v54 = vadd.f32 %v382_v18, %v192_v50 }
  0xc0   :  { %v339_v55 = vpack.c.bf16 %v183_v53, %v181_v51  ;;  %v349_v56 = vpack.c.bf16 %v193_v54, %v191_v52 }
  0xc2   :  { %355 = vst [vmem:[%s481_s3 + $0x28] sm:$0xff] %v339_v55  }
  0xc3   :  { %357 = vst [vmem:[%s481_s3 + $0x38] sm:$0xff] %v349_v56  }

// kernel: up_forward.4
= control target key start
LH: loop header
LB: loop body
LE: loop exit
PB: predicated region body
PF: predicated region fallthrough
CT: control target
= control target key end

     0   :  { %s5084_s1 = inlined_call_operand.vmem [shape: bf16[640,128], index: 1, kind: input, shape index: {}]   ;;  %s5085_s2 = inlined_call_operand.vmem [shape: f32[1,128], index: 2, kind: input, shape index: {}]   ;;  %s5086_s0 = inlined_call_operand.vmem [shape: bf16[512,640], index: 0, kind: input, shape index: {}]   ;;  %s5087_s3 = inlined_call_operand.vmem [shape: bf16[512,128], index: 3, kind: output, shape index: {}]  }
   0x1   :  { %v3370_v0 = vld [vmem:[%s5084_s1 + $0x38] sm:$0xff]  ;;  %v3369_v1 = vld [vmem:[%s5084_s1 + $0x30] sm:$0xff]  ;;  %v3368_v2 = vld [vmem:[%s5084_s1 + $0x28] sm:$0xff] }
   0x2   :  { %3594 = vmatpush.bf16.msra.mxu1 %v3370_v0  ;;  %3595 = vmatpush.bf16.msra.mxu2 %v3370_v0  ;;  %v3367_v3 = vld [vmem:[%s5084_s1 + $0x20] sm:$0xff]  ;;  %v3366_v4 = vld [vmem:[%s5084_s1 + $0x18] sm:$0xff]  ;;  %v3365_v5 = vld [vmem:[%s5084_s1 + $0x10] sm:$0xff] }
   0x3   :  { %3596 = vmatpush.bf16.msra.mxu3 %v3370_v0  ;;  %1362 = vmatpush.bf16.msra.mxu0 %v3370_v0  ;;  %v3364_v6 = vld [vmem:[%s5084_s1 + $0x8] sm:$0xff]  ;;  %v3363_v7 = vld [vmem:[%s5084_s1] sm:$0xff]  ;;  %v3245_v9 = vld [vmem:[%s5086_s0 + $0x150] sm:$0xf0] }
   0x4   :  { %v2565_v8 = vld [vmem:[%s5086_s0 + $0x140] sm:$0xf]  ;;  %v3285_v11 = vld [vmem:[%s5086_s0 + $0x290] sm:$0xf0]  ;;  %v3386_v16 = vld [vmem:[%s5084_s1 + $0xb8] sm:$0xff] }
   0x5   :  { %v2725_v10 = vld [vmem:[%s5086_s0 + $0x280] sm:$0xf]  ;;  %v3325_v13 = vld [vmem:[%s5086_s0 + $0x3d0] sm:$0xf0]  ;;  %v3394_v17 = vld [vmem:[%s5084_s1 + $0xf8] sm:$0xff]  ;;  %v2566_v18 = vor.u32 %v3245_v9, %v2565_v8 }
   0x6   :  { %3597 = vmatpush.bf16.msra.mxu1 %v3369_v1  ;;  %3598 = vmatpush.bf16.msra.mxu2 %v3369_v1  ;;  %v2885_v12 = vld [vmem:[%s5086_s0 + $0x3c0] sm:$0xf]  ;;  %v3205_v15 = vld [vmem:[%s5086_s0 + $0x10] sm:$0xf0]  ;;  %v2726_v19 = vor.u32 %v3285_v11, %v2725_v10  ;;  %v3378_v22 = vld [vmem:[%s5084_s1 + $0x78] sm:$0xff] }
   0x7   :  { %3599 = vmatpush.bf16.msra.mxu3 %v3369_v1  ;;  %1363 = vmatpush.bf16.msra.mxu0 %v3369_v1  ;;  %v2405_v14 = vld [vmem:[%s5086_s0] sm:$0xf]  ;;  %v2886_v20 = vor.u32 %v3325_v13, %v2885_v12  ;;  %v3402_v23 = vld [vmem:[%s5084_s1 + $0x138] sm:$0xff]  ;;  %v3385_v24 = vld [vmem:[%s5084_s1 + $0xb0] sm:$0xff] }
   0x8   :  { %v2406_v21 = vor.u32 %v3205_v15, %v2405_v14  ;;  %v3393_v25 = vld [vmem:[%s5084_s1 + $0xf0] sm:$0xff]  ;;  %v3384_v28 = vld [vmem:[%s5084_s1 + $0xa8] sm:$0xff]  ;;  %v3250_v33 = vld [vmem:[%s5086_s0 + $0x178] sm:$0xf0] }
   0x9   :  { %v3377_v26 = vld [vmem:[%s5084_s1 + $0x70] sm:$0xff]  ;;  %v3392_v29 = vld [vmem:[%s5084_s1 + $0xe8] sm:$0xff]  ;;  %v3290_v35 = vld [vmem:[%s5086_s0 + $0x2b8] sm:$0xf0] }
   0xa   :  { %3600 = vmatpush.bf16.msra.mxu1 %v3368_v2  ;;  %3601 = vmatpush.bf16.msra.mxu2 %v3368_v2  ;;  %v3401_v27 = vld [vmem:[%s5084_s1 + $0x130] sm:$0xff]  ;;  %v3376_v30 = vld [vmem:[%s5084_s1 + $0x68] sm:$0xff]  ;;  %v3330_v37 = vld [vmem:[%s5086_s0 + $0x3f8] sm:$0xf0] }
   0xb   :  { %3602 = vmatpush.bf16.msra.mxu3 %v3368_v2  ;;  %1364 = vmatpush.bf16.msra.mxu0 %v3368_v2  ;;  %v3400_v31 = vld [vmem:[%s5084_s1 + $0x128] sm:$0xff]  ;;  %v3210_v39 = vld [vmem:[%s5086_s0 + $0x38] sm:$0xf0]  ;;  %v3383_v44 = vld [vmem:[%s5084_s1 + $0xa0] sm:$0xff] }
   0xc   :  { %v2585_v32 = vld [vmem:[%s5086_s0 + $0x168] sm:$0xf]  ;;  %v3391_v45 = vld [vmem:[%s5084_s1 + $0xe0] sm:$0xff]  ;;  %v2605_v48 = vld [vmem:[%s5086_s0 + $0x190] sm:$0xf] }
   0xd   :  { %v2745_v34 = vld [vmem:[%s5086_s0 + $0x2a8] sm:$0xf]  ;;  %v2586_v40 = vor.u32 %v3250_v33, %v2585_v32  ;;  %v3375_v46 = vld [vmem:[%s5084_s1 + $0x60] sm:$0xff]  ;;  %v2765_v50 = vld [vmem:[%s5086_s0 + $0x2d0] sm:$0xf] }
   0xe   :  { %3603 = vmatpush.bf16.msra.mxu1 %v3367_v3  ;;  %3604 = vmatpush.bf16.msra.mxu2 %v3367_v3  ;;  %v2905_v36 = vld [vmem:[%s5086_s0 + $0x3e8] sm:$0xf]  ;;  %v2746_v41 = vor.u32 %v3290_v35, %v2745_v34  ;;  %v3399_v47 = vld [vmem:[%s5084_s1 + $0x120] sm:$0xff]  ;;  %v2925_v52 = vld [vmem:[%s5086_s0 + $0x410] sm:$0xf] }
   0xf   :  { %3605 = vmatpush.bf16.msra.mxu3 %v3367_v3  ;;  %1365 = vmatpush.bf16.msra.mxu0 %v3367_v3  ;;  %v2425_v38 = vld [vmem:[%s5086_s0 + $0x28] sm:$0xf]  ;;  %v2906_v42 = vor.u32 %v3330_v37, %v2905_v36  ;;  %v3255_v49 = vld [vmem:[%s5086_s0 + $0x1a0] sm:$0xf0]  ;;  %v2445_v54 = vld [vmem:[%s5086_s0 + $0x50] sm:$0xf] }
  0x10   :  { %v2426_v43 = vor.u32 %v3210_v39, %v2425_v38  ;;  %v3295_v51 = vld [vmem:[%s5086_s0 + $0x2e0] sm:$0xf0]  ;;  %v2606_v56 = vor.u32 %v3255_v49, %v2605_v48  ;;  %v3382_v60 = vld [vmem:[%s5084_s1 + $0x98] sm:$0xff]  ;;  %v3260_v1 = vld [vmem:[%s5086_s0 + $0x1c8] sm:$0xf0] }
  0x11   :  { %v3335_v53 = vld [vmem:[%s5086_s0 + $0x420] sm:$0xf0]  ;;  %v2766_v57 = vor.u32 %v3295_v51, %v2765_v50  ;;  %v3390_v61 = vld [vmem:[%s5084_s1 + $0xd8] sm:$0xff]  ;;  %v3300_v3 = vld [vmem:[%s5086_s0 + $0x308] sm:$0xf0] }
  0x12   :  { %3606 = vmatpush.bf16.msra.mxu1 %v3366_v4  ;;  %3607 = vmatpush.bf16.msra.mxu2 %v3366_v4  ;;  %v3215_v55 = vld [vmem:[%s5086_s0 + $0x60] sm:$0xf0]  ;;  %v2926_v58 = vor.u32 %v3335_v53, %v2925_v52  ;;  %v3374_v62 = vld [vmem:[%s5084_s1 + $0x58] sm:$0xff]  ;;  %v3381_v12 = vld [vmem:[%s5084_s1 + $0x90] sm:$0xff] }
  0x13   :  { %3608 = vmatpush.bf16.msra.mxu3 %v3366_v4  ;;  %1366 = vmatpush.bf16.msra.mxu0 %v3366_v4  ;;  %v2446_v59 = vor.u32 %v3215_v55, %v2445_v54  ;;  %v3398_v63 = vld [vmem:[%s5084_s1 + $0x118] sm:$0xff]  ;;  %v3389_v13 = vld [vmem:[%s5084_s1 + $0xd0] sm:$0xff]  ;;  %v2665_v32 = vld [vmem:[%s5086_s0 + $0x208] sm:$0xf] }
  0x14   :  { %v2625_v0 = vld [vmem:[%s5086_s0 + $0x1b8] sm:$0xf]  ;;  %v3373_v14 = vld [vmem:[%s5084_s1 + $0x50] sm:$0xff]  ;;  %v3270_v33 = vld [vmem:[%s5086_s0 + $0x218] sm:$0xf0] }
  0x15   :  { %v2785_v2 = vld [vmem:[%s5086_s0 + $0x2f8] sm:$0xf]  ;;  %v2626_v8 = vor.u32 %v3260_v1, %v2625_v0  ;;  %v3397_v15 = vld [vmem:[%s5084_s1 + $0x110] sm:$0xff]  ;;  %v2825_v34 = vld [vmem:[%s5086_s0 + $0x348] sm:$0xf] }
  0x16   :  { %3609 = vmatpush.bf16.msra.mxu1 %v3365_v5  ;;  %3610 = vmatpush.bf16.msra.mxu2 %v3365_v5  ;;  %v2945_v4 = vld [vmem:[%s5086_s0 + $0x438] sm:$0xf]  ;;  %v2786_v9 = vor.u32 %v3300_v3, %v2785_v2  ;;  %v3310_v35 = vld [vmem:[%s5086_s0 + $0x358] sm:$0xf0]  ;;  %v2985_v36 = vld [vmem:[%s5086_s0 + $0x488] sm:$0xf] }
  0x17   :  { %3611 = vmatpush.bf16.msra.mxu3 %v3365_v5  ;;  %1367 = vmatpush.bf16.msra.mxu0 %v3365_v5  ;;  %v3340_v5 = vld [vmem:[%s5086_s0 + $0x448] sm:$0xf0]  ;;  %v3350_v37 = vld [vmem:[%s5086_s0 + $0x498] sm:$0xf0]  ;;  %v2505_v38 = vld [vmem:[%s5086_s0 + $0xc8] sm:$0xf] }
  0x18   :  { %v2946_v10 = vor.u32 %v3340_v5, %v2945_v4  ;;  %v3230_v39 = vld [vmem:[%s5086_s0 + $0xd8] sm:$0xf0]  ;;  %v2685_v48 = vld [vmem:[%s5086_s0 + $0x230] sm:$0xf]  ;;  %v3275_v49 = vld [vmem:[%s5086_s0 + $0x240] sm:$0xf0] }
  0x19   :  { %v2845_v50 = vld [vmem:[%s5086_s0 + $0x370] sm:$0xf]  ;;  %v3315_v51 = vld [vmem:[%s5086_s0 + $0x380] sm:$0xf0]  ;;  %v3025_v0 = vld [vmem:[%s5086_s0 + $0x4d8] sm:$0xf] }
  0x1a   :  { %3612 = vmatpush.bf16.msra.mxu1 %v3364_v6  ;;  %3613 = vmatpush.bf16.msra.mxu2 %v3364_v6  ;;  %v3005_v52 = vld [vmem:[%s5086_s0 + $0x4b0] sm:$0xf]  ;;  %v3355_v53 = vld [vmem:[%s5086_s0 + $0x4c0] sm:$0xf0]  ;;  %v3360_v1 = vld [vmem:[%s5086_s0 + $0x4e8] sm:$0xf0] }
  0x1b   :  { %3614 = vmatpush.bf16.msra.mxu3 %v3364_v6  ;;  %1368 = vmatpush.bf16.msra.mxu0 %v3364_v6  ;;  %v2465_v6 = vld [vmem:[%s5086_s0 + $0x78] sm:$0xf]  ;;  %v2525_v54 = vld [vmem:[%s5086_s0 + $0xf0] sm:$0xf]  ;;  %v3235_v55 = vld [vmem:[%s5086_s0 + $0x100] sm:$0xf0] }
  0x1c   :  { %v2545_v2 = vld [vmem:[%s5086_s0 + $0x118] sm:$0xf]  ;;  %v3240_v3 = vld [vmem:[%s5086_s0 + $0x128] sm:$0xf0] }
  0x1e   :  { %3615 = vmatpush.bf16.msra.mxu1 %v3363_v7  ;;  %3616 = vmatpush.bf16.msra.mxu2 %v3363_v7 }
  0x1f   :  { %3617 = vmatpush.bf16.msra.mxu3 %v3363_v7  ;;  %1369 = vmatpush.bf16.msra.mxu0 %v3363_v7  ;;  %v3220_v7 = vld [vmem:[%s5086_s0 + $0x88] sm:$0xf0] }
  0x20   :  { %v2466_v11 = vor.u32 %v3220_v7, %v2465_v6  ;;  %v3026_v6 = vor.u32 %v3360_v1, %v3025_v0  ;;  %v2546_v7 = vor.u32 %v3240_v3, %v2545_v2  ;;  %v3218_v2 = vld [vmem:[%s5086_s0 + $0x7c] sm:$0xf]  ;;  %v2467_v3 = vld [vmem:[%s5086_s0 + $0x8c] sm:$0xf0] }
  0x21   :  { %1410 = vmatmul.bf16.vlgmr.msra.gmra.mxu1 %v2566_v18  ;;  %1450 = vmatmul.bf16.vlgmr.msra.gmra.mxu2 %v2726_v19  ;;  %v2805_v18 = vld [vmem:[%s5086_s0 + $0x320] sm:$0xf]  ;;  %v3305_v19 = vld [vmem:[%s5086_s0 + $0x330] sm:$0xf0] }
  0x22   :  { %1700 = vmatpush.bf16.msrb.mxu2 %v3386_v16  ;;  %1490 = vmatmul.bf16.vlgmr.msra.gmra.mxu3 %v2886_v20  ;;  %v2645_v16 = vld [vmem:[%s5086_s0 + $0x1e0] sm:$0xf] }
  0x23   :  { %1869 = vmatpush.bf16.msrb.mxu3 %v3394_v17  ;;  %1370 = vmatmul.bf16.vlgmr.msra.gmra.mxu0 %v2406_v21  ;;  %v3265_v17 = vld [vmem:[%s5086_s0 + $0x1f0] sm:$0xf0]  ;;  %v2965_v20 = vld [vmem:[%s5086_s0 + $0x460] sm:$0xf] }
  0x24   :  { %1531 = vmatpush.bf16.msrb.mxu1 %v3378_v22  ;;  %2038 = vmatpush.bf16.msrb.mxu0 %v3402_v23  ;;  %v3345_v21 = vld [vmem:[%s5086_s0 + $0x470] sm:$0xf0]  ;;  %v2485_v22 = vld [vmem:[%s5086_s0 + $0xa0] sm:$0xf] }
  0x25   :  { %v3225_v23 = vld [vmem:[%s5086_s0 + $0xb0] sm:$0xf0] }
  0x26   :  { %1701 = vmatpush.bf16.msrb.mxu2 %v3385_v24  ;;  %v2646_v24 = vor.u32 %v3265_v17, %v2645_v16 }
  0x27   :  { %1870 = vmatpush.bf16.msrb.mxu3 %v3393_v25  ;;  %v2806_v25 = vor.u32 %v3305_v19, %v2805_v18 }
  0x28   :  { %1532 = vmatpush.bf16.msrb.mxu1 %v3377_v26  ;;  %2039 = vmatpush.bf16.msrb.mxu0 %v3401_v27  ;;  %v2966_v26 = vor.u32 %v3345_v21, %v2965_v20  ;;  %v2486_v27 = vor.u32 %v3225_v23, %v2485_v22 }
  0x2a   :  { %1702 = vmatpush.bf16.msrb.mxu2 %v3384_v28  ;;  %v3380_v28 = vld [vmem:[%s5084_s1 + $0x88] sm:$0xff] }
  0x2b   :  { %1871 = vmatpush.bf16.msrb.mxu3 %v3392_v29  ;;  %v3388_v29 = vld [vmem:[%s5084_s1 + $0xc8] sm:$0xff] }
  0x2c   :  { %1533 = vmatpush.bf16.msrb.mxu1 %v3376_v30  ;;  %2040 = vmatpush.bf16.msrb.mxu0 %v3400_v31  ;;  %v3372_v30 = vld [vmem:[%s5084_s1 + $0x48] sm:$0xff] }
  0x2d   :  { %v3396_v31 = vld [vmem:[%s5084_s1 + $0x108] sm:$0xff] }
  0x2e   :  { %1703 = vmatpush.bf16.msrb.mxu2 %v3383_v44  ;;  %v3379_v44 = vld [vmem:[%s5084_s1 + $0x80] sm:$0xff] }
  0x2f   :  { %1872 = vmatpush.bf16.msrb.mxu3 %v3391_v45  ;;  %v3387_v45 = vld [vmem:[%s5084_s1 + $0xc0] sm:$0xff] }
  0x30   :  { %1534 = vmatpush.bf16.msrb.mxu1 %v3375_v46  ;;  %2041 = vmatpush.bf16.msrb.mxu0 %v3399_v47  ;;  %v3371_v46 = vld [vmem:[%s5084_s1 + $0x40] sm:$0xff] }
  0x31   :  { %1415 = vmatmul.bf16.gmra.mxu1 %v2586_v40  ;;  %1455 = vmatmul.bf16.gmra.mxu2 %v2746_v41  ;;  %v2666_v40 = vor.u32 %v3270_v33, %v2665_v32  ;;  %v2826_v41 = vor.u32 %v3310_v35, %v2825_v34  ;;  %v3395_v47 = vld [vmem:[%s5084_s1 + $0x100] sm:$0xff]  ;;  %v2441_v32 = vld [vmem:[%s5086_s0 + $0x38] sm:$0xf]  ;;  %v3212_v33 = vld [vmem:[%s5086_s0 + $0x48] sm:$0xf0] }
  0x32   :  { %1495 = vmatmul.bf16.gmra.mxu3 %v2906_v42  ;;  %1704 = vmatpush.bf16.msrb.mxu2 %v3382_v60  ;;  %v2986_v42 = vor.u32 %v3350_v37, %v2985_v36  ;;  %v2705_v60 = vld [vmem:[%s5086_s0 + $0x258] sm:$0xf] }
  0x33   :  { %1375 = vmatmul.bf16.gmra.mxu0 %v2426_v43  ;;  %1873 = vmatpush.bf16.msrb.mxu3 %v3390_v61  ;;  %v2506_v43 = vor.u32 %v3230_v39, %v2505_v38  ;;  %v3280_v61 = vld [vmem:[%s5086_s0 + $0x268] sm:$0xf0] }
  0x34   :  { %1535 = vmatpush.bf16.msrb.mxu1 %v3374_v62  ;;  %2042 = vmatpush.bf16.msrb.mxu0 %v3398_v63  ;;  %v2865_v62 = vld [vmem:[%s5086_s0 + $0x398] sm:$0xf]  ;;  %v3320_v63 = vld [vmem:[%s5086_s0 + $0x3a8] sm:$0xf0]  ;;  %v2706_v4 = vor.u32 %v3280_v61, %v2705_v60 }
  0x35   :  { %v2866_v5 = vor.u32 %v3320_v63, %v2865_v62 }
  0x36   :  { %1705 = vmatpush.bf16.msrb.mxu2 %v3381_v12  ;;  %v3204_v12 = vld [vmem:[%s5086_s0 + $0xc] sm:$0xf] }
  0x37   :  { %1874 = vmatpush.bf16.msrb.mxu3 %v3389_v13  ;;  %v2415_v13 = vld [vmem:[%s5086_s0 + $0x1c] sm:$0xf0] }
  0x38   :  { %1536 = vmatpush.bf16.msrb.mxu1 %v3373_v14  ;;  %2043 = vmatpush.bf16.msrb.mxu0 %v3397_v15  ;;  %v2421_v14 = vld [vmem:[%s5086_s0 + $0x10] sm:$0xf]  ;;  %v3207_v15 = vld [vmem:[%s5086_s0 + $0x20] sm:$0xf0]  ;;  %v2418_v19 = vor.u32 %v3204_v12, %v2415_v13  ;;  %v2470_v12 = vor.u32 %v3218_v2, %v2467_v3 }
  0x39   :  { %v2422_v20 = vor.u32 %v3207_v15, %v2421_v14  ;;  %v2513_v2 = vld [vmem:[%s5086_s0 + $0xd0] sm:$0xf]  ;;  %v3231_v3 = vld [vmem:[%s5086_s0 + $0xe0] sm:$0xf0] }
  0x3a   :  { %1706 = vmatpush.bf16.msrb.mxu2 %v3380_v28  ;;  %v2433_v28 = vld [vmem:[%s5086_s0 + $0x30] sm:$0xf] }
  0x3b   :  { %1875 = vmatpush.bf16.msrb.mxu3 %v3388_v29  ;;  %v3211_v29 = vld [vmem:[%s5086_s0 + $0x40] sm:$0xf0] }
  0x3c   :  { %1537 = vmatpush.bf16.msrb.mxu1 %v3372_v30  ;;  %2044 = vmatpush.bf16.msrb.mxu0 %v3396_v31  ;;  %v3209_v30 = vld [vmem:[%s5086_s0 + $0x34] sm:$0xf]  ;;  %v2435_v31 = vld [vmem:[%s5086_s0 + $0x44] sm:$0xf0]  ;;  %v2434_v37 = vor.u32 %v3211_v29, %v2433_v28  ;;  %v3223_v28 = vld [vmem:[%s5086_s0 + $0xa4] sm:$0xf] }
  0x3d   :  { %v2438_v39 = vor.u32 %v3209_v30, %v2435_v31  ;;  %v2487_v29 = vld [vmem:[%s5086_s0 + $0xb4] sm:$0xf0]  ;;  %v2493_v30 = vld [vmem:[%s5086_s0 + $0xa8] sm:$0xf]  ;;  %v3226_v31 = vld [vmem:[%s5086_s0 + $0xb8] sm:$0xf0] }
  0x3e   :  { %1707 = vmatpush.bf16.msrb.mxu2 %v3379_v44 }
  0x3f   :  { %1876 = vmatpush.bf16.msrb.mxu3 %v3387_v45 }
  0x40   :  { %1538 = vmatpush.bf16.msrb.mxu1 %v3371_v46  ;;  %2045 = vmatpush.bf16.msrb.mxu0 %v3395_v47  ;;  %v3213_v46 = vld [vmem:[%s5086_s0 + $0x54] sm:$0xf]  ;;  %v2447_v47 = vld [vmem:[%s5086_s0 + $0x64] sm:$0xf0] }
  0x41   :  { %1420 = vmatmul.bf16.gmra.mxu1 %v2606_v56  ;;  %1460 = vmatmul.bf16.gmra.mxu2 %v2766_v57  ;;  %v2686_v56 = vor.u32 %v3275_v49, %v2685_v48  ;;  %v2846_v57 = vor.u32 %v3315_v51, %v2845_v50  ;;  %v2453_v48 = vld [vmem:[%s5086_s0 + $0x58] sm:$0xf]  ;;  %v3216_v49 = vld [vmem:[%s5086_s0 + $0x68] sm:$0xf0]  ;;  %v3214_v50 = vld [vmem:[%s5086_s0 + $0x5c] sm:$0xf] }
  0x42   :  { %1500 = vmatmul.bf16.gmra.mxu3 %v2926_v58  ;;  %v3006_v58 = vor.u32 %v3355_v53, %v3005_v52  ;;  %v2455_v51 = vld [vmem:[%s5086_s0 + $0x6c] sm:$0xf0]  ;;  %v2461_v52 = vld [vmem:[%s5086_s0 + $0x60] sm:$0xf]  ;;  %v3217_v53 = vld [vmem:[%s5086_s0 + $0x70] sm:$0xf0] }
  0x43   :  { %1380 = vmatmul.bf16.gmra.mxu0 %v2446_v59  ;;  %v2526_v59 = vor.u32 %v3235_v55, %v2525_v54  ;;  %v2462_v60 = vor.u32 %v3217_v53, %v2461_v52 }
  0x51   :  { %1425 = vmatmul.bf16.gmra.mxu1 %v2626_v8  ;;  %1465 = vmatmul.bf16.gmra.mxu2 %v2786_v9  ;;  %v3203_v8 = vld [vmem:[%s5086_s0 + $0x4] sm:$0xf]  ;;  %v2407_v9 = vld [vmem:[%s5086_s0 + $0x14] sm:$0xf0] }
  0x52   :  { %1505 = vmatmul.bf16.gmra.mxu3 %v2946_v10  ;;  %v2413_v10 = vld [vmem:[%s5086_s0 + $0x8] sm:$0xf]  ;;  %v2410_v16 = vor.u32 %v3203_v8, %v2407_v9  ;;  %v3222_v9 = vld [vmem:[%s5086_s0 + $0x98] sm:$0xf0] }
  0x53   :  { %1385 = vmatmul.bf16.gmra.mxu0 %v2466_v11  ;;  %v3206_v11 = vld [vmem:[%s5086_s0 + $0x18] sm:$0xf0]  ;;  %v2481_v8 = vld [vmem:[%s5086_s0 + $0x88] sm:$0xf] }
  0x54   :  { %v2414_v17 = vor.u32 %v3206_v11, %v2413_v10 }
  0x61   :  { %1430 = vmatmul.bf16.gmra.mxu1 %v2646_v24  ;;  %1470 = vmatmul.bf16.gmra.mxu2 %v2806_v25 }
  0x62   :  { %1510 = vmatmul.bf16.gmra.mxu3 %v2966_v26  ;;  %v3208_v26 = vld [vmem:[%s5086_s0 + $0x2c] sm:$0xf] }
  0x63   :  { %1390 = vmatmul.bf16.gmra.mxu0 %v2486_v27  ;;  %v2427_v27 = vld [vmem:[%s5086_s0 + $0x3c] sm:$0xf0] }
  0x64   :  { %v2430_v36 = vor.u32 %v3208_v26, %v2427_v27 }
  0x71   :  { %1435 = vmatmul.bf16.gmra.mxu1 %v2666_v40  ;;  %1475 = vmatmul.bf16.gmra.mxu2 %v2826_v41  ;;  %v2442_v40 = vor.u32 %v3212_v33, %v2441_v32  ;;  %v3224_v32 = vld [vmem:[%s5086_s0 + $0xac] sm:$0xf]  ;;  %v2495_v33 = vld [vmem:[%s5086_s0 + $0xbc] sm:$0xf0] }
  0x72   :  { %1515 = vmatmul.bf16.gmra.mxu3 %v2986_v42 }
  0x73   :  { %1395 = vmatmul.bf16.gmra.mxu0 %v2506_v43 }
  0x81   :  { %1440 = vmatmul.bf16.gmra.mxu1 %v2686_v56  ;;  %1480 = vmatmul.bf16.gmra.mxu2 %v2846_v57  ;;  %v2450_v56 = vor.u32 %v3213_v46, %v2447_v47  ;;  %v2454_v57 = vor.u32 %v3216_v49, %v2453_v48  ;;  %v2490_v46 = vor.u32 %v3223_v28, %v2487_v29 }
  0x82   :  { %1520 = vmatmul.bf16.gmra.mxu3 %v3006_v58  ;;  %v2494_v47 = vor.u32 %v3226_v31, %v2493_v30  ;;  %v2498_v49 = vor.u32 %v3224_v32, %v2495_v33 }
  0x83   :  { %1400 = vmatmul.bf16.gmra.mxu0 %v2526_v59  ;;  %v2458_v59 = vor.u32 %v3214_v50, %v2455_v51 }
  0x91   :  { %1445 = vmatmul.bf16.gmra.mxu1 %v2706_v4  ;;  %1485 = vmatmul.bf16.gmra.mxu2 %v2866_v5  ;;  %v2473_v4 = vld [vmem:[%s5086_s0 + $0x80] sm:$0xf]  ;;  %v3221_v5 = vld [vmem:[%s5086_s0 + $0x90] sm:$0xf0] }
  0x92   :  { %1525 = vmatmul.bf16.gmra.mxu3 %v3026_v6  ;;  %v3219_v6 = vld [vmem:[%s5086_s0 + $0x84] sm:$0xf]  ;;  %v2474_v13 = vor.u32 %v3221_v5, %v2473_v4  ;;  %v3229_v4 = vld [vmem:[%s5086_s0 + $0xd4] sm:$0xf]  ;;  %v2515_v5 = vld [vmem:[%s5086_s0 + $0xe4] sm:$0xf0] }
  0x93   :  { %1405 = vmatmul.bf16.gmra.mxu0 %v2546_v7  ;;  %v2475_v7 = vld [vmem:[%s5086_s0 + $0x94] sm:$0xf0] }
  0x94   :  { %v2478_v15 = vor.u32 %v3219_v6, %v2475_v7  ;;  %v2521_v6 = vld [vmem:[%s5086_s0 + $0xd8] sm:$0xf]  ;;  %v3232_v7 = vld [vmem:[%s5086_s0 + $0xe8] sm:$0xf0] }
  0x95   :  { %v2522_v28 = vor.u32 %v3232_v7, %v2521_v6 }
  0x9e   :  { %v3977_v18 = vpop.f32.mrf.mxu1 }
  0xa0   :  { %v3979_v21 = vpop.f32.mrf.mxu0 }
  0xa1   :  { %1539 = vmatmul.bf16.vlgmr.msrb.gmra.mxu1 %v2410_v16  ;;  %1708 = vmatmul.bf16.vlgmr.msrb.gmra.mxu2 %v2414_v17  ;;  %v2482_v16 = vor.u32 %v3222_v9, %v2481_v8 }
  0xa2   :  { %1877 = vmatmul.bf16.vlgmr.msrb.gmra.mxu3 %v2418_v19 }
  0xa3   :  { %2046 = vmatmul.bf16.vlgmr.msrb.gmra.mxu0 %v2422_v20 }
  0xa4   :  { %v3981_v22 = vpop.f32.mrf.mxu2 }
  0xa5   :  { %v3983_v23 = vpop.f32.mrf.mxu3 }
  0xa6   :  { %5088 = vst [vmem:[#allocation2_spill] sm:$0xff] %v3983_v23  ;;  %v3985_v24 = vpop.f32.mrf.mxu1  ;;  %v4300_v23 = vld [vmem:[%s5085_s2] ss:$0 sm:$0xff] }
  0xa8   :  { %v3987_v25 = vpop.f32.mrf.mxu0 }
  0xac   :  { %v4013_v34 = vpop.f32.mrf.mxu2 }
  0xad   :  { %v4015_v35 = vpop.f32.mrf.mxu3 }
  0xae   :  { %5089 = vst [vmem:[#allocation3_spill] sm:$0xff] %v4015_v35  ;;  %v4017_v38 = vpop.f32.mrf.mxu1 }
  0xb0   :  { %v4019_v41 = vpop.f32.mrf.mxu0 }
  0xb1   :  { %1544 = vmatmul.bf16.gmra.mxu1 %v2430_v36  ;;  %1713 = vmatmul.bf16.gmra.mxu2 %v2434_v37  ;;  %v2501_v36 = vld [vmem:[%s5086_s0 + $0xb0] sm:$0xf]  ;;  %v3227_v37 = vld [vmem:[%s5086_s0 + $0xc0] sm:$0xf0] }
  0xb2   :  { %1882 = vmatmul.bf16.gmra.mxu3 %v2438_v39  ;;  %v2502_v50 = vor.u32 %v3227_v37, %v2501_v36  ;;  %v3233_v36 = vld [vmem:[%s5086_s0 + $0xf4] sm:$0xf]  ;;  %v2527_v37 = vld [vmem:[%s5086_s0 + $0x104] sm:$0xf0] }
  0xb3   :  { %2051 = vmatmul.bf16.gmra.mxu0 %v2442_v40 }
  0xb4   :  { %v4021_v42 = vpop.f32.mrf.mxu2 }
  0xb5   :  { %v4023_v43 = vpop.f32.mrf.mxu3 }
  0xb6   :  { %5090 = vst [vmem:[#allocation4_spill] sm:$0xff] %v4023_v43  ;;  %v4025_v44 = vpop.f32.mrf.mxu1 }
  0xb8   :  { %v4027_v45 = vpop.f32.mrf.mxu0 }
  0xbc   :  { %v4053_v54 = vpop.f32.mrf.mxu2 }
  0xbd   :  { %v4055_v55 = vpop.f32.mrf.mxu3 }
  0xbe   :  { %5091 = vst [vmem:[#allocation5_spill] sm:$0xff] %v4055_v55  ;;  %v4057_v58 = vpop.f32.mrf.mxu1 }
  0xc0   :  { %v4059_v61 = vpop.f32.mrf.mxu0 }
  0xc1   :  { %1549 = vmatmul.bf16.gmra.mxu1 %v2450_v56  ;;  %1718 = vmatmul.bf16.gmra.mxu2 %v2454_v57 }
  0xc2   :  { %1887 = vmatmul.bf16.gmra.mxu3 %v2458_v59  ;;  %v3228_v59 = vld [vmem:[%s5086_s0 + $0xcc] sm:$0xf] }
  0xc3   :  { %2056 = vmatmul.bf16.gmra.mxu0 %v2462_v60  ;;  %v2507_v60 = vld [vmem:[%s5086_s0 + $0xdc] sm:$0xf0] }
  0xc4   :  { %v4061_v62 = vpop.f32.mrf.mxu2 }
  0xc5   :  { %v4063_v63 = vpop.f32.mrf.mxu3 }
  0xc6   :  { %5092 = vst [vmem:[#allocation6_spill] sm:$0xff] %v4063_v63  ;;  %v4065_v0 = vpop.f32.mrf.mxu1 }
  0xc8   :  { %v4067_v1 = vpop.f32.mrf.mxu0 }
  0xcc   :  { %v4093_v10 = vpop.f32.mrf.mxu2 }
  0xcd   :  { %v4095_v11 = vpop.f32.mrf.mxu3 }
  0xce   :  { %5093 = vst [vmem:[#allocation7_spill] sm:$0xff] %v4095_v11  ;;  %v4097_v14 = vpop.f32.mrf.mxu1 }
  0xd0   :  { %v4099_v17 = vpop.f32.mrf.mxu0 }
  0xd1   :  { %1554 = vmatmul.bf16.gmra.mxu1 %v2470_v12  ;;  %1723 = vmatmul.bf16.gmra.mxu2 %v2474_v13  ;;  %v2510_v12 = vor.u32 %v3228_v59, %v2507_v60  ;;  %v2514_v13 = vor.u32 %v3231_v3, %v2513_v2  ;;  %v2541_v59 = vld [vmem:[%s5086_s0 + $0x100] sm:$0xf]  ;;  %v3237_v60 = vld [vmem:[%s5086_s0 + $0x110] sm:$0xf0] }
  0xd2   :  { %1892 = vmatmul.bf16.gmra.mxu3 %v2478_v15 }
  0xd3   :  { %2061 = vmatmul.bf16.gmra.mxu0 %v2482_v16  ;;  %v2518_v16 = vor.u32 %v3229_v4, %v2515_v5  ;;  %v2530_v4 = vor.u32 %v3233_v36, %v2527_v37  ;;  %v3238_v36 = vld [vmem:[%s5086_s0 + $0x11c] sm:$0xf]  ;;  %v2547_v37 = vld [vmem:[%s5086_s0 + $0x12c] sm:$0xf0] }
  0xd4   :  { %v4101_v19 = vpop.f32.mrf.mxu2 }
  0xd5   :  { %5094 = vst [vmem:[#allocation8_spill] sm:$0xff] %v4101_v19  ;;  %v4103_v20 = vpop.f32.mrf.mxu3 }
  0xd6   :  { %5095 = vst [vmem:[#allocation9_spill] sm:$0xff] %v4103_v20  ;;  %v4105_v26 = vpop.f32.mrf.mxu1 }
  0xd8   :  { %v4107_v27 = vpop.f32.mrf.mxu0 }
  0xdc   :  { %v4133_v39 = vpop.f32.mrf.mxu2 }
  0xdd   :  { %5096 = vst [vmem:[#allocation10_spill] sm:$0xff] %v4133_v39  ;;  %v4135_v40 = vpop.f32.mrf.mxu3 }
  0xde   :  { %5097 = vst [vmem:[#allocation11_spill] sm:$0xff] %v4135_v40  ;;  %v4137_v48 = vpop.f32.mrf.mxu1 }
  0xe0   :  { %v4139_v51 = vpop.f32.mrf.mxu0 }
  0xe1   :  { %1559 = vmatmul.bf16.gmra.mxu1 %v2490_v46  ;;  %1728 = vmatmul.bf16.gmra.mxu2 %v2494_v47  ;;  %v2533_v46 = vld [vmem:[%s5086_s0 + $0xf8] sm:$0xf]  ;;  %v3236_v47 = vld [vmem:[%s5086_s0 + $0x108] sm:$0xf0] }
  0xe2   :  { %1897 = vmatmul.bf16.gmra.mxu3 %v2498_v49  ;;  %v3234_v49 = vld [vmem:[%s5086_s0 + $0xfc] sm:$0xf]  ;;  %v2534_v5 = vor.u32 %v3236_v47, %v2533_v46  ;;  %v2553_v46 = vld [vmem:[%s5086_s0 + $0x120] sm:$0xf]  ;;  %v3241_v47 = vld [vmem:[%s5086_s0 + $0x130] sm:$0xf0] }
  0xe3   :  { %2066 = vmatmul.bf16.gmra.mxu0 %v2502_v50  ;;  %v2535_v50 = vld [vmem:[%s5086_s0 + $0x10c] sm:$0xf0] }
  0xe4   :  { %v4141_v52 = vpop.f32.mrf.mxu2  ;;  %v2538_v7 = vor.u32 %v3234_v49, %v2535_v50  ;;  %v3239_v49 = vld [vmem:[%s5086_s0 + $0x124] sm:$0xf]  ;;  %v2555_v50 = vld [vmem:[%s5086_s0 + $0x134] sm:$0xf0] }
  0xe5   :  { %5098 = vst [vmem:[#allocation12_spill] sm:$0xff] %v4141_v52  ;;  %v4143_v53 = vpop.f32.mrf.mxu3  ;;  %v1377_v52 = vadd.f32 %v4300_v23, %v4019_v41  ;;  %v3253_v41 = vld [vmem:[%s5086_s0 + $0x194] sm:$0xf] }
  0xe6   :  { %5099 = vst [vmem:[#allocation13_spill] sm:$0xff] %v4143_v53  ;;  %v4145_v56 = vpop.f32.mrf.mxu1 }
  0xe8   :  { %v4147_v57 = vpop.f32.mrf.mxu0 }
  0xec   :  { %v4173_v8 = vpop.f32.mrf.mxu2 }
  0xed   :  { %5100 = vst [vmem:[#allocation14_spill] sm:$0xff] %v4173_v8  ;;  %v4175_v9 = vpop.f32.mrf.mxu3 }
  0xee   :  { %5101 = vst [vmem:[#allocation15_spill] sm:$0xff] %v4175_v9  ;;  %v4177_v15 = vpop.f32.mrf.mxu1 }
  0xf0   :  { %v4179_v29 = vpop.f32.mrf.mxu0 }
  0xf1   :  { %1564 = vmatmul.bf16.gmra.mxu1 %v2510_v12  ;;  %1733 = vmatmul.bf16.gmra.mxu2 %v2514_v13  ;;  %v2542_v12 = vor.u32 %v3237_v60, %v2541_v59  ;;  %v2561_v59 = vld [vmem:[%s5086_s0 + $0x128] sm:$0xf]  ;;  %v3242_v60 = vld [vmem:[%s5086_s0 + $0x138] sm:$0xf0] }
  0xf2   :  { %1902 = vmatmul.bf16.gmra.mxu3 %v2518_v16  ;;  %v2562_v53 = vor.u32 %v3242_v60, %v2561_v59 }
  0xf3   :  { %2071 = vmatmul.bf16.gmra.mxu0 %v2522_v28 }
  0xf4   :  { %v4181_v30 = vpop.f32.mrf.mxu2 }
  0xf5   :  { %5102 = vst [vmem:[#allocation16_spill] sm:$0xff] %v4181_v30  ;;  %v4183_v31 = vpop.f32.mrf.mxu3 }
  0xf6   :  { %5103 = vst [vmem:[#allocation17_spill] sm:$0xff] %v4183_v31  ;;  %v4185_v32 = vpop.f32.mrf.mxu1 }
  0xf8   :  { %v4187_v33 = vpop.f32.mrf.mxu0 }
  0xfc   :  { %v4213_v2 = vpop.f32.mrf.mxu2 }
  0xfd   :  { %5104 = vst [vmem:[#allocation18_spill] sm:$0xff] %v4213_v2  ;;  %v4215_v3 = vpop.f32.mrf.mxu3 }
  0xfe   :  { %5105 = vst [vmem:[#allocation19_spill] sm:$0xff] %v4215_v3  ;;  %v4217_v6 = vpop.f32.mrf.mxu1  ;;  %v2558_v3 = vor.u32 %v3239_v49, %v2555_v50  ;;  %v2581_v49 = vld [vmem:[%s5086_s0 + $0x150] sm:$0xf]  ;;  %v3247_v50 = vld [vmem:[%s5086_s0 + $0x160] sm:$0xf0] }
  0xff   :  { %v2582_v43 = vor.u32 %v3247_v50, %v2581_v49  ;;  %v2595_v49 = vld [vmem:[%s5086_s0 + $0x184] sm:$0xf0]  ;;  %v2601_v50 = vld [vmem:[%s5086_s0 + $0x178] sm:$0xf] }
 0x100   :  { %v4219_v13 = vpop.f32.mrf.mxu0 }
 0x101   :  { %1569 = vmatmul.bf16.gmra.mxu1 %v2530_v4  ;;  %1738 = vmatmul.bf16.gmra.mxu2 %v2534_v5 }
 0x102   :  { %1907 = vmatmul.bf16.gmra.mxu3 %v2538_v7  ;;  %v2550_v7 = vor.u32 %v3238_v36, %v2547_v37  ;;  %v3243_v36 = vld [vmem:[%s5086_s0 + $0x144] sm:$0xf]  ;;  %v2567_v37 = vld [vmem:[%s5086_s0 + $0x154] sm:$0xf0] }
 0x103   :  { %2076 = vmatmul.bf16.gmra.mxu0 %v2542_v12  ;;  %v2554_v12 = vor.u32 %v3241_v47, %v2553_v46  ;;  %v3244_v46 = vld [vmem:[%s5086_s0 + $0x14c] sm:$0xf]  ;;  %v2575_v47 = vld [vmem:[%s5086_s0 + $0x15c] sm:$0xf0] }
 0x104   :  { %v4221_v16 = vpop.f32.mrf.mxu2 }
 0x105   :  { %5106 = vst [vmem:[#allocation20_spill] sm:$0xff] %v4221_v16  ;;  %v4223_v28 = vpop.f32.mrf.mxu3 }
 0x106   :  { %5107 = vst [vmem:[#allocation21_spill] sm:$0xff] %v4223_v28  ;;  %v4225_v31 = vpop.f32.mrf.mxu1 }
 0x108   :  { %v4227_v9 = vpop.f32.mrf.mxu0 }
 0x10c   :  { %v4253_v4 = vpop.f32.mrf.mxu2 }
 0x10d   :  { %5108 = vst [vmem:[#allocation22_spill] sm:$0xff] %v4253_v4  ;;  %v4255_v5 = vpop.f32.mrf.mxu3 }
 0x10e   :  { %5109 = vst [vmem:[#allocation23_spill] sm:$0xff] %v4255_v5  ;;  %v4257_v28 = vpop.f32.mrf.mxu1  ;;  %v2578_v5 = vor.u32 %v3244_v46, %v2575_v47  ;;  %v1374_v46 = vadd.f32 %v4300_v23, %v3987_v25  ;;  %v3248_v47 = vld [vmem:[%s5086_s0 + $0x16c] sm:$0xf]  ;;  %v3249_v25 = vld [vmem:[%s5086_s0 + $0x174] sm:$0xf] }
 0x110   :  { %v4259_v40 = vpop.f32.mrf.mxu0 }
 0x111   :  { %1574 = vmatmul.bf16.gmra.mxu1 %v2550_v7  ;;  %1743 = vmatmul.bf16.gmra.mxu2 %v2554_v12  ;;  %v2570_v7 = vor.u32 %v3243_v36, %v2567_v37 }
 0x112   :  { %1912 = vmatmul.bf16.gmra.mxu3 %v2558_v3  ;;  %v3246_v3 = vld [vmem:[%s5086_s0 + $0x158] sm:$0xf0] }
 0x113   :  { %2081 = vmatmul.bf16.gmra.mxu0 %v2562_v53  ;;  %v2573_v53 = vld [vmem:[%s5086_s0 + $0x148] sm:$0xf] }
 0x114   :  { %v4261_v20 = vpop.f32.mrf.mxu2  ;;  %v2574_v12 = vor.u32 %v3246_v3, %v2573_v53 }
 0x115   :  { %5110 = vst [vmem:[#allocation24_spill] sm:$0xff] %v4261_v20  ;;  %v4263_v11 = vpop.f32.mrf.mxu3 }
 0x116   :  { %5111 = vst [vmem:[#allocation25_spill] sm:$0xff] %v4263_v11  ;;  %v4265_v63 = vpop.f32.mrf.mxu1 }
 0x118   :  { %v4267_v55 = vpop.f32.mrf.mxu0 }
 0x11c   :  { %v4293_v59 = vpop.f32.mrf.mxu2 }
 0x11d   :  { %5112 = vst [vmem:[#allocation26_spill] sm:$0xff] %v4293_v59  ;;  %v4295_v60 = vpop.f32.mrf.mxu3  ;;  %v1372_v59 = vadd.f32 %v4300_v23, %v3979_v21  ;;  %v2593_v21 = vld [vmem:[%s5086_s0 + $0x170] sm:$0xf] }
 0x11e   :  { %5113 = vst [vmem:[#allocation27_spill] sm:$0xff] %v4295_v60  ;;  %v1540_v11 = vpop.f32.mrf.mxu1 }
 0x11f   :  { %v1541_v60 = vadd.f32 %v1540_v11, %v1372_v59  ;;  %v3251_v11 = vld [vmem:[%s5086_s0 + $0x180] sm:$0xf0]  ;;  %v3252_v59 = vld [vmem:[%s5086_s0 + $0x188] sm:$0xf0] }
 0x120   :  { %v2047_v35 = vpop.f32.mrf.mxu0  ;;  %v2594_v16 = vor.u32 %v3251_v11, %v2593_v21  ;;  %v2621_v11 = vld [vmem:[%s5086_s0 + $0x1a0] sm:$0xf] }
 0x121   :  { %1579 = vmatmul.bf16.gmra.mxu1 %v2570_v7  ;;  %1748 = vmatmul.bf16.gmra.mxu2 %v2574_v12 }
 0x122   :  { %1917 = vmatmul.bf16.gmra.mxu3 %v2578_v5 }
 0x123   :  { %2086 = vmatmul.bf16.gmra.mxu0 %v2582_v43  ;;  %v2587_v43 = vld [vmem:[%s5086_s0 + $0x17c] sm:$0xf0] }
 0x124   :  { %v1709_v20 = vpop.f32.mrf.mxu2  ;;  %v2590_v4 = vor.u32 %v3248_v47, %v2587_v43 }
 0x125   :  { %v1878_v36 = vpop.f32.mrf.mxu3  ;;  %v1710_v53 = vadd.f32 %v1709_v20, %v1541_v60 }
 0x126   :  { %v1542_v37 = vpop.f32.mrf.mxu1 }
 0x127   :  { %v1879_v20 = vadd.f32 %v1878_v36, %v1710_v53  ;;  %v1543_v5 = vadd.f32 %v1542_v37, %v1374_v46  ;;  %v2598_v36 = vor.u32 %v3249_v25, %v2595_v49  ;;  %v2602_v37 = vor.u32 %v3252_v59, %v2601_v50  ;;  %v3257_v25 = vld [vmem:[%s5086_s0 + $0x1b0] sm:$0xf0] }
 0x128   :  { %v2049_v3 = vpop.f32.mrf.mxu0 }
 0x129   :  { %v2048_v53 = vadd.f32 %v2047_v35, %v1879_v20 }
 0x12b   :  { %v2207_v39 = vmax.f32 %v2048_v53, 0.0 }
 0x12c   :  { %v1711_v60 = vpop.f32.mrf.mxu2 }
 0x12d   :  { %v1712_v7 = vadd.f32 %v1711_v60, %v1543_v5  ;;  %v1880_v12 = vpop.f32.mrf.mxu3 }
 0x12e   :  { %v1545_v2 = vpop.f32.mrf.mxu1 }
 0x12f   :  { %v1881_v46 = vadd.f32 %v1880_v12, %v1712_v7  ;;  %v1546_v47 = vadd.f32 %v1545_v2, %v1377_v52  ;;  %v3256_v52 = vld [vmem:[%s5086_s0 + $0x1a8] sm:$0xf0] }
 0x130   :  { %v2052_v30 = vpop.f32.mrf.mxu0 }
 0x131   :  { %v2050_v8 = vadd.f32 %v2049_v3, %v1881_v46  ;;  %1584 = vmatmul.bf16.gmra.mxu1 %v2590_v4  ;;  %1753 = vmatmul.bf16.gmra.mxu2 %v2594_v16  ;;  %v1379_v16 = vadd.f32 %v4300_v23, %v4027_v45  ;;  %v3254_v45 = vld [vmem:[%s5086_s0 + $0x19c] sm:$0xf]  ;;  %v2615_v4 = vld [vmem:[%s5086_s0 + $0x1ac] sm:$0xf0] }
 0x132   :  { %1922 = vmatmul.bf16.gmra.mxu3 %v2598_v36  ;;  %v2618_v36 = vor.u32 %v3254_v45, %v2615_v4  ;;  %v2627_v45 = vld [vmem:[%s5086_s0 + $0x1cc] sm:$0xf0] }
 0x133   :  { %2091 = vmatmul.bf16.gmra.mxu0 %v2602_v37  ;;  %v2208_v19 = vmax.f32 %v2050_v8, 0.0  ;;  %v2622_v37 = vor.u32 %v3257_v25, %v2621_v11  ;;  %v2635_v25 = vld [vmem:[%s5086_s0 + $0x1d4] sm:$0xf0] }
 0x134   :  { %v1714_v5 = vpop.f32.mrf.mxu2 }
 0x135   :  { %v3406_v60 = vpack.c.bf16 %v2208_v19, %v2207_v39  ;;  %v1883_v43 = vpop.f32.mrf.mxu3  ;;  %v1715_v35 = vadd.f32 %v1714_v5, %v1546_v47  ;;  %v2607_v19 = vld [vmem:[%s5086_s0 + $0x1a4] sm:$0xf0]  ;;  %v2613_v39 = vld [vmem:[%s5086_s0 + $0x198] sm:$0xf]  ;;  %v1382_v47 = vadd.f32 %v4300_v23, %v4059_v61  ;;  %v3258_v61 = vld [vmem:[%s5086_s0 + $0x1bc] sm:$0xf] }
 0x136   :  { %v1547_v21 = vpop.f32.mrf.mxu1  ;;  %v2610_v59 = vor.u32 %v3253_v41, %v2607_v19  ;;  %v2614_v7 = vor.u32 %v3256_v52, %v2613_v39  ;;  %v1384_v52 = vadd.f32 %v4300_v23, %v4067_v1  ;;  %v3259_v1 = vld [vmem:[%s5086_s0 + $0x1c4] sm:$0xf] }
 0x137   :  { %3407 = vst [vmem:[%s5087_s3] sm:$0xff] %v3406_v60   ;;  %v1884_v8 = vadd.f32 %v1883_v43, %v1715_v35  ;;  %v1548_v2 = vadd.f32 %v1547_v21, %v1379_v16 }
 0x138   :  { %v2054_v3 = vpop.f32.mrf.mxu0 }
 0x139   :  { %v2053_v53 = vadd.f32 %v2052_v30, %v1884_v8  ;;  %v2633_v8 = vld [vmem:[%s5086_s0 + $0x1c0] sm:$0xf] }
 0x13b   :  { %v2209_v43 = vmax.f32 %v2053_v53, 0.0  ;;  %v2638_v53 = vor.u32 %v3259_v1, %v2635_v25  ;;  %v3266_v1 = vld [vmem:[%s5086_s0 + $0x1f8] sm:$0xf0]  ;;  %v2655_v25 = vld [vmem:[%s5086_s0 + $0x1fc] sm:$0xf0] }
 0x13c   :  { %v1716_v20 = vpop.f32.mrf.mxu2 }
 0x13d   :  { %v1717_v49 = vadd.f32 %v1716_v20, %v1548_v2  ;;  %v1885_v50 = vpop.f32.mrf.mxu3  ;;  %v3261_v2 = vld [vmem:[%s5086_s0 + $0x1d0] sm:$0xf0]  ;;  %v2641_v20 = vld [vmem:[%s5086_s0 + $0x1c8] sm:$0xf] }
 0x13e   :  { %v1550_v12 = vpop.f32.mrf.mxu1 }
 0x13f   :  { %v1886_v46 = vadd.f32 %v1885_v50, %v1717_v49  ;;  %v1551_v41 = vadd.f32 %v1550_v12, %v1382_v47  ;;  %v3262_v49 = vld [vmem:[%s5086_s0 + $0x1d8] sm:$0xf0]  ;;  %v2630_v12 = vor.u32 %v3258_v61, %v2627_v45  ;;  %v1389_v45 = vadd.f32 %v4300_v23, %v4107_v27  ;;  %v3264_v27 = vld [vmem:[%s5086_s0 + $0x1ec] sm:$0xf] }
 0x140   :  { %v2057_v5 = vpop.f32.mrf.mxu0 }
 0x141   :  { %v2055_v60 = vadd.f32 %v2054_v3, %v1886_v46  ;;  %1589 = vmatmul.bf16.gmra.mxu1 %v2610_v59  ;;  %1758 = vmatmul.bf16.gmra.mxu2 %v2614_v7  ;;  %v2642_v46 = vor.u32 %v3262_v49, %v2641_v20  ;;  %v2661_v20 = vld [vmem:[%s5086_s0 + $0x1f0] sm:$0xf]  ;;  %v3267_v49 = vld [vmem:[%s5086_s0 + $0x200] sm:$0xf0] }
 0x142   :  { %1927 = vmatmul.bf16.gmra.mxu3 %v2618_v36  ;;  %v2634_v36 = vor.u32 %v3261_v2, %v2633_v8  ;;  %v2647_v8 = vld [vmem:[%s5086_s0 + $0x1f4] sm:$0xf0]  ;;  %v2653_v2 = vld [vmem:[%s5086_s0 + $0x1e8] sm:$0xf] }
 0x143   :  { %2096 = vmatmul.bf16.gmra.mxu0 %v2622_v37  ;;  %v2210_v21 = vmax.f32 %v2055_v60, 0.0 }
 0x144   :  { %v1719_v35 = vpop.f32.mrf.mxu2 }
 0x145   :  { %v3411_v16 = vpack.c.bf16 %v2210_v21, %v2209_v43  ;;  %v1888_v19 = vpop.f32.mrf.mxu3  ;;  %v1720_v30 = vadd.f32 %v1719_v35, %v1551_v41  ;;  %v1387_v35 = vadd.f32 %v4300_v23, %v4099_v17  ;;  %v3263_v17 = vld [vmem:[%s5086_s0 + $0x1e4] sm:$0xf] }
 0x146   :  { %v1552_v39 = vpop.f32.mrf.mxu1 }
 0x147   :  { %3563 = vst [vmem:[%s5087_s3 + $0x8] sm:$0xff] %v3411_v16   ;;  %v1889_v4 = vadd.f32 %v1888_v19, %v1720_v30  ;;  %v1553_v11 = vadd.f32 %v1552_v39, %v1384_v52 }
 0x148   :  { %v2059_v3 = vpop.f32.mrf.mxu0 }
 0x149   :  { %v2058_v60 = vadd.f32 %v2057_v5, %v1889_v4 }
 0x14b   :  { %v2211_v16 = vmax.f32 %v2058_v60, 0.0 }
 0x14c   :  { %v1721_v50 = vpop.f32.mrf.mxu2 }
 0x14d   :  { %v1722_v59 = vadd.f32 %v1721_v50, %v1553_v11  ;;  %v1890_v7 = vpop.f32.mrf.mxu3 }
 0x14e   :  { %v1555_v37 = vpop.f32.mrf.mxu1 }
 0x14f   :  { %v1891_v47 = vadd.f32 %v1890_v7, %v1722_v59  ;;  %v1556_v30 = vadd.f32 %v1555_v37, %v1387_v35 }
 0x150   :  { %v2062_v43 = vpop.f32.mrf.mxu0 }
 0x151   :  { %v2060_v21 = vadd.f32 %v2059_v3, %v1891_v47  ;;  %1594 = vmatmul.bf16.gmra.mxu1 %v2630_v12  ;;  %1763 = vmatmul.bf16.gmra.mxu2 %v2634_v36  ;;  %v2650_v12 = vor.u32 %v3263_v17, %v2647_v8  ;;  %v2654_v36 = vor.u32 %v3266_v1, %v2653_v2  ;;  %v2667_v17 = vld [vmem:[%s5086_s0 + $0x21c] sm:$0xf0]  ;;  %v2673_v8 = vld [vmem:[%s5086_s0 + $0x210] sm:$0xf]  ;;  %v3271_v2 = vld [vmem:[%s5086_s0 + $0x220] sm:$0xf0] }
 0x152   :  { %1932 = vmatmul.bf16.gmra.mxu3 %v2638_v53  ;;  %v2658_v53 = vor.u32 %v3264_v27, %v2655_v25  ;;  %v3272_v25 = vld [vmem:[%s5086_s0 + $0x228] sm:$0xf0] }
 0x153   :  { %2101 = vmatmul.bf16.gmra.mxu0 %v2642_v46  ;;  %v2212_v41 = vmax.f32 %v2060_v21, 0.0  ;;  %v2662_v46 = vor.u32 %v3267_v49, %v2661_v20 }
 0x154   :  { %v1724_v19 = vpop.f32.mrf.mxu2 }
 0x155   :  { %v3416_v39 = vpack.c.bf16 %v2212_v41, %v2211_v16  ;;  %v1893_v52 = vpop.f32.mrf.mxu3  ;;  %v1725_v5 = vadd.f32 %v1724_v19, %v1556_v30  ;;  %v1392_v16 = vadd.f32 %v4300_v23, %v4139_v51  ;;  %v3268_v51 = vld [vmem:[%s5086_s0 + $0x20c] sm:$0xf] }
 0x156   :  { %v1557_v61 = vpop.f32.mrf.mxu1 }
 0x157   :  { %3564 = vst [vmem:[%s5087_s3 + $0x10] sm:$0xff] %v3416_v39   ;;  %v1894_v4 = vadd.f32 %v1893_v52, %v1725_v5  ;;  %v1558_v11 = vadd.f32 %v1557_v61, %v1389_v45  ;;  %v1394_v45 = vadd.f32 %v4300_v23, %v4147_v57  ;;  %v3269_v57 = vld [vmem:[%s5086_s0 + $0x214] sm:$0xf] }
 0x158   :  { %v2064_v3 = vpop.f32.mrf.mxu0 }
 0x159   :  { %v2063_v60 = vadd.f32 %v2062_v43, %v1894_v4  ;;  %v2675_v4 = vld [vmem:[%s5086_s0 + $0x224] sm:$0xf0] }
 0x15b   :  { %v2213_v41 = vmax.f32 %v2063_v60, 0.0 }
 0x15c   :  { %v1726_v50 = vpop.f32.mrf.mxu2 }
 0x15d   :  { %v1727_v59 = vadd.f32 %v1726_v50, %v1558_v11  ;;  %v1895_v7 = vpop.f32.mrf.mxu3  ;;  %v2681_v11 = vld [vmem:[%s5086_s0 + $0x218] sm:$0xf] }
 0x15e   :  { %v1560_v37 = vpop.f32.mrf.mxu1 }
 0x15f   :  { %v1896_v47 = vadd.f32 %v1895_v7, %v1727_v59  ;;  %v1561_v52 = vadd.f32 %v1560_v37, %v1392_v16  ;;  %v2670_v59 = vor.u32 %v3268_v51, %v2667_v17  ;;  %v2674_v7 = vor.u32 %v3271_v2, %v2673_v8  ;;  %v3276_v51 = vld [vmem:[%s5086_s0 + $0x248] sm:$0xf0]  ;;  %v2695_v2 = vld [vmem:[%s5086_s0 + $0x24c] sm:$0xf0] }
 0x160   :  { %v2067_v21 = vpop.f32.mrf.mxu0  ;;  %v2682_v37 = vor.u32 %v3272_v25, %v2681_v11 }
 0x161   :  { %v2065_v35 = vadd.f32 %v2064_v3, %v1896_v47  ;;  %1599 = vmatmul.bf16.gmra.mxu1 %v2650_v12  ;;  %1768 = vmatmul.bf16.gmra.mxu2 %v2654_v36  ;;  %v2678_v36 = vor.u32 %v3269_v57, %v2675_v4  ;;  %v2701_v57 = vld [vmem:[%s5086_s0 + $0x240] sm:$0xf] }
 0x162   :  { %1937 = vmatmul.bf16.gmra.mxu3 %v2658_v53 }
 0x163   :  { %2106 = vmatmul.bf16.gmra.mxu0 %v2662_v46  ;;  %v2214_v19 = vmax.f32 %v2065_v35, 0.0  ;;  %v1397_v35 = vadd.f32 %v4300_v23, %v4179_v29  ;;  %v3273_v29 = vld [vmem:[%s5086_s0 + $0x234] sm:$0xf] }
 0x164   :  { %v1729_v39 = vpop.f32.mrf.mxu2 }
 0x165   :  { %v3421_v30 = vpack.c.bf16 %v2214_v19, %v2213_v41  ;;  %v1898_v61 = vpop.f32.mrf.mxu3  ;;  %v1730_v43 = vadd.f32 %v1729_v39, %v1561_v52 }
 0x166   :  { %v1562_v5 = vpop.f32.mrf.mxu1 }
 0x167   :  { %3565 = vst [vmem:[%s5087_s3 + $0x18] sm:$0xff] %v3421_v30   ;;  %v1899_v1 = vadd.f32 %v1898_v61, %v1730_v43  ;;  %v1563_v27 = vadd.f32 %v1562_v5, %v1394_v45  ;;  %v1399_v43 = vadd.f32 %v4300_v23, %v4187_v33  ;;  %v2693_v45 = vld [vmem:[%s5086_s0 + $0x238] sm:$0xf]  ;;  %v3274_v33 = vld [vmem:[%s5086_s0 + $0x23c] sm:$0xf] }
 0x168   :  { %v2069_v3 = vpop.f32.mrf.mxu0 }
 0x169   :  { %v2068_v53 = vadd.f32 %v2067_v21, %v1899_v1  ;;  %v3277_v1 = vld [vmem:[%s5086_s0 + $0x250] sm:$0xf0] }
 0x16b   :  { %v2215_v16 = vmax.f32 %v2068_v53, 0.0  ;;  %v1402_v53 = vadd.f32 %v4300_v23, %v4219_v13  ;;  %v3278_v13 = vld [vmem:[%s5086_s0 + $0x25c] sm:$0xf] }
 0x16c   :  { %v1731_v20 = vpop.f32.mrf.mxu2 }
 0x16d   :  { %v1732_v49 = vadd.f32 %v1731_v20, %v1563_v27  ;;  %v1900_v50 = vpop.f32.mrf.mxu3  ;;  %v2694_v20 = vor.u32 %v3276_v51, %v2693_v45  ;;  %v2721_v45 = vld [vmem:[%s5086_s0 + $0x268] sm:$0xf]  ;;  %v3282_v51 = vld [vmem:[%s5086_s0 + $0x278] sm:$0xf0] }
 0x16e   :  { %v1565_v12 = vpop.f32.mrf.mxu1 }
 0x16f   :  { %v1901_v46 = vadd.f32 %v1900_v50, %v1732_v49  ;;  %v1566_v30 = vadd.f32 %v1565_v12, %v1397_v35  ;;  %v2698_v50 = vor.u32 %v3274_v33, %v2695_v2 }
 0x170   :  { %v2072_v60 = vpop.f32.mrf.mxu0 }
 0x171   :  { %v2070_v47 = vadd.f32 %v2069_v3, %v1901_v46  ;;  %1604 = vmatmul.bf16.gmra.mxu1 %v2670_v59  ;;  %1773 = vmatmul.bf16.gmra.mxu2 %v2674_v7  ;;  %v2687_v3 = vld [vmem:[%s5086_s0 + $0x244] sm:$0xf0]  ;;  %v2702_v59 = vor.u32 %v3277_v1, %v2701_v57 }
 0x172   :  { %1942 = vmatmul.bf16.gmra.mxu3 %v2678_v36  ;;  %v2690_v25 = vor.u32 %v3273_v29, %v2687_v3  ;;  %v2715_v3 = vld [vmem:[%s5086_s0 + $0x274] sm:$0xf0] }
 0x173   :  { %2111 = vmatmul.bf16.gmra.mxu0 %v2682_v37  ;;  %v2216_v41 = vmax.f32 %v2070_v47, 0.0 }
 0x174   :  { %v1734_v19 = vpop.f32.mrf.mxu2 }
 0x175   :  { %v3426_v39 = vpack.c.bf16 %v2216_v41, %v2215_v16  ;;  %v1903_v52 = vpop.f32.mrf.mxu3  ;;  %v1735_v21 = vadd.f32 %v1734_v19, %v1566_v30 }
 0x176   :  { %v1567_v61 = vpop.f32.mrf.mxu1 }
 0x177   :  { %3566 = vst [vmem:[%s5087_s3 + $0x20] sm:$0xff] %v3426_v39   ;;  %v1904_v17 = vadd.f32 %v1903_v52, %v1735_v21  ;;  %v1568_v8 = vadd.f32 %v1567_v61, %v1399_v43  ;;  %v1404_v52 = vadd.f32 %v4300_v23, %v4227_v9  ;;  %v2707_v61 = vld [vmem:[%s5086_s0 + $0x26c] sm:$0xf0]  ;;  %v2713_v21 = vld [vmem:[%s5086_s0 + $0x260] sm:$0xf] }
 0x178   :  { %v2074_v5 = vpop.f32.mrf.mxu0  ;;  %v3279_v9 = vld [vmem:[%s5086_s0 + $0x264] sm:$0xf]  ;;  %v2710_v2 = vor.u32 %v3278_v13, %v2707_v61  ;;  %v2741_v13 = vld [vmem:[%s5086_s0 + $0x290] sm:$0xf] }
 0x179   :  { %v2073_v7 = vadd.f32 %v2072_v60, %v1904_v17  ;;  %v3287_v61 = vld [vmem:[%s5086_s0 + $0x2a0] sm:$0xf0] }
 0x17b   :  { %v2217_v46 = vmax.f32 %v2073_v7, 0.0 }
 0x17c   :  { %v1736_v27 = vpop.f32.mrf.mxu2 }
 0x17d   :  { %v1737_v4 = vadd.f32 %v1736_v27, %v1568_v8  ;;  %v1905_v11 = vpop.f32.mrf.mxu3  ;;  %v2718_v27 = vor.u32 %v3279_v9, %v2715_v3 }
 0x17e   :  { %v1570_v49 = vpop.f32.mrf.mxu1 }
 0x17f   :  { %v1906_v12 = vadd.f32 %v1905_v11, %v1737_v4  ;;  %v1571_v41 = vadd.f32 %v1570_v49, %v1402_v53  ;;  %v2722_v4 = vor.u32 %v3282_v51, %v2721_v45  ;;  %v2742_v51 = vor.u32 %v3287_v61, %v2741_v13 }
 0x180   :  { %v2077_v36 = vpop.f32.mrf.mxu0 }
 0x181   :  { %v2075_v37 = vadd.f32 %v2074_v5, %v1906_v12  ;;  %1609 = vmatmul.bf16.gmra.mxu1 %v2690_v25  ;;  %1778 = vmatmul.bf16.gmra.mxu2 %v2694_v20  ;;  %v3281_v5 = vld [vmem:[%s5086_s0 + $0x270] sm:$0xf0] }
 0x182   :  { %1947 = vmatmul.bf16.gmra.mxu3 %v2698_v50  ;;  %v2714_v57 = vor.u32 %v3281_v5, %v2713_v21  ;;  %v1407_v50 = vadd.f32 %v4300_v23, %v4259_v40  ;;  %v3283_v40 = vld [vmem:[%s5086_s0 + $0x284] sm:$0xf] }
 0x183   :  { %2116 = vmatmul.bf16.gmra.mxu0 %v2702_v59  ;;  %v2218_v47 = vmax.f32 %v2075_v37, 0.0 }
 0x184   :  { %v1739_v35 = vpop.f32.mrf.mxu2 }
 0x185   :  { %v3431_v16 = vpack.c.bf16 %v2218_v47, %v2217_v46  ;;  %v1908_v19 = vpop.f32.mrf.mxu3  ;;  %v1740_v60 = vadd.f32 %v1739_v35, %v1571_v41  ;;  %v2727_v41 = vld [vmem:[%s5086_s0 + $0x294] sm:$0xf0] }
 0x186   :  { %v1572_v39 = vpop.f32.mrf.mxu1 }
 0x187   :  { %3567 = vst [vmem:[%s5087_s3 + $0x28] sm:$0xff] %v3431_v16   ;;  %v1909_v43 = vadd.f32 %v1908_v19, %v1740_v60  ;;  %v1573_v29 = vadd.f32 %v1572_v39, %v1404_v52  ;;  %v1409_v16 = vadd.f32 %v4300_v23, %v4267_v55  ;;  %v2733_v19 = vld [vmem:[%s5086_s0 + $0x288] sm:$0xf]  ;;  %v3286_v39 = vld [vmem:[%s5086_s0 + $0x298] sm:$0xf0] }
 0x188   :  { %v2079_v30 = vpop.f32.mrf.mxu0  ;;  %v3284_v55 = vld [vmem:[%s5086_s0 + $0x28c] sm:$0xf]  ;;  %v2735_v52 = vld [vmem:[%s5086_s0 + $0x29c] sm:$0xf0] }
 0x189   :  { %v2078_v11 = vadd.f32 %v2077_v36, %v1909_v43  ;;  %v2730_v43 = vor.u32 %v3283_v40, %v2727_v41  ;;  %v2738_v45 = vor.u32 %v3284_v55, %v2735_v52 }
 0x18b   :  { %v2219_v59 = vmax.f32 %v2078_v11, 0.0 }
 0x18c   :  { %v1741_v33 = vpop.f32.mrf.mxu2 }
 0x18d   :  { %v1742_v17 = vadd.f32 %v1741_v33, %v1573_v29  ;;  %v1910_v8 = vpop.f32.mrf.mxu3  ;;  %v2734_v29 = vor.u32 %v3286_v39, %v2733_v19 }
 0x18e   :  { %v1575_v1 = vpop.f32.mrf.mxu1 }
 0x18f   :  { %v1911_v25 = vadd.f32 %v1910_v8, %v1742_v17  ;;  %v1576_v53 = vadd.f32 %v1575_v1, %v1407_v50 }
 0x190   :  { %v2082_v20 = vpop.f32.mrf.mxu0 }
 0x191   :  { %v2080_v49 = vadd.f32 %v2079_v30, %v1911_v25  ;;  %1614 = vmatmul.bf16.gmra.mxu1 %v2710_v2  ;;  %1783 = vmatmul.bf16.gmra.mxu2 %v2714_v57  ;;  %v1412_v57 = vadd.f32 %v4300_v23, %v3977_v18  ;;  %v3288_v18 = vld [vmem:[%s5086_s0 + $0x2ac] sm:$0xf] }
 0x192   :  { %1952 = vmatmul.bf16.gmra.mxu3 %v2718_v27 }
 0x193   :  { %2121 = vmatmul.bf16.gmra.mxu0 %v2722_v4  ;;  %v2220_v7 = vmax.f32 %v2080_v49, 0.0 }
 0x194   :  { %v1744_v12 = vpop.f32.mrf.mxu2 }
 0x195   :  { %v3436_v37 = vpack.c.bf16 %v2220_v7, %v2219_v59  ;;  %v1913_v46 = vpop.f32.mrf.mxu3  ;;  %v1745_v36 = vadd.f32 %v1744_v12, %v1576_v53  ;;  %v1414_v7 = vadd.f32 %v4300_v23, %v3985_v24  ;;  %v2747_v12 = vld [vmem:[%s5086_s0 + $0x2bc] sm:$0xf0]  ;;  %v3291_v53 = vld [vmem:[%s5086_s0 + $0x2c0] sm:$0xf0]  ;;  %v3289_v24 = vld [vmem:[%s5086_s0 + $0x2b4] sm:$0xf] }
 0x196   :  { %v1577_v47 = vpop.f32.mrf.mxu1  ;;  %v2750_v39 = vor.u32 %v3288_v18, %v2747_v12 }
 0x197   :  { %3568 = vst [vmem:[%s5087_s3 + $0x30] sm:$0xff] %v3436_v37   ;;  %v1914_v60 = vadd.f32 %v1913_v46, %v1745_v36  ;;  %v1578_v30 = vadd.f32 %v1577_v47, %v1409_v16  ;;  %v2753_v37 = vld [vmem:[%s5086_s0 + $0x2b0] sm:$0xf]  ;;  %v2755_v36 = vld [vmem:[%s5086_s0 + $0x2c4] sm:$0xf0] }
 0x198   :  { %v2084_v35 = vpop.f32.mrf.mxu0  ;;  %v3292_v16 = vld [vmem:[%s5086_s0 + $0x2c8] sm:$0xf0]  ;;  %v2754_v55 = vor.u32 %v3291_v53, %v2753_v37 }
 0x199   :  { %v2083_v33 = vadd.f32 %v2082_v20, %v1914_v60 }
 0x19b   :  { %v2221_v1 = vmax.f32 %v2083_v33, 0.0 }
 0x19c   :  { %v1746_v21 = vpop.f32.mrf.mxu2 }
 0x19d   :  { %v1747_v5 = vadd.f32 %v1746_v21, %v1578_v30  ;;  %v1915_v9 = vpop.f32.mrf.mxu3  ;;  %v2758_v30 = vor.u32 %v3289_v24, %v2755_v36 }
 0x19e   :  { %v1580_v3 = vpop.f32.mrf.mxu1 }
 0x19f   :  { %v1916_v17 = vadd.f32 %v1915_v9, %v1747_v5  ;;  %v1581_v25 = vadd.f32 %v1580_v3, %v1412_v57  ;;  %v1417_v9 = vadd.f32 %v4300_v23, %v4017_v38  ;;  %v1419_v57 = vadd.f32 %v4300_v23, %v4025_v44  ;;  %v3293_v38 = vld [vmem:[%s5086_s0 + $0x2d4] sm:$0xf]  ;;  %v3294_v44 = vld [vmem:[%s5086_s0 + $0x2dc] sm:$0xf] }
 0x1a0   :  { %v2087_v8 = vpop.f32.mrf.mxu0 }
 0x1a1   :  { %v2085_v2 = vadd.f32 %v2084_v35, %v1916_v17  ;;  %1619 = vmatmul.bf16.gmra.mxu1 %v2730_v43  ;;  %1788 = vmatmul.bf16.gmra.mxu2 %v2734_v29  ;;  %v2761_v35 = vld [vmem:[%s5086_s0 + $0x2b8] sm:$0xf] }
 0x1a2   :  { %1957 = vmatmul.bf16.gmra.mxu3 %v2738_v45  ;;  %v2762_v52 = vor.u32 %v3292_v16, %v2761_v35 }
 0x1a3   :  { %2126 = vmatmul.bf16.gmra.mxu0 %v2742_v51  ;;  %v2222_v27 = vmax.f32 %v2085_v2, 0.0 }
 0x1a4   :  { %v1749_v4 = vpop.f32.mrf.mxu2 }
 0x1a5   :  { %v3441_v11 = vpack.c.bf16 %v2222_v27, %v2221_v1  ;;  %v1918_v49 = vpop.f32.mrf.mxu3  ;;  %v1750_v20 = vadd.f32 %v1749_v4, %v1581_v25  ;;  %v2767_v1 = vld [vmem:[%s5086_s0 + $0x2e4] sm:$0xf0]  ;;  %v2773_v27 = vld [vmem:[%s5086_s0 + $0x2d8] sm:$0xf]  ;;  %v3296_v4 = vld [vmem:[%s5086_s0 + $0x2e8] sm:$0xf0] }
 0x1a6   :  { %v1582_v50 = vpop.f32.mrf.mxu1  ;;  %v2770_v12 = vor.u32 %v3293_v38, %v2767_v1  ;;  %v2774_v37 = vor.u32 %v3296_v4, %v2773_v27 }
 0x1a7   :  { %3569 = vst [vmem:[%s5087_s3 + $0x38] sm:$0xff] %v3441_v11   ;;  %v1919_v46 = vadd.f32 %v1918_v49, %v1750_v20  ;;  %v1583_v47 = vadd.f32 %v1582_v50, %v1414_v7  ;;  %v2775_v49 = vld [vmem:[%s5086_s0 + $0x2ec] sm:$0xf0]  ;;  %v2781_v50 = vld [vmem:[%s5086_s0 + $0x2e0] sm:$0xf] }
 0x1a8   :  { %v2089_v59 = vpop.f32.mrf.mxu0  ;;  %v3297_v20 = vld [vmem:[%s5086_s0 + $0x2f0] sm:$0xf0]  ;;  %v2778_v24 = vor.u32 %v3294_v44, %v2775_v49 }
 0x1a9   :  { %v2088_v13 = vadd.f32 %v2087_v8, %v1919_v46  ;;  %v2782_v46 = vor.u32 %v3297_v20, %v2781_v50  ;;  %v1427_v50 = vadd.f32 %v4300_v23, %v4097_v14  ;;  %v3303_v14 = vld [vmem:[%s5086_s0 + $0x324] sm:$0xf] }
 0x1ab   :  { %v2223_v43 = vmax.f32 %v2088_v13, 0.0 }
 0x1ac   :  { %v1751_v40 = vpop.f32.mrf.mxu2 }
 0x1ad   :  { %v1752_v41 = vadd.f32 %v1751_v40, %v1583_v47  ;;  %v1920_v19 = vpop.f32.mrf.mxu3  ;;  %v1422_v40 = vadd.f32 %v4300_v23, %v4057_v58  ;;  %v3298_v58 = vld [vmem:[%s5086_s0 + $0x2fc] sm:$0xf] }
 0x1ae   :  { %v1585_v60 = vpop.f32.mrf.mxu1 }
 0x1af   :  { %v1921_v61 = vadd.f32 %v1920_v19, %v1752_v41  ;;  %v1586_v51 = vadd.f32 %v1585_v60, %v1417_v9  ;;  %v2793_v9 = vld [vmem:[%s5086_s0 + $0x300] sm:$0xf] }
 0x1b0   :  { %v2092_v21 = vpop.f32.mrf.mxu0 }
 0x1b1   :  { %v2090_v5 = vadd.f32 %v2089_v59, %v1921_v61  ;;  %1624 = vmatmul.bf16.gmra.mxu1 %v2750_v39  ;;  %1793 = vmatmul.bf16.gmra.mxu2 %v2754_v55 }
 0x1b2   :  { %1962 = vmatmul.bf16.gmra.mxu3 %v2758_v30 }
 0x1b3   :  { %2131 = vmatmul.bf16.gmra.mxu0 %v2762_v52  ;;  %v2224_v29 = vmax.f32 %v2090_v5, 0.0  ;;  %v2787_v5 = vld [vmem:[%s5086_s0 + $0x30c] sm:$0xf0] }
 0x1b4   :  { %v1754_v3 = vpop.f32.mrf.mxu2 }
 0x1b5   :  { %v3446_v45 = vpack.c.bf16 %v2224_v29, %v2223_v43  ;;  %v1923_v33 = vpop.f32.mrf.mxu3  ;;  %v1755_v8 = vadd.f32 %v1754_v3, %v1586_v51  ;;  %v3301_v43 = vld [vmem:[%s5086_s0 + $0x310] sm:$0xf0]  ;;  %v2801_v51 = vld [vmem:[%s5086_s0 + $0x308] sm:$0xf] }
 0x1b6   :  { %v1587_v17 = vpop.f32.mrf.mxu1  ;;  %v2794_v38 = vor.u32 %v3301_v43, %v2793_v9 }
 0x1b7   :  { %3570 = vst [vmem:[%s5087_s3 + $0x40] sm:$0xff] %v3446_v45   ;;  %v1924_v11 = vadd.f32 %v1923_v33, %v1755_v8  ;;  %v1588_v25 = vadd.f32 %v1587_v17, %v1419_v57  ;;  %v2795_v45 = vld [vmem:[%s5086_s0 + $0x314] sm:$0xf0]  ;;  %v3302_v33 = vld [vmem:[%s5086_s0 + $0x318] sm:$0xf0]  ;;  %v2790_v57 = vor.u32 %v3298_v58, %v2787_v5 }
 0x1b8   :  { %v2094_v2 = vpop.f32.mrf.mxu0  ;;  %v2802_v4 = vor.u32 %v3302_v33, %v2801_v51 }
 0x1b9   :  { %v2093_v47 = vadd.f32 %v2092_v21, %v1924_v11  ;;  %v1424_v21 = vadd.f32 %v4300_v23, %v4065_v0  ;;  %v3299_v0 = vld [vmem:[%s5086_s0 + $0x304] sm:$0xf] }
 0x1ba   :  { %v2798_v27 = vor.u32 %v3299_v0, %v2795_v45 }
 0x1bb   :  { %v2225_v41 = vmax.f32 %v2093_v47, 0.0  ;;  %v1429_v47 = vadd.f32 %v4300_v23, %v4105_v26  ;;  %v3304_v26 = vld [vmem:[%s5086_s0 + $0x32c] sm:$0xf] }
 0x1bc   :  { %v1756_v59 = vpop.f32.mrf.mxu2 }
 0x1bd   :  { %v1757_v7 = vadd.f32 %v1756_v59, %v1588_v25  ;;  %v1925_v18 = vpop.f32.mrf.mxu3 }
 0x1be   :  { %v1590_v53 = vpop.f32.mrf.mxu1 }
 0x1bf   :  { %v1926_v36 = vadd.f32 %v1925_v18, %v1757_v7  ;;  %v1591_v60 = vadd.f32 %v1590_v53, %v1422_v40 }
 0x1c0   :  { %v2097_v35 = vpop.f32.mrf.mxu0 }
 0x1c1   :  { %v2095_v16 = vadd.f32 %v2094_v2, %v1926_v36  ;;  %1629 = vmatmul.bf16.gmra.mxu1 %v2770_v12  ;;  %1798 = vmatmul.bf16.gmra.mxu2 %v2774_v37  ;;  %v2807_v36 = vld [vmem:[%s5086_s0 + $0x334] sm:$0xf0] }
 0x1c2   :  { %1967 = vmatmul.bf16.gmra.mxu3 %v2778_v24 }
 0x1c3   :  { %2136 = vmatmul.bf16.gmra.mxu0 %v2782_v46  ;;  %v2226_v19 = vmax.f32 %v2095_v16, 0.0  ;;  %v3306_v16 = vld [vmem:[%s5086_s0 + $0x338] sm:$0xf0] }
 0x1c4   :  { %v1759_v39 = vpop.f32.mrf.mxu2 }
 0x1c5   :  { %v3451_v55 = vpack.c.bf16 %v2226_v19, %v2225_v41  ;;  %v1928_v30 = vpop.f32.mrf.mxu3  ;;  %v1760_v13 = vadd.f32 %v1759_v39, %v1591_v60  ;;  %v2815_v19 = vld [vmem:[%s5086_s0 + $0x33c] sm:$0xf0]  ;;  %v2821_v39 = vld [vmem:[%s5086_s0 + $0x330] sm:$0xf] }
 0x1c6   :  { %v1592_v52 = vpop.f32.mrf.mxu1  ;;  %v2818_v58 = vor.u32 %v3304_v26, %v2815_v19  ;;  %v1437_v26 = vadd.f32 %v4300_v23, %v4177_v15  ;;  %v3313_v15 = vld [vmem:[%s5086_s0 + $0x374] sm:$0xf] }
 0x1c7   :  { %3571 = vst [vmem:[%s5087_s3 + $0x48] sm:$0xff] %v3451_v55   ;;  %v1929_v29 = vadd.f32 %v1928_v30, %v1760_v13  ;;  %v1593_v3 = vadd.f32 %v1592_v52, %v1424_v21  ;;  %v3307_v55 = vld [vmem:[%s5086_s0 + $0x340] sm:$0xf0]  ;;  %v2810_v13 = vor.u32 %v3303_v14, %v2807_v36 }
 0x1c8   :  { %v2099_v61 = vpop.f32.mrf.mxu0  ;;  %v2822_v5 = vor.u32 %v3307_v55, %v2821_v39 }
 0x1c9   :  { %v2098_v44 = vadd.f32 %v2097_v35, %v1929_v29  ;;  %v2813_v35 = vld [vmem:[%s5086_s0 + $0x328] sm:$0xf] }
 0x1cb   :  { %v2227_v20 = vmax.f32 %v2098_v44, 0.0  ;;  %v2833_v44 = vld [vmem:[%s5086_s0 + $0x350] sm:$0xf] }
 0x1cc   :  { %v1761_v17 = vpop.f32.mrf.mxu2 }
 0x1cd   :  { %v1762_v8 = vadd.f32 %v1761_v17, %v1593_v3  ;;  %v1930_v2 = vpop.f32.mrf.mxu3  ;;  %v1432_v3 = vadd.f32 %v4300_v23, %v4137_v48  ;;  %v3308_v48 = vld [vmem:[%s5086_s0 + $0x34c] sm:$0xf] }
 0x1ce   :  { %v1595_v1 = vpop.f32.mrf.mxu1 }
 0x1cf   :  { %v1931_v11 = vadd.f32 %v1930_v2, %v1762_v8  ;;  %v1596_v12 = vadd.f32 %v1595_v1, %v1427_v50  ;;  %v2835_v50 = vld [vmem:[%s5086_s0 + $0x364] sm:$0xf0] }
 0x1d0   :  { %v2102_v25 = vpop.f32.mrf.mxu0 }
 0x1d1   :  { %v2100_v49 = vadd.f32 %v2099_v61, %v1931_v11  ;;  %1634 = vmatmul.bf16.gmra.mxu1 %v2790_v57  ;;  %1803 = vmatmul.bf16.gmra.mxu2 %v2794_v38  ;;  %v2814_v61 = vor.u32 %v3306_v16, %v2813_v35  ;;  %v3311_v11 = vld [vmem:[%s5086_s0 + $0x360] sm:$0xf0] }
 0x1d2   :  { %1972 = vmatmul.bf16.gmra.mxu3 %v2798_v27  ;;  %v1434_v27 = vadd.f32 %v4300_v23, %v4145_v56  ;;  %v3309_v56 = vld [vmem:[%s5086_s0 + $0x354] sm:$0xf] }
 0x1d3   :  { %2141 = vmatmul.bf16.gmra.mxu0 %v2802_v4  ;;  %v2228_v59 = vmax.f32 %v2100_v49, 0.0  ;;  %v2827_v4 = vld [vmem:[%s5086_s0 + $0x35c] sm:$0xf0] }
 0x1d4   :  { %v1764_v7 = vpop.f32.mrf.mxu2 }
 0x1d5   :  { %v3456_v18 = vpack.c.bf16 %v2228_v59, %v2227_v20  ;;  %v1933_v37 = vpop.f32.mrf.mxu3  ;;  %v1765_v24 = vadd.f32 %v1764_v7, %v1596_v12  ;;  %v2841_v20 = vld [vmem:[%s5086_s0 + $0x358] sm:$0xf]  ;;  %v3312_v59 = vld [vmem:[%s5086_s0 + $0x368] sm:$0xf0] }
 0x1d6   :  { %v1597_v53 = vpop.f32.mrf.mxu1 }
 0x1d7   :  { %3572 = vst [vmem:[%s5087_s3 + $0x50] sm:$0xff] %v3456_v18   ;;  %v1934_v40 = vadd.f32 %v1933_v37, %v1765_v24  ;;  %v1598_v41 = vadd.f32 %v1597_v53, %v1429_v47  ;;  %v2830_v37 = vor.u32 %v3308_v48, %v2827_v4  ;;  %v2834_v53 = vor.u32 %v3311_v11, %v2833_v44  ;;  %v4736_v4 = vld [vmem:[%s5085_s2] ss:$0 sm:$0xff] }
 0x1d8   :  { %v2104_v46 = vpop.f32.mrf.mxu0  ;;  %v2842_v47 = vor.u32 %v3312_v59, %v2841_v20  ;;  %v1442_v44 = vadd.f32 %v4736_v4, %v4217_v6  ;;  %v3318_v6 = vld [vmem:[%s5086_s0 + $0x39c] sm:$0xf] }
 0x1d9   :  { %v2103_v9 = vadd.f32 %v2102_v25, %v1934_v40 }
 0x1db   :  { %v2229_v45 = vmax.f32 %v2103_v9, 0.0 }
 0x1dc   :  { %v1766_v60 = vpop.f32.mrf.mxu2 }
 0x1dd   :  { %v1767_v30 = vadd.f32 %v1766_v60, %v1598_v41  ;;  %v1935_v52 = vpop.f32.mrf.mxu3 }
 0x1de   :  { %v1600_v21 = vpop.f32.mrf.mxu1 }
 0x1df   :  { %v1936_v43 = vadd.f32 %v1935_v52, %v1767_v30  ;;  %v1601_v8 = vadd.f32 %v1600_v21, %v1432_v3  ;;  %v2847_v21 = vld [vmem:[%s5086_s0 + $0x384] sm:$0xf0] }
 0x1e0   :  { %v2107_v0 = vpop.f32.mrf.mxu0 }
 0x1e1   :  { %v2105_v29 = vadd.f32 %v2104_v46, %v1936_v43  ;;  %1639 = vmatmul.bf16.gmra.mxu1 %v2810_v13  ;;  %1808 = vmatmul.bf16.gmra.mxu2 %v2814_v61  ;;  %v2838_v46 = vor.u32 %v3309_v56, %v2835_v50  ;;  %v1439_v61 = vadd.f32 %v4300_v23, %v4185_v32  ;;  %v3314_v23 = vld [vmem:[%s5086_s0 + $0x37c] sm:$0xf]  ;;  %v2855_v43 = vld [vmem:[%s5086_s0 + $0x38c] sm:$0xf0] }
 0x1e2   :  { %1977 = vmatmul.bf16.gmra.mxu3 %v2818_v58  ;;  %v2853_v58 = vld [vmem:[%s5086_s0 + $0x378] sm:$0xf] }
 0x1e3   :  { %2146 = vmatmul.bf16.gmra.mxu0 %v2822_v5  ;;  %v2230_v51 = vmax.f32 %v2105_v29, 0.0  ;;  %v3316_v5 = vld [vmem:[%s5086_s0 + $0x388] sm:$0xf0]  ;;  %v3317_v29 = vld [vmem:[%s5086_s0 + $0x390] sm:$0xf0] }
 0x1e4   :  { %v1769_v33 = vpop.f32.mrf.mxu2 }
 0x1e5   :  { %v3461_v17 = vpack.c.bf16 %v2230_v51, %v2229_v45  ;;  %v1938_v2 = vpop.f32.mrf.mxu3  ;;  %v1770_v38 = vadd.f32 %v1769_v33, %v1601_v8  ;;  %v2850_v33 = vor.u32 %v3313_v15, %v2847_v21  ;;  %v1447_v15 = vadd.f32 %v4736_v4, %v4257_v28  ;;  %v3323_v28 = vld [vmem:[%s5086_s0 + $0x3c4] sm:$0xf] }
 0x1e6   :  { %v1602_v57 = vpop.f32.mrf.mxu1 }
 0x1e7   :  { %3573 = vst [vmem:[%s5087_s3 + $0x58] sm:$0xff] %v3461_v17   ;;  %v1939_v25 = vadd.f32 %v1938_v2, %v1770_v38  ;;  %v1603_v49 = vadd.f32 %v1602_v57, %v1434_v27  ;;  %v2854_v17 = vor.u32 %v3316_v5, %v2853_v58  ;;  %v2858_v2 = vor.u32 %v3314_v23, %v2855_v43 }
 0x1e8   :  { %v2109_v1 = vpop.f32.mrf.mxu0 }
 0x1e9   :  { %v2108_v14 = vadd.f32 %v2107_v0, %v1939_v25  ;;  %v2861_v0 = vld [vmem:[%s5086_s0 + $0x380] sm:$0xf] }
 0x1ea   :  { %v2862_v57 = vor.u32 %v3317_v29, %v2861_v0 }
 0x1eb   :  { %v2231_v40 = vmax.f32 %v2108_v14, 0.0  ;;  %v2875_v14 = vld [vmem:[%s5086_s0 + $0x3b4] sm:$0xf0] }
 0x1ec   :  { %v1771_v7 = vpop.f32.mrf.mxu2 }
 0x1ed   :  { %v1772_v18 = vadd.f32 %v1771_v7, %v1603_v49  ;;  %v1940_v12 = vpop.f32.mrf.mxu3 }
 0x1ee   :  { %v1605_v24 = vpop.f32.mrf.mxu1 }
 0x1ef   :  { %v1941_v36 = vadd.f32 %v1940_v12, %v1772_v18  ;;  %v1606_v55 = vadd.f32 %v1605_v24, %v1437_v26  ;;  %v1444_v12 = vadd.f32 %v4736_v4, %v4225_v31  ;;  %v3321_v24 = vld [vmem:[%s5086_s0 + $0x3b0] sm:$0xf0]  ;;  %v3319_v31 = vld [vmem:[%s5086_s0 + $0x3a4] sm:$0xf] }
 0x1f0   :  { %v2112_v35 = vpop.f32.mrf.mxu0 }
 0x1f1   :  { %v2110_v16 = vadd.f32 %v2109_v1, %v1941_v36  ;;  %1644 = vmatmul.bf16.gmra.mxu1 %v2830_v37  ;;  %1813 = vmatmul.bf16.gmra.mxu2 %v2834_v53  ;;  %v2867_v37 = vld [vmem:[%s5086_s0 + $0x3ac] sm:$0xf0]  ;;  %v2873_v53 = vld [vmem:[%s5086_s0 + $0x3a0] sm:$0xf]  ;;  %v2881_v36 = vld [vmem:[%s5086_s0 + $0x3a8] sm:$0xf] }
 0x1f2   :  { %1982 = vmatmul.bf16.gmra.mxu3 %v2838_v46 }
 0x1f3   :  { %2151 = vmatmul.bf16.gmra.mxu0 %v2842_v47  ;;  %v2232_v41 = vmax.f32 %v2110_v16, 0.0 }
 0x1f4   :  { %v1774_v19 = vpop.f32.mrf.mxu2 }
 0x1f5   :  { %v3466_v39 = vpack.c.bf16 %v2232_v41, %v2231_v40  ;;  %v1943_v60 = vpop.f32.mrf.mxu3  ;;  %v1775_v52 = vadd.f32 %v1774_v19, %v1606_v55  ;;  %v2870_v41 = vor.u32 %v3318_v6, %v2867_v37  ;;  %v2874_v19 = vor.u32 %v3321_v24, %v2873_v53 }
 0x1f6   :  { %v1607_v30 = vpop.f32.mrf.mxu1  ;;  %v2878_v55 = vor.u32 %v3319_v31, %v2875_v14 }
 0x1f7   :  { %3574 = vst [vmem:[%s5087_s3 + $0x60] sm:$0xff] %v3466_v39   ;;  %v1944_v32 = vadd.f32 %v1943_v60, %v1775_v52  ;;  %v1608_v9 = vadd.f32 %v1607_v30, %v1439_v61 }
 0x1f8   :  { %v2114_v13 = vpop.f32.mrf.mxu0 }
 0x1f9   :  { %v2113_v38 = vadd.f32 %v2112_v35, %v1944_v32  ;;  %v3322_v35 = vld [vmem:[%s5086_s0 + $0x3b8] sm:$0xf0] }
 0x1fa   :  { %v2882_v60 = vor.u32 %v3322_v35, %v2881_v36  ;;  %v1454_v36 = vadd.f32 %v4736_v4, %v4013_v34  ;;  %v2907_v35 = vld [vmem:[%s5086_s0 + $0x3fc] sm:$0xf0]  ;;  %v3329_v34 = vld [vmem:[%s5086_s0 + $0x3f4] sm:$0xf] }
 0x1fb   :  { %v2233_v11 = vmax.f32 %v2113_v38, 0.0  ;;  %v3327_v38 = vld [vmem:[%s5086_s0 + $0x3e0] sm:$0xf0] }
 0x1fc   :  { %v1776_v3 = vpop.f32.mrf.mxu2 }
 0x1fd   :  { %v1777_v45 = vadd.f32 %v1776_v3, %v1608_v9  ;;  %v1945_v51 = vpop.f32.mrf.mxu3  ;;  %v1449_v3 = vadd.f32 %v4736_v4, %v4265_v63  ;;  %v3324_v63 = vld [vmem:[%s5086_s0 + $0x3cc] sm:$0xf] }
 0x1fe   :  { %v1610_v8 = vpop.f32.mrf.mxu1 }
 0x1ff   :  { %v1946_v1 = vadd.f32 %v1945_v51, %v1777_v45  ;;  %v1611_v50 = vadd.f32 %v1610_v8, %v1442_v44  ;;  %v2887_v45 = vld [vmem:[%s5086_s0 + $0x3d4] sm:$0xf0]  ;;  %v2893_v51 = vld [vmem:[%s5086_s0 + $0x3c8] sm:$0xf] }
 0x200   :  { %v2117_v27 = vpop.f32.mrf.mxu0  ;;  %v2890_v44 = vor.u32 %v3323_v28, %v2887_v45 }
 0x201   :  { %v2115_v48 = vadd.f32 %v2114_v13, %v1946_v1  ;;  %1649 = vmatmul.bf16.gmra.mxu1 %v2850_v33  ;;  %1818 = vmatmul.bf16.gmra.mxu2 %v2854_v17  ;;  %v3326_v33 = vld [vmem:[%s5086_s0 + $0x3d8] sm:$0xf0] }
 0x202   :  { %1987 = vmatmul.bf16.gmra.mxu3 %v2858_v2  ;;  %v2895_v2 = vld [vmem:[%s5086_s0 + $0x3dc] sm:$0xf0] }
 0x203   :  { %2156 = vmatmul.bf16.gmra.mxu0 %v2862_v57  ;;  %v2234_v56 = vmax.f32 %v2115_v48, 0.0  ;;  %v2901_v57 = vld [vmem:[%s5086_s0 + $0x3d0] sm:$0xf] }
 0x204   :  { %v1779_v25 = vpop.f32.mrf.mxu2 }
 0x205   :  { %v3471_v49 = vpack.c.bf16 %v2234_v56, %v2233_v11  ;;  %v1948_v20 = vpop.f32.mrf.mxu3  ;;  %v1780_v7 = vadd.f32 %v1779_v25, %v1611_v50  ;;  %v2894_v11 = vor.u32 %v3326_v33, %v2893_v51  ;;  %v2898_v25 = vor.u32 %v3324_v63, %v2895_v2  ;;  %v2927_v2 = vld [vmem:[%s5086_s0 + $0x424] sm:$0xf0] }
 0x206   :  { %v1612_v59 = vpop.f32.mrf.mxu1 }
 0x207   :  { %3575 = vst [vmem:[%s5087_s3 + $0x68] sm:$0xff] %v3471_v49   ;;  %v1949_v46 = vadd.f32 %v1948_v20, %v1780_v7  ;;  %v1613_v47 = vadd.f32 %v1612_v59, %v1444_v12  ;;  %v2902_v49 = vor.u32 %v3327_v38, %v2901_v57  ;;  %v2933_v57 = vld [vmem:[%s5086_s0 + $0x418] sm:$0xf]  ;;  %v3336_v38 = vld [vmem:[%s5086_s0 + $0x428] sm:$0xf0] }
 0x208   :  { %v2119_v18 = vpop.f32.mrf.mxu0 }
 0x209   :  { %v2118_v30 = vadd.f32 %v2117_v27, %v1949_v46 }
 0x20b   :  { %v2235_v21 = vmax.f32 %v2118_v30, 0.0 }
 0x20c   :  { %v1781_v16 = vpop.f32.mrf.mxu2 }
 0x20d   :  { %v1782_v26 = vadd.f32 %v1781_v16, %v1613_v47  ;;  %v1950_v40 = vpop.f32.mrf.mxu3  ;;  %v2913_v16 = vld [vmem:[%s5086_s0 + $0x3f0] sm:$0xf] }
 0x20e   :  { %v1615_v39 = vpop.f32.mrf.mxu1 }
 0x20f   :  { %v1951_v52 = vadd.f32 %v1950_v40, %v1782_v26  ;;  %v1616_v32 = vadd.f32 %v1615_v39, %v1447_v15  ;;  %v3331_v26 = vld [vmem:[%s5086_s0 + $0x400] sm:$0xf0]  ;;  %v2921_v39 = vld [vmem:[%s5086_s0 + $0x3f8] sm:$0xf] }
 0x210   :  { %v2122_v13 = vpop.f32.mrf.mxu0 }
 0x211   :  { %v2120_v61 = vadd.f32 %v2119_v18, %v1951_v52  ;;  %1654 = vmatmul.bf16.gmra.mxu1 %v2870_v41  ;;  %1823 = vmatmul.bf16.gmra.mxu2 %v2874_v19  ;;  %v1452_v18 = vadd.f32 %v4736_v4, %v3981_v22  ;;  %v3328_v22 = vld [vmem:[%s5086_s0 + $0x3ec] sm:$0xf]  ;;  %v2915_v19 = vld [vmem:[%s5086_s0 + $0x404] sm:$0xf0] }
 0x212   :  { %1992 = vmatmul.bf16.gmra.mxu3 %v2878_v55  ;;  %v3332_v55 = vld [vmem:[%s5086_s0 + $0x408] sm:$0xf0] }
 0x213   :  { %2161 = vmatmul.bf16.gmra.mxu0 %v2882_v60  ;;  %v2236_v58 = vmax.f32 %v2120_v61, 0.0  ;;  %v2914_v61 = vor.u32 %v3331_v26, %v2913_v16 }
 0x214   :  { %v1784_v5 = vpop.f32.mrf.mxu2 }
 0x215   :  { %v3476_v23 = vpack.c.bf16 %v2236_v58, %v2235_v21  ;;  %v1953_v9 = vpop.f32.mrf.mxu3  ;;  %v1785_v0 = vadd.f32 %v1784_v5, %v1616_v32  ;;  %v2918_v21 = vor.u32 %v3329_v34, %v2915_v19  ;;  %v2922_v58 = vor.u32 %v3332_v55, %v2921_v39  ;;  %v3341_v19 = vld [vmem:[%s5086_s0 + $0x450] sm:$0xf0] }
 0x216   :  { %v1617_v43 = vpop.f32.mrf.mxu1  ;;  %v1464_v34 = vadd.f32 %v4736_v4, %v4093_v10  ;;  %v3339_v10 = vld [vmem:[%s5086_s0 + $0x444] sm:$0xf] }
 0x217   :  { %3576 = vst [vmem:[%s5087_s3 + $0x70] sm:$0xff] %v3476_v23   ;;  %v1954_v17 = vadd.f32 %v1953_v9, %v1785_v0  ;;  %v1618_v8 = vadd.f32 %v1617_v43, %v1449_v3  ;;  %v1457_v43 = vadd.f32 %v4736_v4, %v4021_v42  ;;  %v3333_v42 = vld [vmem:[%s5086_s0 + $0x414] sm:$0xf] }
 0x218   :  { %v2124_v29 = vpop.f32.mrf.mxu0 }
 0x219   :  { %v2123_v50 = vadd.f32 %v2122_v13, %v1954_v17  ;;  %v2910_v13 = vor.u32 %v3328_v22, %v2907_v35 }
 0x21b   :  { %v2237_v12 = vmax.f32 %v2123_v50, 0.0  ;;  %v2930_v50 = vor.u32 %v3333_v42, %v2927_v2 }
 0x21c   :  { %v1786_v1 = vpop.f32.mrf.mxu2 }
 0x21d   :  { %v1787_v27 = vadd.f32 %v1786_v1, %v1618_v8  ;;  %v1955_v48 = vpop.f32.mrf.mxu3  ;;  %v1459_v8 = vadd.f32 %v4736_v4, %v4053_v54  ;;  %v3334_v54 = vld [vmem:[%s5086_s0 + $0x41c] sm:$0xf] }
 0x21e   :  { %v1620_v56 = vpop.f32.mrf.mxu1 }
 0x21f   :  { %v1956_v20 = vadd.f32 %v1955_v48, %v1787_v27  ;;  %v1621_v24 = vadd.f32 %v1620_v56, %v1452_v18  ;;  %v2935_v48 = vld [vmem:[%s5086_s0 + $0x42c] sm:$0xf0] }
 0x220   :  { %v2127_v59 = vpop.f32.mrf.mxu0 }
 0x221   :  { %v2125_v7 = vadd.f32 %v2124_v29, %v1956_v20  ;;  %1659 = vmatmul.bf16.gmra.mxu1 %v2890_v44  ;;  %1828 = vmatmul.bf16.gmra.mxu2 %v2894_v11  ;;  %v2941_v44 = vld [vmem:[%s5086_s0 + $0x420] sm:$0xf]  ;;  %v3337_v11 = vld [vmem:[%s5086_s0 + $0x430] sm:$0xf0]  ;;  %v2934_v20 = vor.u32 %v3336_v38, %v2933_v57 }
 0x222   :  { %1997 = vmatmul.bf16.gmra.mxu3 %v2898_v25  ;;  %v2942_v18 = vor.u32 %v3337_v11, %v2941_v44  ;;  %v5115_v38 = vld [vmem:[#allocation10_spill] sm:$0xff]  ;;  %v3346_v44 = vld [vmem:[%s5086_s0 + $0x478] sm:$0xf0]  ;;  %v3344_v11 = vld [vmem:[%s5086_s0 + $0x46c] sm:$0xf] }
 0x223   :  { %2166 = vmatmul.bf16.gmra.mxu0 %v2902_v49  ;;  %v2238_v6 = vmax.f32 %v2125_v7, 0.0  ;;  %v2938_v7 = vor.u32 %v3334_v54, %v2935_v48  ;;  %v1469_v54 = vadd.f32 %v4736_v4, %v5115_v38  ;;  %v2973_v48 = vld [vmem:[%s5086_s0 + $0x468] sm:$0xf] }
 0x224   :  { %v1789_v37 = vpop.f32.mrf.mxu2 }
 0x225   :  { %v3481_v53 = vpack.c.bf16 %v2238_v6, %v2237_v12  ;;  %v1958_v31 = vpop.f32.mrf.mxu3  ;;  %v1790_v47 = vadd.f32 %v1789_v37, %v1621_v24  ;;  %v1462_v24 = vadd.f32 %v4736_v4, %v4061_v62  ;;  %v3338_v62 = vld [vmem:[%s5086_s0 + $0x43c] sm:$0xf] }
 0x226   :  { %v1622_v46 = vpop.f32.mrf.mxu1 }
 0x227   :  { %3577 = vst [vmem:[%s5087_s3 + $0x78] sm:$0xff] %v3481_v53   ;;  %v1959_v40 = vadd.f32 %v1958_v31, %v1790_v47  ;;  %v1623_v41 = vadd.f32 %v1622_v46, %v1454_v36 }
 0x228   :  { %v2129_v14 = vpop.f32.mrf.mxu0 }
 0x229   :  { %v2128_v5 = vadd.f32 %v2127_v59, %v1959_v40  ;;  %v2947_v40 = vld [vmem:[%s5086_s0 + $0x44c] sm:$0xf0] }
 0x22b   :  { %v2239_v0 = vmax.f32 %v2128_v5, 0.0 }
 0x22c   :  { %v1791_v60 = vpop.f32.mrf.mxu2 }
 0x22d   :  { %v1792_v30 = vadd.f32 %v1791_v60, %v1623_v41  ;;  %v1960_v52 = vpop.f32.mrf.mxu3  ;;  %v2953_v41 = vld [vmem:[%s5086_s0 + $0x440] sm:$0xf]  ;;  %v2955_v60 = vld [vmem:[%s5086_s0 + $0x454] sm:$0xf0] }
 0x22e   :  { %v1625_v15 = vpop.f32.mrf.mxu1 }
 0x22f   :  { %v1961_v23 = vadd.f32 %v1960_v52, %v1792_v30  ;;  %v1626_v45 = vadd.f32 %v1625_v15, %v1457_v43  ;;  %v2961_v30 = vld [vmem:[%s5086_s0 + $0x448] sm:$0xf]  ;;  %v3342_v52 = vld [vmem:[%s5086_s0 + $0x458] sm:$0xf0] }
 0x230   :  { %v2132_v32 = vpop.f32.mrf.mxu0 }
 0x231   :  { %v2130_v9 = vadd.f32 %v2129_v14, %v1961_v23  ;;  %1664 = vmatmul.bf16.gmra.mxu1 %v2910_v13  ;;  %1833 = vmatmul.bf16.gmra.mxu2 %v2914_v61  ;;  %v2958_v23 = vor.u32 %v3339_v10, %v2955_v60  ;;  %v3348_v60 = vld [vmem:[%s5086_s0 + $0x48c] sm:$0xf] }
 0x232   :  { %2002 = vmatmul.bf16.gmra.mxu3 %v2918_v21  ;;  %v2950_v21 = vor.u32 %v3338_v62, %v2947_v40 }
 0x233   :  { %2171 = vmatmul.bf16.gmra.mxu0 %v2922_v58  ;;  %v2240_v29 = vmax.f32 %v2130_v9, 0.0  ;;  %v2954_v58 = vor.u32 %v3341_v19, %v2953_v41 }
 0x234   :  { %v1794_v3 = vpop.f32.mrf.mxu2 }
 0x235   :  { %v3486_v28 = vpack.c.bf16 %v2240_v29, %v2239_v0  ;;  %v1963_v51 = vpop.f32.mrf.mxu3  ;;  %v1795_v63 = vadd.f32 %v1794_v3, %v1626_v45  ;;  %v5114_v3 = vld [vmem:[#allocation8_spill] sm:$0xff] }
 0x236   :  { %v1627_v33 = vpop.f32.mrf.mxu1 }
 0x237   :  { %3578 = vst [vmem:[%s5087_s3 + $0x80] sm:$0xff] %v3486_v28   ;;  %v1964_v1 = vadd.f32 %v1963_v51, %v1795_v63  ;;  %v1628_v27 = vadd.f32 %v1627_v33, %v1459_v8  ;;  %v1467_v28 = vadd.f32 %v4736_v4, %v5114_v3 }
 0x238   :  { %v2134_v17 = vpop.f32.mrf.mxu0 }
 0x239   :  { %v2133_v12 = vadd.f32 %v2132_v32, %v1964_v1  ;;  %v2962_v32 = vor.u32 %v3342_v52, %v2961_v30  ;;  %v3343_v1 = vld [vmem:[%s5086_s0 + $0x464] sm:$0xf]  ;;  %v2987_v30 = vld [vmem:[%s5086_s0 + $0x49c] sm:$0xf0]  ;;  %v2993_v52 = vld [vmem:[%s5086_s0 + $0x490] sm:$0xf] }
 0x23b   :  { %v2241_v31 = vmax.f32 %v2133_v12, 0.0 }
 0x23c   :  { %v1796_v56 = vpop.f32.mrf.mxu2 }
 0x23d   :  { %v1797_v25 = vadd.f32 %v1796_v56, %v1628_v27  ;;  %v1965_v49 = vpop.f32.mrf.mxu3  ;;  %v2967_v27 = vld [vmem:[%s5086_s0 + $0x474] sm:$0xf0] }
 0x23e   :  { %v1630_v59 = vpop.f32.mrf.mxu1  ;;  %v2970_v12 = vor.u32 %v3343_v1, %v2967_v27 }
 0x23f   :  { %v1966_v6 = vadd.f32 %v1965_v49, %v1797_v25  ;;  %v1631_v36 = vadd.f32 %v1630_v59, %v1462_v24  ;;  %v2975_v49 = vld [vmem:[%s5086_s0 + $0x47c] sm:$0xf0] }
 0x240   :  { %v2137_v37 = vpop.f32.mrf.mxu0 }
 0x241   :  { %v2135_v53 = vadd.f32 %v2134_v17, %v1966_v6  ;;  %1669 = vmatmul.bf16.gmra.mxu1 %v2930_v50  ;;  %1838 = vmatmul.bf16.gmra.mxu2 %v2934_v20  ;;  %v2981_v50 = vld [vmem:[%s5086_s0 + $0x470] sm:$0xf]  ;;  %v3347_v20 = vld [vmem:[%s5086_s0 + $0x480] sm:$0xf0]  ;;  %v2974_v6 = vor.u32 %v3346_v44, %v2973_v48 }
 0x242   :  { %2007 = vmatmul.bf16.gmra.mxu3 %v2938_v7  ;;  %v2982_v24 = vor.u32 %v3347_v20, %v2981_v50  ;;  %v3007_v50 = vld [vmem:[%s5086_s0 + $0x4c4] sm:$0xf0]  ;;  %v3013_v20 = vld [vmem:[%s5086_s0 + $0x4b8] sm:$0xf] }
 0x243   :  { %2176 = vmatmul.bf16.gmra.mxu0 %v2942_v18  ;;  %v2242_v46 = vmax.f32 %v2135_v53, 0.0  ;;  %v2978_v53 = vor.u32 %v3344_v11, %v2975_v49  ;;  %v3353_v49 = vld [vmem:[%s5086_s0 + $0x4b4] sm:$0xf] }
 0x244   :  { %v1799_v47 = vpop.f32.mrf.mxu2 }
 0x245   :  { %v3491_v14 = vpack.c.bf16 %v2242_v46, %v2241_v31  ;;  %v1968_v22 = vpop.f32.mrf.mxu3  ;;  %v1800_v16 = vadd.f32 %v1799_v47, %v1631_v36  ;;  %v5116_v36 = vld [vmem:[#allocation12_spill] sm:$0xff] }
 0x246   :  { %v1632_v35 = vpop.f32.mrf.mxu1 }
 0x247   :  { %3579 = vst [vmem:[%s5087_s3 + $0x88] sm:$0xff] %v3491_v14   ;;  %v1969_v39 = vadd.f32 %v1968_v22, %v1800_v16  ;;  %v1633_v55 = vadd.f32 %v1632_v35, %v1464_v34  ;;  %v1472_v22 = vadd.f32 %v4736_v4, %v5116_v36 }
 0x248   :  { %v2139_v26 = vpop.f32.mrf.mxu0 }
 0x249   :  { %v2138_v9 = vadd.f32 %v2137_v37, %v1969_v39  ;;  %v5117_v39 = vld [vmem:[#allocation14_spill] sm:$0xff] }
 0x24b   :  { %v2243_v45 = vmax.f32 %v2138_v9, 0.0 }
 0x24c   :  { %v1801_v13 = vpop.f32.mrf.mxu2 }
 0x24d   :  { %v1802_v61 = vadd.f32 %v1801_v13, %v1633_v55  ;;  %v1970_v15 = vpop.f32.mrf.mxu3  ;;  %v1474_v55 = vadd.f32 %v4736_v4, %v5117_v39  ;;  %v3351_v13 = vld [vmem:[%s5086_s0 + $0x4a0] sm:$0xf0] }
 0x24e   :  { %v1635_v5 = vpop.f32.mrf.mxu1 }
 0x24f   :  { %v1971_v43 = vadd.f32 %v1970_v15, %v1802_v61  ;;  %v1636_v17 = vadd.f32 %v1635_v5, %v1467_v28  ;;  %v3349_v61 = vld [vmem:[%s5086_s0 + $0x494] sm:$0xf]  ;;  %v3001_v5 = vld [vmem:[%s5086_s0 + $0x498] sm:$0xf] }
 0x250   :  { %v2142_v0 = vpop.f32.mrf.mxu0 }
 0x251   :  { %v2140_v29 = vadd.f32 %v2139_v26, %v1971_v43  ;;  %1674 = vmatmul.bf16.gmra.mxu1 %v2950_v21  ;;  %1843 = vmatmul.bf16.gmra.mxu2 %v2954_v58  ;;  %v2995_v58 = vld [vmem:[%s5086_s0 + $0x4a4] sm:$0xf0] }
 0x252   :  { %2012 = vmatmul.bf16.gmra.mxu3 %v2958_v23  ;;  %v3352_v23 = vld [vmem:[%s5086_s0 + $0x4a8] sm:$0xf0]  ;;  %v2998_v28 = vor.u32 %v3349_v61, %v2995_v58  ;;  %v3358_v58 = vld [vmem:[%s5086_s0 + $0x4dc] sm:$0xf] }
 0x253   :  { %2181 = vmatmul.bf16.gmra.mxu0 %v2962_v32  ;;  %v2244_v51 = vmax.f32 %v2140_v29, 0.0  ;;  %v2994_v29 = vor.u32 %v3351_v13, %v2993_v52 }
 0x254   :  { %v1804_v33 = vpop.f32.mrf.mxu2 }
 0x255   :  { %v3496_v63 = vpack.c.bf16 %v2244_v51, %v2243_v45  ;;  %v1973_v8 = vpop.f32.mrf.mxu3  ;;  %v1805_v2 = vadd.f32 %v1804_v33, %v1636_v17  ;;  %v3002_v45 = vor.u32 %v3352_v23, %v3001_v5  ;;  %v3027_v5 = vld [vmem:[%s5086_s0 + $0x4ec] sm:$0xf0]  ;;  %v3033_v23 = vld [vmem:[%s5086_s0 + $0x4e0] sm:$0xf] }
 0x256   :  { %v1637_v42 = vpop.f32.mrf.mxu1 }
 0x257   :  { %3580 = vst [vmem:[%s5087_s3 + $0x90] sm:$0xff] %v3496_v63   ;;  %v1974_v56 = vadd.f32 %v1973_v8, %v1805_v2  ;;  %v1638_v25 = vadd.f32 %v1637_v42, %v1469_v54  ;;  %v5118_v8 = vld [vmem:[#allocation16_spill] sm:$0xff] }
 0x258   :  { %v2144_v57 = vpop.f32.mrf.mxu0  ;;  %v1477_v42 = vadd.f32 %v4736_v4, %v5118_v8 }
 0x259   :  { %v2143_v31 = vadd.f32 %v2142_v0, %v1974_v56  ;;  %v2990_v0 = vor.u32 %v3348_v60, %v2987_v30  ;;  %v5119_v56 = vld [vmem:[#allocation18_spill] sm:$0xff] }
 0x25b   :  { %v2245_v35 = vmax.f32 %v2143_v31, 0.0 }
 0x25c   :  { %v1806_v59 = vpop.f32.mrf.mxu2 }
 0x25d   :  { %v1807_v7 = vadd.f32 %v1806_v59, %v1638_v25  ;;  %v1975_v18 = vpop.f32.mrf.mxu3  ;;  %v1479_v25 = vadd.f32 %v4736_v4, %v5119_v56  ;;  %v3356_v59 = vld [vmem:[%s5086_s0 + $0x4c8] sm:$0xf0] }
 0x25e   :  { %v1640_v37 = vpop.f32.mrf.mxu1 }
 0x25f   :  { %v1976_v46 = vadd.f32 %v1975_v18, %v1807_v7  ;;  %v1641_v62 = vadd.f32 %v1640_v37, %v1472_v22  ;;  %v3354_v7 = vld [vmem:[%s5086_s0 + $0x4bc] sm:$0xf]  ;;  %v3021_v37 = vld [vmem:[%s5086_s0 + $0x4c0] sm:$0xf] }
 0x260   :  { %v2147_v47 = vpop.f32.mrf.mxu0 }
 0x261   :  { %v2145_v14 = vadd.f32 %v2144_v57, %v1976_v46  ;;  %1679 = vmatmul.bf16.gmra.mxu1 %v2970_v12  ;;  %1848 = vmatmul.bf16.gmra.mxu2 %v2974_v6  ;;  %v3015_v6 = vld [vmem:[%s5086_s0 + $0x4cc] sm:$0xf0] }
 0x262   :  { %2017 = vmatmul.bf16.gmra.mxu3 %v2978_v53  ;;  %v3357_v53 = vld [vmem:[%s5086_s0 + $0x4d0] sm:$0xf0]  ;;  %v3018_v22 = vor.u32 %v3354_v7, %v3015_v6 }
 0x263   :  { %2186 = vmatmul.bf16.gmra.mxu0 %v2982_v24  ;;  %v2246_v16 = vmax.f32 %v2145_v14, 0.0  ;;  %v3014_v14 = vor.u32 %v3356_v59, %v3013_v20 }
 0x264   :  { %v1809_v26 = vpop.f32.mrf.mxu2 }
 0x265   :  { %v3501_v34 = vpack.c.bf16 %v2246_v16, %v2245_v35  ;;  %v1978_v40 = vpop.f32.mrf.mxu3  ;;  %v1810_v19 = vadd.f32 %v1809_v26, %v1641_v62  ;;  %v3022_v35 = vor.u32 %v3357_v53, %v3021_v37 }
 0x266   :  { %v1642_v41 = vpop.f32.mrf.mxu1 }
 0x267   :  { %3581 = vst [vmem:[%s5087_s3 + $0x98] sm:$0xff] %v3501_v34   ;;  %v1979_v15 = vadd.f32 %v1978_v40, %v1810_v19  ;;  %v1643_v21 = vadd.f32 %v1642_v41, %v1474_v55  ;;  %v5120_v40 = vld [vmem:[#allocation20_spill] sm:$0xff] }
 0x268   :  { %v2149_v10 = vpop.f32.mrf.mxu0  ;;  %v1482_v41 = vadd.f32 %v4736_v4, %v5120_v40 }
 0x269   :  { %v2148_v51 = vadd.f32 %v2147_v47, %v1979_v15  ;;  %v3010_v47 = vor.u32 %v3353_v49, %v3007_v50  ;;  %v5121_v15 = vld [vmem:[#allocation22_spill] sm:$0xff] }
 0x26b   :  { %v2247_v2 = vmax.f32 %v2148_v51, 0.0 }
 0x26c   :  { %v1811_v32 = vpop.f32.mrf.mxu2 }
 0x26d   :  { %v1812_v9 = vadd.f32 %v1811_v32, %v1643_v21  ;;  %v1980_v43 = vpop.f32.mrf.mxu3  ;;  %v1484_v21 = vadd.f32 %v4736_v4, %v5121_v15  ;;  %v3361_v32 = vld [vmem:[%s5086_s0 + $0x4f0] sm:$0xf0] }
 0x26e   :  { %v1645_v3 = vpop.f32.mrf.mxu1 }
 0x26f   :  { %v1981_v33 = vadd.f32 %v1980_v43, %v1812_v9  ;;  %v1646_v1 = vadd.f32 %v1645_v3, %v1477_v42  ;;  %v3359_v9 = vld [vmem:[%s5086_s0 + $0x4e4] sm:$0xf]  ;;  %v3041_v3 = vld [vmem:[%s5086_s0 + $0x4e8] sm:$0xf] }
 0x270   :  { %v2152_v63 = vpop.f32.mrf.mxu0 }
 0x271   :  { %v2150_v17 = vadd.f32 %v2149_v10, %v1981_v33  ;;  %1684 = vmatmul.bf16.gmra.mxu1 %v2990_v0  ;;  %1853 = vmatmul.bf16.gmra.mxu2 %v2994_v29  ;;  %v3035_v29 = vld [vmem:[%s5086_s0 + $0x4f4] sm:$0xf0] }
 0x272   :  { %2022 = vmatmul.bf16.gmra.mxu3 %v2998_v28  ;;  %v3362_v28 = vld [vmem:[%s5086_s0 + $0x4f8] sm:$0xf0]  ;;  %v3038_v42 = vor.u32 %v3359_v9, %v3035_v29 }
 0x273   :  { %2191 = vmatmul.bf16.gmra.mxu0 %v3002_v45  ;;  %v2248_v57 = vmax.f32 %v2150_v17, 0.0  ;;  %v3034_v17 = vor.u32 %v3361_v32, %v3033_v23 }
 0x274   :  { %v1814_v38 = vpop.f32.mrf.mxu2 }
 0x275   :  { %v3506_v54 = vpack.c.bf16 %v2248_v57, %v2247_v2  ;;  %v1983_v27 = vpop.f32.mrf.mxu3  ;;  %v1815_v44 = vadd.f32 %v1814_v38, %v1646_v1  ;;  %v3042_v2 = vor.u32 %v3362_v28, %v3041_v3 }
 0x276   :  { %v1647_v48 = vpop.f32.mrf.mxu1 }
 0x277   :  { %3582 = vst [vmem:[%s5087_s3 + $0xa0] sm:$0xff] %v3506_v54   ;;  %v1984_v18 = vadd.f32 %v1983_v27, %v1815_v44  ;;  %v1648_v12 = vadd.f32 %v1647_v48, %v1479_v25  ;;  %v5122_v27 = vld [vmem:[#allocation24_spill] sm:$0xff] }
 0x278   :  { %v2154_v11 = vpop.f32.mrf.mxu0  ;;  %v1487_v48 = vadd.f32 %v4736_v4, %v5122_v27 }
 0x279   :  { %v2153_v16 = vadd.f32 %v2152_v63, %v1984_v18  ;;  %v3030_v63 = vor.u32 %v3358_v58, %v3027_v5  ;;  %v5123_v18 = vld [vmem:[#allocation26_spill] sm:$0xff] }
 0x27b   :  { %v2249_v19 = vmax.f32 %v2153_v16, 0.0 }
 0x27c   :  { %v1816_v24 = vpop.f32.mrf.mxu2 }
 0x27d   :  { %v1817_v31 = vadd.f32 %v1816_v24, %v1648_v12  ;;  %v1985_v46 = vpop.f32.mrf.mxu3  ;;  %v1489_v12 = vadd.f32 %v4736_v4, %v5123_v18 }
 0x27e   :  { %v1650_v36 = vpop.f32.mrf.mxu1 }
 0x27f   :  { %v1986_v26 = vadd.f32 %v1985_v46, %v1817_v31  ;;  %v1651_v60 = vadd.f32 %v1650_v36, %v1482_v41 }
 0x280   :  { %v2157_v34 = vpop.f32.mrf.mxu0 }
 0x281   :  { %v2155_v62 = vadd.f32 %v2154_v11, %v1986_v26  ;;  %1689 = vmatmul.bf16.gmra.mxu1 %v3010_v47  ;;  %1858 = vmatmul.bf16.gmra.mxu2 %v3014_v14 }
 0x282   :  { %2027 = vmatmul.bf16.gmra.mxu3 %v3018_v22 }
 0x283   :  { %2196 = vmatmul.bf16.gmra.mxu0 %v3022_v35  ;;  %v2250_v10 = vmax.f32 %v2155_v62, 0.0  ;;  %v5124_v35 = vld [vmem:[#allocation2_spill] sm:$0xff] }
 0x284   :  { %v1819_v39 = vpop.f32.mrf.mxu2  ;;  %v1492_v16 = vadd.f32 %v4736_v4, %v5124_v35 }
 0x285   :  { %v3511_v55 = vpack.c.bf16 %v2250_v10, %v2249_v19  ;;  %v1988_v30 = vpop.f32.mrf.mxu3  ;;  %v1820_v13 = vadd.f32 %v1819_v39, %v1651_v60  ;;  %v5125_v60 = vld [vmem:[#allocation3_spill] sm:$0xff] }
 0x286   :  { %v1652_v52 = vpop.f32.mrf.mxu1 }
 0x287   :  { %3583 = vst [vmem:[%s5087_s3 + $0xa8] sm:$0xff] %v3511_v55   ;;  %v1989_v43 = vadd.f32 %v1988_v30, %v1820_v13  ;;  %v1653_v0 = vadd.f32 %v1652_v52, %v1484_v21  ;;  %v1494_v30 = vadd.f32 %v4736_v4, %v5125_v60 }
 0x288   :  { %v2159_v61 = vpop.f32.mrf.mxu0 }
 0x289   :  { %v2158_v57 = vadd.f32 %v2157_v34, %v1989_v43  ;;  %v5126_v43 = vld [vmem:[#allocation4_spill] sm:$0xff] }
 0x28b   :  { %v2251_v44 = vmax.f32 %v2158_v57, 0.0 }
 0x28c   :  { %v1821_v45 = vpop.f32.mrf.mxu2 }
 0x28d   :  { %v1822_v51 = vadd.f32 %v1821_v45, %v1653_v0  ;;  %v1990_v33 = vpop.f32.mrf.mxu3  ;;  %v1497_v0 = vadd.f32 %v4736_v4, %v5126_v43 }
 0x28e   :  { %v1655_v8 = vpop.f32.mrf.mxu1 }
 0x28f   :  { %v1991_v38 = vadd.f32 %v1990_v33, %v1822_v51  ;;  %v1656_v49 = vadd.f32 %v1655_v8, %v1487_v48 }
 0x290   :  { %v2162_v54 = vpop.f32.mrf.mxu0 }
 0x291   :  { %v2160_v1 = vadd.f32 %v2159_v61, %v1991_v38  ;;  %1694 = vmatmul.bf16.gmra.mxu1 %v3030_v63  ;;  %1863 = vmatmul.bf16.gmra.mxu2 %v3034_v17 }
 0x292   :  { %2032 = vmatmul.bf16.gmra.mxu3 %v3038_v42  ;;  %v5127_v42 = vld [vmem:[#allocation5_spill] sm:$0xff] }
 0x293   :  { %2201 = vmatmul.bf16.gmra.mxu0 %v3042_v2  ;;  %v2252_v11 = vmax.f32 %v2160_v1, 0.0  ;;  %v1499_v2 = vadd.f32 %v4736_v4, %v5127_v42 }
 0x294   :  { %v1824_v56 = vpop.f32.mrf.mxu2 }
 0x295   :  { %v3516_v25 = vpack.c.bf16 %v2252_v11, %v2251_v44  ;;  %v1993_v50 = vpop.f32.mrf.mxu3  ;;  %v1825_v59 = vadd.f32 %v1824_v56, %v1656_v49  ;;  %v5128_v49 = vld [vmem:[#allocation6_spill] sm:$0xff] }
 0x296   :  { %v1657_v20 = vpop.f32.mrf.mxu1 }
 0x297   :  { %3584 = vst [vmem:[%s5087_s3 + $0xb0] sm:$0xff] %v3516_v25   ;;  %v1994_v6 = vadd.f32 %v1993_v50, %v1825_v59  ;;  %v1658_v37 = vadd.f32 %v1657_v20, %v1489_v12  ;;  %v1502_v50 = vadd.f32 %v4736_v4, %v5128_v49 }
 0x298   :  { %v2164_v7 = vpop.f32.mrf.mxu0 }
 0x299   :  { %v2163_v47 = vadd.f32 %v2162_v54, %v1994_v6 }
 0x29b   :  { %v2253_v26 = vmax.f32 %v2163_v47, 0.0 }
 0x29c   :  { %v1826_v53 = vpop.f32.mrf.mxu2 }
 0x29d   :  { %v1827_v24 = vadd.f32 %v1826_v53, %v1658_v37  ;;  %v1995_v31 = vpop.f32.mrf.mxu3 }
 0x29e   :  { %v1660_v46 = vpop.f32.mrf.mxu1 }
 0x29f   :  { %v1996_v14 = vadd.f32 %v1995_v31, %v1827_v24  ;;  %v1661_v41 = vadd.f32 %v1660_v46, %v1492_v16  ;;  %v5129_v31 = vld [vmem:[#allocation7_spill] sm:$0xff] }
 0x2a0   :  { %v2167_v36 = vpop.f32.mrf.mxu0  ;;  %v1504_v46 = vadd.f32 %v4736_v4, %v5129_v31 }
 0x2a1   :  { %v2165_v22 = vadd.f32 %v2164_v7, %v1996_v14 }
 0x2a3   :  { %v2254_v34 = vmax.f32 %v2165_v22, 0.0 }
 0x2a4   :  { %v1829_v62 = vpop.f32.mrf.mxu2 }
 0x2a5   :  { %v3521_v40 = vpack.c.bf16 %v2254_v34, %v2253_v26  ;;  %v1998_v19 = vpop.f32.mrf.mxu3  ;;  %v1830_v39 = vadd.f32 %v1829_v62, %v1661_v41  ;;  %v5130_v41 = vld [vmem:[#allocation9_spill] sm:$0xff] }
 0x2a6   :  { %v1662_v10 = vpop.f32.mrf.mxu1 }
 0x2a7   :  { %3585 = vst [vmem:[%s5087_s3 + $0xb8] sm:$0xff] %v3521_v40   ;;  %v1999_v52 = vadd.f32 %v1998_v19, %v1830_v39  ;;  %v1663_v13 = vadd.f32 %v1662_v10, %v1494_v30  ;;  %v1507_v19 = vadd.f32 %v4736_v4, %v5130_v41 }
 0x2a8   :  { %v2169_v55 = vpop.f32.mrf.mxu0 }
 0x2a9   :  { %v2168_v5 = vadd.f32 %v2167_v36, %v1999_v52 }
 0x2ab   :  { %v2255_v29 = vmax.f32 %v2168_v5, 0.0 }
 0x2ac   :  { %v1831_v61 = vpop.f32.mrf.mxu2 }
 0x2ad   :  { %v1832_v15 = vadd.f32 %v1831_v61, %v1663_v13  ;;  %v2000_v21 = vpop.f32.mrf.mxu3 }
 0x2ae   :  { %v1665_v58 = vpop.f32.mrf.mxu1 }
 0x2af   :  { %v2001_v23 = vadd.f32 %v2000_v21, %v1832_v15  ;;  %v1666_v51 = vadd.f32 %v1665_v58, %v1497_v0  ;;  %v5131_v21 = vld [vmem:[#allocation11_spill] sm:$0xff] }
 0x2b0   :  { %v2172_v32 = vpop.f32.mrf.mxu0  ;;  %v1509_v58 = vadd.f32 %v4736_v4, %v5131_v21 }
 0x2b1   :  { %v2170_v9 = vadd.f32 %v2169_v55, %v2001_v23 }
 0x2b3   :  { %v2256_v3 = vmax.f32 %v2170_v9, 0.0 }
 0x2b4   :  { %v1834_v28 = vpop.f32.mrf.mxu2 }
 0x2b5   :  { %v3526_v45 = vpack.c.bf16 %v2256_v3, %v2255_v29  ;;  %v2003_v33 = vpop.f32.mrf.mxu3  ;;  %v1835_v17 = vadd.f32 %v1834_v28, %v1666_v51  ;;  %v5132_v51 = vld [vmem:[#allocation13_spill] sm:$0xff] }
 0x2b6   :  { %v1667_v63 = vpop.f32.mrf.mxu1 }
 0x2b7   :  { %3586 = vst [vmem:[%s5087_s3 + $0xc0] sm:$0xff] %v3526_v45   ;;  %v2004_v57 = vadd.f32 %v2003_v33, %v1835_v17  ;;  %v1668_v38 = vadd.f32 %v1667_v63, %v1499_v2  ;;  %v1512_v33 = vadd.f32 %v4736_v4, %v5132_v51 }
 0x2b8   :  { %v2174_v8 = vpop.f32.mrf.mxu0 }
 0x2b9   :  { %v2173_v44 = vadd.f32 %v2172_v32, %v2004_v57 }
 0x2bb   :  { %v2257_v20 = vmax.f32 %v2173_v44, 0.0 }
 0x2bc   :  { %v1836_v54 = vpop.f32.mrf.mxu2 }
 0x2bd   :  { %v1837_v1 = vadd.f32 %v1836_v54, %v1668_v38  ;;  %v2005_v27 = vpop.f32.mrf.mxu3 }
 0x2be   :  { %v1670_v48 = vpop.f32.mrf.mxu1 }
 0x2bf   :  { %v2006_v11 = vadd.f32 %v2005_v27, %v1837_v1  ;;  %v1671_v12 = vadd.f32 %v1670_v48, %v1502_v50  ;;  %v5133_v27 = vld [vmem:[#allocation15_spill] sm:$0xff] }
 0x2c0   :  { %v2177_v56 = vpop.f32.mrf.mxu0  ;;  %v1514_v48 = vadd.f32 %v4736_v4, %v5133_v27 }
 0x2c1   :  { %v2175_v25 = vadd.f32 %v2174_v8, %v2006_v11 }
 0x2c3   :  { %v2258_v59 = vmax.f32 %v2175_v25, 0.0 }
 0x2c4   :  { %v1839_v7 = vpop.f32.mrf.mxu2 }
 0x2c5   :  { %v3531_v18 = vpack.c.bf16 %v2258_v59, %v2257_v20  ;;  %v2008_v6 = vpop.f32.mrf.mxu3  ;;  %v1840_v53 = vadd.f32 %v1839_v7, %v1671_v12  ;;  %v5134_v12 = vld [vmem:[#allocation17_spill] sm:$0xff] }
 0x2c6   :  { %v1672_v37 = vpop.f32.mrf.mxu1 }
 0x2c7   :  { %3587 = vst [vmem:[%s5087_s3 + $0xc8] sm:$0xff] %v3531_v18   ;;  %v2009_v47 = vadd.f32 %v2008_v6, %v1840_v53  ;;  %v1673_v14 = vadd.f32 %v1672_v37, %v1504_v46  ;;  %v1517_v6 = vadd.f32 %v4736_v4, %v5134_v12 }
 0x2c8   :  { %v2179_v24 = vpop.f32.mrf.mxu0 }
 0x2c9   :  { %v2178_v26 = vadd.f32 %v2177_v56, %v2009_v47 }
 0x2cb   :  { %v2259_v10 = vmax.f32 %v2178_v26, 0.0 }
 0x2cc   :  { %v1841_v36 = vpop.f32.mrf.mxu2 }
 0x2cd   :  { %v1842_v22 = vadd.f32 %v1841_v36, %v1673_v14  ;;  %v2010_v35 = vpop.f32.mrf.mxu3 }
 0x2ce   :  { %v1675_v16 = vpop.f32.mrf.mxu1 }
 0x2cf   :  { %v2011_v34 = vadd.f32 %v2010_v35, %v1842_v22  ;;  %v1676_v30 = vadd.f32 %v1675_v16, %v1507_v19  ;;  %v5135_v35 = vld [vmem:[#allocation19_spill] sm:$0xff] }
 0x2d0   :  { %v2182_v62 = vpop.f32.mrf.mxu0  ;;  %v1519_v16 = vadd.f32 %v4736_v4, %v5135_v35 }
 0x2d1   :  { %v2180_v40 = vadd.f32 %v2179_v24, %v2011_v34 }
 0x2d3   :  { %v2260_v39 = vmax.f32 %v2180_v40, 0.0 }
 0x2d4   :  { %v1844_v55 = vpop.f32.mrf.mxu2 }
 0x2d5   :  { %v3536_v60 = vpack.c.bf16 %v2260_v39, %v2259_v10  ;;  %v2013_v52 = vpop.f32.mrf.mxu3  ;;  %v1845_v61 = vadd.f32 %v1844_v55, %v1676_v30  ;;  %v5136_v30 = vld [vmem:[#allocation21_spill] sm:$0xff] }
 0x2d6   :  { %v1677_v13 = vpop.f32.mrf.mxu1 }
 0x2d7   :  { %3588 = vst [vmem:[%s5087_s3 + $0xd0] sm:$0xff] %v3536_v60   ;;  %v2014_v5 = vadd.f32 %v2013_v52, %v1845_v61  ;;  %v1678_v23 = vadd.f32 %v1677_v13, %v1509_v58  ;;  %v1522_v52 = vadd.f32 %v4736_v4, %v5136_v30 }
 0x2d8   :  { %v2184_v15 = vpop.f32.mrf.mxu0 }
 0x2d9   :  { %v2183_v29 = vadd.f32 %v2182_v62, %v2014_v5 }
 0x2db   :  { %v2261_v63 = vmax.f32 %v2183_v29, 0.0 }
 0x2dc   :  { %v1846_v32 = vpop.f32.mrf.mxu2 }
 0x2dd   :  { %v1847_v9 = vadd.f32 %v1846_v32, %v1678_v23  ;;  %v2015_v43 = vpop.f32.mrf.mxu3 }
 0x2de   :  { %v1680_v0 = vpop.f32.mrf.mxu1 }
 0x2df   :  { %v2016_v3 = vadd.f32 %v2015_v43, %v1847_v9  ;;  %v1681_v2 = vadd.f32 %v1680_v0, %v1512_v33  ;;  %v5137_v9 = vld [vmem:[#allocation23_spill] sm:$0xff] }
 0x2e0   :  { %v2187_v28 = vpop.f32.mrf.mxu0  ;;  %v1524_v43 = vadd.f32 %v4736_v4, %v5137_v9 }
 0x2e1   :  { %v2185_v45 = vadd.f32 %v2184_v15, %v2016_v3 }
 0x2e3   :  { %v2262_v17 = vmax.f32 %v2185_v45, 0.0 }
 0x2e4   :  { %v1849_v8 = vpop.f32.mrf.mxu2 }
 0x2e5   :  { %v3541_v42 = vpack.c.bf16 %v2262_v17, %v2261_v63  ;;  %v2018_v57 = vpop.f32.mrf.mxu3  ;;  %v1850_v54 = vadd.f32 %v1849_v8, %v1681_v2  ;;  %v5138_v2 = vld [vmem:[#allocation25_spill] sm:$0xff] }
 0x2e6   :  { %v1682_v38 = vpop.f32.mrf.mxu1 }
 0x2e7   :  { %3589 = vst [vmem:[%s5087_s3 + $0xd8] sm:$0xff] %v3541_v42   ;;  %v2019_v44 = vadd.f32 %v2018_v57, %v1850_v54  ;;  %v1683_v11 = vadd.f32 %v1682_v38, %v1514_v48  ;;  %v3620_v42 = vld [vmem:[%s5085_s2] ss:$0 sm:$0xff] }
 0x2e8   :  { %v2189_v1 = vpop.f32.mrf.mxu0  ;;  %v1527_v57 = vadd.f32 %v3620_v42, %v5138_v2 }
 0x2e9   :  { %v2188_v20 = vadd.f32 %v2187_v28, %v2019_v44 }
 0x2eb   :  { %v2263_v37 = vmax.f32 %v2188_v20, 0.0 }
 0x2ec   :  { %v1851_v56 = vpop.f32.mrf.mxu2 }
 0x2ed   :  { %v1852_v25 = vadd.f32 %v1851_v56, %v1683_v11  ;;  %v2020_v49 = vpop.f32.mrf.mxu3 }
 0x2ee   :  { %v1685_v50 = vpop.f32.mrf.mxu1 }
 0x2ef   :  { %v2021_v59 = vadd.f32 %v2020_v49, %v1852_v25  ;;  %v1686_v46 = vadd.f32 %v1685_v50, %v1517_v6  ;;  %v5139_v25 = vld [vmem:[#allocation27_spill] sm:$0xff] }
 0x2f0   :  { %v2192_v7 = vpop.f32.mrf.mxu0  ;;  %v1529_v49 = vadd.f32 %v3620_v42, %v5139_v25 }
 0x2f1   :  { %v2190_v18 = vadd.f32 %v2189_v1, %v2021_v59 }
 0x2f3   :  { %v2264_v53 = vmax.f32 %v2190_v18, 0.0 }
 0x2f4   :  { %v1854_v24 = vpop.f32.mrf.mxu2 }
 0x2f5   :  { %v3546_v31 = vpack.c.bf16 %v2264_v53, %v2263_v37  ;;  %v2023_v47 = vpop.f32.mrf.mxu3  ;;  %v1855_v36 = vadd.f32 %v1854_v24, %v1686_v46 }
 0x2f6   :  { %v1687_v14 = vpop.f32.mrf.mxu1 }
 0x2f7   :  { %3590 = vst [vmem:[%s5087_s3 + $0xe0] sm:$0xff] %v3546_v31   ;;  %v2024_v26 = vadd.f32 %v2023_v47, %v1855_v36  ;;  %v1688_v34 = vadd.f32 %v1687_v14, %v1519_v16 }
 0x2f8   :  { %v2194_v22 = vpop.f32.mrf.mxu0 }
 0x2f9   :  { %v2193_v10 = vadd.f32 %v2192_v7, %v2024_v26 }
 0x2fb   :  { %v2265_v13 = vmax.f32 %v2193_v10, 0.0 }
 0x2fc   :  { %v1856_v62 = vpop.f32.mrf.mxu2 }
 0x2fd   :  { %v1857_v40 = vadd.f32 %v1856_v62, %v1688_v34  ;;  %v2025_v41 = vpop.f32.mrf.mxu3 }
 0x2fe   :  { %v1690_v19 = vpop.f32.mrf.mxu1 }
 0x2ff   :  { %v2026_v39 = vadd.f32 %v2025_v41, %v1857_v40  ;;  %v1691_v58 = vadd.f32 %v1690_v19, %v1522_v52 }
 0x300   :  { %v2197_v60 = vpop.f32.mrf.mxu0 }
 0x301   :  { %v2195_v55 = vadd.f32 %v2194_v22, %v2026_v39 }
 0x303   :  { %v2266_v61 = vmax.f32 %v2195_v55, 0.0 }
 0x304   :  { %v1859_v15 = vpop.f32.mrf.mxu2 }
 0x305   :  { %v3551_v21 = vpack.c.bf16 %v2266_v61, %v2265_v13  ;;  %v2028_v5 = vpop.f32.mrf.mxu3  ;;  %v1860_v32 = vadd.f32 %v1859_v15, %v1691_v58 }
 0x306   :  { %v1692_v23 = vpop.f32.mrf.mxu1 }
 0x307   :  { %3591 = vst [vmem:[%s5087_s3 + $0xe8] sm:$0xff] %v3551_v21   ;;  %v2029_v0 = vadd.f32 %v2028_v5, %v1860_v32  ;;  %v1693_v29 = vadd.f32 %v1692_v23, %v1524_v43 }
 0x308   :  { %v2199_v3 = vpop.f32.mrf.mxu0 }
 0x309   :  { %v2198_v63 = vadd.f32 %v2197_v60, %v2029_v0 }
 0x30b   :  { %v2267_v38 = vmax.f32 %v2198_v63, 0.0 }
 0x30c   :  { %v1861_v28 = vpop.f32.mrf.mxu2 }
 0x30d   :  { %v1862_v45 = vadd.f32 %v1861_v28, %v1693_v29  ;;  %v2030_v51 = vpop.f32.mrf.mxu3 }
 0x30e   :  { %v1695_v33 = vpop.f32.mrf.mxu1 }
 0x30f   :  { %v2031_v17 = vadd.f32 %v2030_v51, %v1862_v45  ;;  %v1696_v27 = vadd.f32 %v1695_v33, %v1527_v57 }
 0x310   :  { %v2202_v44 = vpop.f32.mrf.mxu0 }
 0x311   :  { %v2200_v8 = vadd.f32 %v2199_v3, %v2031_v17 }
 0x313   :  { %v2268_v54 = vmax.f32 %v2200_v8, 0.0 }
 0x314   :  { %v1864_v1 = vpop.f32.mrf.mxu2 }
 0x315   :  { %v3556_v4 = vpack.c.bf16 %v2268_v54, %v2267_v38  ;;  %v2033_v48 = vpop.f32.mrf.mxu3  ;;  %v1865_v11 = vadd.f32 %v1864_v1, %v1696_v27 }
 0x316   :  { %v1697_v56 = vpop.f32.mrf.mxu1 }
 0x317   :  { %3592 = vst [vmem:[%s5087_s3 + $0xf0] sm:$0xff] %v3556_v4   ;;  %v2034_v50 = vadd.f32 %v2033_v48, %v1865_v11  ;;  %v1698_v20 = vadd.f32 %v1697_v56, %v1529_v49 }
 0x318   :  { %v2204_v37 = vpop.f32.mrf.mxu0 }
 0x319   :  { %v2203_v12 = vadd.f32 %v2202_v44, %v2034_v50 }
 0x31b   :  { %v2269_v24 = vmax.f32 %v2203_v12, 0.0 }
 0x31c   :  { %v1866_v59 = vpop.f32.mrf.mxu2 }
 0x31d   :  { %v1867_v7 = vadd.f32 %v1866_v59, %v1698_v20  ;;  %v2035_v18 = vpop.f32.mrf.mxu3 }
 0x31f   :  { %v2036_v6 = vadd.f32 %v2035_v18, %v1867_v7 }
 0x321   :  { %v2205_v53 = vadd.f32 %v2204_v37, %v2036_v6 }
 0x323   :  { %v2270_v31 = vmax.f32 %v2205_v53, 0.0 }
 0x325   :  { %v3561_v46 = vpack.c.bf16 %v2270_v31, %v2269_v24 }
 0x327   :  { %3593 = vst [vmem:[%s5087_s3 + $0xf8] sm:$0xff] %v3561_v46  }

// kernel: up_forward.5
= control target key start
LH: loop header
LB: loop body
LE: loop exit
PB: predicated region body
PF: predicated region fallthrough
CT: control target
= control target key end

     0   :  { %s3047_s0 = inlined_call_operand.vmem [shape: bf16[512,384], index: 0, kind: input, shape index: {}]   ;;  %s3048_s1 = inlined_call_operand.vmem [shape: bf16[384,128], index: 1, kind: input, shape index: {}]   ;;  %s3049_s2 = inlined_call_operand.vmem [shape: f32[1,128], index: 2, kind: input, shape index: {}]   ;;  %s3050_s3 = inlined_call_operand.hbm [shape: f32[512,128], index: 3, kind: output, shape index: {}]  }
   0x1   :  { %v2087_v0 = vld [vmem:[%s3048_s1 + $0x38] sm:$0xff]  ;;  %v2086_v3 = vld [vmem:[%s3048_s1 + $0x30] sm:$0xff]  ;;  %v2085_v6 = vld [vmem:[%s3048_s1 + $0x28] sm:$0xff] }
   0x2   :  { %v2188_v1 = vld [vmem:[%s3048_s1 + $0x78] sm:$0xff]  ;;  %851 = vmatpush.bf16.msra.mxu0 %v2087_v0  ;;  %2104 = vmatpush.bf16.msra.mxu3 %v2087_v0  ;;  %v2203_v4 = vld [vmem:[%s3048_s1 + $0x70] sm:$0xff]  ;;  %v2093_v7 = vld [vmem:[%s3048_s1 + $0x68] sm:$0xff] }
   0x3   :  { %v2193_v2 = vld [vmem:[%s3048_s1 + $0xb8] sm:$0xff]  ;;  %1020 = vmatpush.bf16.msra.mxu1 %v2188_v1  ;;  %v2208_v5 = vld [vmem:[%s3048_s1 + $0xb0] sm:$0xff]  ;;  %v2221_v8 = vld [vmem:[%s3048_s1 + $0xa8] sm:$0xff] }
   0x4   :  { %1189 = vmatpush.bf16.msra.mxu2 %v2193_v2  ;;  %v2084_v9 = vld [vmem:[%s3048_s1 + $0x20] sm:$0xff] }
   0x5   :  { %v2229_v10 = vld [vmem:[%s3048_s1 + $0x60] sm:$0xff] }
   0x6   :  { %852 = vmatpush.bf16.msra.mxu0 %v2086_v3  ;;  %2105 = vmatpush.bf16.msra.mxu3 %v2086_v3  ;;  %v2235_v11 = vld [vmem:[%s3048_s1 + $0xa0] sm:$0xff] }
   0x7   :  { %1021 = vmatpush.bf16.msra.mxu1 %v2203_v4 }
   0x8   :  { %1190 = vmatpush.bf16.msra.mxu2 %v2208_v5 }
   0xa   :  { %853 = vmatpush.bf16.msra.mxu0 %v2085_v6  ;;  %2106 = vmatpush.bf16.msra.mxu3 %v2085_v6 }
   0xb   :  { %1022 = vmatpush.bf16.msra.mxu1 %v2093_v7 }
   0xc   :  { %1191 = vmatpush.bf16.msra.mxu2 %v2221_v8 }
   0xd   :  { %8 = vsyncpa [#allocation3], 0  ;;  %v2083_v12 = vld [vmem:[%s3048_s1 + $0x18] sm:$0xff]  ;;  %v2082_v15 = vld [vmem:[%s3048_s1 + $0x10] sm:$0xff]  ;;  %s1492_s4 = sshll.u32 %s3050_s3, 4  ;;  %s2160_s5 = smov 128   ;;  %s1493_s4 = int_to_ptr.hbm [resolvable:$true] %s1492_s4 }
   0xe   :  { %854 = vmatpush.bf16.msra.mxu0 %v2084_v9  ;;  %2107 = vmatpush.bf16.msra.mxu3 %v2084_v9  ;;  %v2091_v13 = vld [vmem:[%s3048_s1 + $0x58] sm:$0xff]  ;;  %v2090_v16 = vld [vmem:[%s3048_s1 + $0x50] sm:$0xff]  ;;  %v2081_v18 = vld [vmem:[%s3048_s1 + $0x8] sm:$0xff]  ;;  %s2161_s6 = smov 8  }
   0xf   :  { %1023 = vmatpush.bf16.msra.mxu1 %v2229_v10  ;;  %v2248_v14 = vld [vmem:[%s3048_s1 + $0x98] sm:$0xff]  ;;  %v2260_v17 = vld [vmem:[%s3048_s1 + $0x90] sm:$0xff]  ;;  %v2089_v19 = vld [vmem:[%s3048_s1 + $0x48] sm:$0xff] }
  0x10   :  { %1192 = vmatpush.bf16.msra.mxu2 %v2235_v11  ;;  %v2272_v20 = vld [vmem:[%s3048_s1 + $0x88] sm:$0xff]  ;;  %v2080_v21 = vld [vmem:[%s3048_s1] sm:$0xff]  ;;  %v1508_v29 = vld [vmem:[%s3047_s0 + $0xc] sm:$0xf0] }
  0x11   :  { %v2088_v22 = vld [vmem:[%s3048_s1 + $0x40] sm:$0xff]  ;;  %v1985_v25 = vld [vmem:[%s3047_s0 + $0x8] sm:$0xf0]  ;;  %v1514_v30 = vld [vmem:[%s3047_s0 + $0x8] sm:$0xf] }
  0x12   :  { %855 = vmatpush.bf16.msra.mxu0 %v2083_v12  ;;  %2108 = vmatpush.bf16.msra.mxu3 %v2083_v12  ;;  %v2283_v23 = vld [vmem:[%s3048_s1 + $0x80] sm:$0xff]  ;;  %v2057_v27 = vld [vmem:[%s3047_s0 + $0x248] sm:$0xf0]  ;;  %v1986_v31 = vld [vmem:[%s3047_s0 + $0x10] sm:$0xf0] }
  0x13   :  { %1024 = vmatpush.bf16.msra.mxu1 %v2091_v13  ;;  %v1506_v24 = vld [vmem:[%s3047_s0] sm:$0xf]  ;;  %v1984_v28 = vld [vmem:[%s3047_s0 + $0x4] sm:$0xf]  ;;  %v1515_v35 = vor.u32 %v1986_v31, %v1514_v30  ;;  %v1518_v36 = vld [vmem:[%s3047_s0 + $0x18] sm:$0xf] }
  0x14   :  { %1193 = vmatpush.bf16.msra.mxu2 %v2248_v14  ;;  %v1794_v26 = vld [vmem:[%s3047_s0 + $0x240] sm:$0xf]  ;;  %v1507_v32 = vor.u32 %v1985_v25, %v1506_v24  ;;  %v1511_v34 = vor.u32 %v1984_v28, %v1508_v29  ;;  %v1988_v37 = vld [vmem:[%s3047_s0 + $0x20] sm:$0xf0]  ;;  %v1806_v38 = vld [vmem:[%s3047_s0 + $0x258] sm:$0xf] }
  0x15   :  { %v1795_v33 = vor.u32 %v2057_v27, %v1794_v26  ;;  %v2060_v39 = vld [vmem:[%s3047_s0 + $0x260] sm:$0xf0]  ;;  %v1987_v40 = vld [vmem:[%s3047_s0 + $0x1c] sm:$0xf]  ;;  %v1520_v41 = vld [vmem:[%s3047_s0 + $0x24] sm:$0xf0]  ;;  %v1519_v44 = vor.u32 %v1988_v37, %v1518_v36 }
  0x16   :  { %856 = vmatpush.bf16.msra.mxu0 %v2082_v15  ;;  %2109 = vmatpush.bf16.msra.mxu3 %v2082_v15  ;;  %v1526_v42 = vld [vmem:[%s3047_s0 + $0x20] sm:$0xf]  ;;  %v1989_v43 = vld [vmem:[%s3047_s0 + $0x28] sm:$0xf0]  ;;  %v1807_v45 = vor.u32 %v2060_v39, %v1806_v38  ;;  %v1523_v46 = vor.u32 %v1987_v40, %v1520_v41  ;;  %v1530_v48 = vld [vmem:[%s3047_s0 + $0x30] sm:$0xf] }
  0x17   :  { %1025 = vmatpush.bf16.msra.mxu1 %v2090_v16  ;;  %v1527_v47 = vor.u32 %v1989_v43, %v1526_v42  ;;  %v1991_v49 = vld [vmem:[%s3047_s0 + $0x38] sm:$0xf0]  ;;  %v1818_v50 = vld [vmem:[%s3047_s0 + $0x270] sm:$0xf]  ;;  %v1990_v52 = vld [vmem:[%s3047_s0 + $0x34] sm:$0xf] }
  0x18   :  { %1194 = vmatpush.bf16.msra.mxu2 %v2260_v17  ;;  %v2063_v51 = vld [vmem:[%s3047_s0 + $0x278] sm:$0xf0]  ;;  %v1532_v53 = vld [vmem:[%s3047_s0 + $0x3c] sm:$0xf0]  ;;  %v1538_v54 = vld [vmem:[%s3047_s0 + $0x38] sm:$0xf]  ;;  %v1531_v56 = vor.u32 %v1991_v49, %v1530_v48 }
  0x19   :  { %v1992_v55 = vld [vmem:[%s3047_s0 + $0x40] sm:$0xf0]  ;;  %v1819_v57 = vor.u32 %v2063_v51, %v1818_v50  ;;  %v1535_v58 = vor.u32 %v1990_v52, %v1532_v53  ;;  %v1542_v60 = vld [vmem:[%s3047_s0 + $0x48] sm:$0xf]  ;;  %v1994_v61 = vld [vmem:[%s3047_s0 + $0x50] sm:$0xf0] }
  0x1a   :  { %857 = vmatpush.bf16.msra.mxu0 %v2081_v18  ;;  %2110 = vmatpush.bf16.msra.mxu3 %v2081_v18  ;;  %v1539_v59 = vor.u32 %v1992_v55, %v1538_v54  ;;  %v1830_v62 = vld [vmem:[%s3047_s0 + $0x288] sm:$0xf]  ;;  %v2066_v63 = vld [vmem:[%s3047_s0 + $0x290] sm:$0xf0]  ;;  %v1993_v0 = vld [vmem:[%s3047_s0 + $0x4c] sm:$0xf] }
  0x1b   :  { %1026 = vmatpush.bf16.msra.mxu1 %v2089_v19  ;;  %v1995_v3 = vld [vmem:[%s3047_s0 + $0x58] sm:$0xf0]  ;;  %v1997_v9 = vld [vmem:[%s3047_s0 + $0x68] sm:$0xf0]  ;;  %v1996_v12 = vld [vmem:[%s3047_s0 + $0x64] sm:$0xf] }
  0x1c   :  { %1195 = vmatpush.bf16.msra.mxu2 %v2272_v20  ;;  %v1998_v15 = vld [vmem:[%s3047_s0 + $0x70] sm:$0xf0]  ;;  %v1999_v24 = vld [vmem:[%s3047_s0 + $0x7c] sm:$0xf]  ;;  %v1568_v25 = vld [vmem:[%s3047_s0 + $0x84] sm:$0xf0] }
  0x1d   :  { %v1574_v26 = vld [vmem:[%s3047_s0 + $0x80] sm:$0xf]  ;;  %v2001_v27 = vld [vmem:[%s3047_s0 + $0x88] sm:$0xf0]  ;;  %v1571_v30 = vor.u32 %v1999_v24, %v1568_v25  ;;  %v2002_v36 = vld [vmem:[%s3047_s0 + $0x94] sm:$0xf] }
  0x1e   :  { %858 = vmatpush.bf16.msra.mxu0 %v2080_v21  ;;  %2111 = vmatpush.bf16.msra.mxu3 %v2080_v21  ;;  %v2000_v21 = vld [vmem:[%s3047_s0 + $0x80] sm:$0xf0]  ;;  %v1575_v31 = vor.u32 %v2001_v27, %v1574_v26  ;;  %v1580_v37 = vld [vmem:[%s3047_s0 + $0x9c] sm:$0xf0]  ;;  %v1586_v38 = vld [vmem:[%s3047_s0 + $0x98] sm:$0xf] }
  0x1f   :  { %1027 = vmatpush.bf16.msra.mxu1 %v2088_v22  ;;  %v2004_v39 = vld [vmem:[%s3047_s0 + $0xa0] sm:$0xf0]  ;;  %v1583_v42 = vor.u32 %v2002_v36, %v1580_v37  ;;  %v2005_v48 = vld [vmem:[%s3047_s0 + $0xac] sm:$0xf]  ;;  %v1592_v49 = vld [vmem:[%s3047_s0 + $0xb4] sm:$0xf0] }
  0x20   :  { %1196 = vmatpush.bf16.msra.mxu2 %v2283_v23  ;;  %v1587_v43 = vor.u32 %v2004_v39, %v1586_v38  ;;  %v1598_v50 = vld [vmem:[%s3047_s0 + $0xb0] sm:$0xf]  ;;  %v2007_v51 = vld [vmem:[%s3047_s0 + $0xb8] sm:$0xf0]  ;;  %v1595_v54 = vor.u32 %v2005_v48, %v1592_v49  ;;  %v1820_v48 = vld [vmem:[%s3047_s0 + $0x27c] sm:$0xf0] }
  0x21   :  { %859 = vmatmul.bf16.vlgmr.msra.gmra.mxu0 %v1507_v32  ;;  %979 = vmatmul.bf16.vlgmr.msra.gmra.mxu3 %v1795_v33  ;;  %v1578_v32 = vld [vmem:[%s3047_s0 + $0x90] sm:$0xf]  ;;  %v2003_v33 = vld [vmem:[%s3047_s0 + $0x98] sm:$0xf0]  ;;  %v1599_v55 = vor.u32 %v2007_v51, %v1598_v50  ;;  %v1628_v49 = vld [vmem:[%s3047_s0 + $0xfc] sm:$0xf0] }
  0x22   :  { %2112 = vmatpush.bf16.msrb.mxu3 %v2188_v1  ;;  %1028 = vmatmul.bf16.vlgmr.msra.gmra.mxu1 %v1511_v34  ;;  %v1544_v1 = vld [vmem:[%s3047_s0 + $0x54] sm:$0xf0]  ;;  %v1866_v34 = vld [vmem:[%s3047_s0 + $0x2d0] sm:$0xf]  ;;  %v1579_v40 = vor.u32 %v2003_v33, %v1578_v32  ;;  %v2016_v51 = vld [vmem:[%s3047_s0 + $0x100] sm:$0xf0] }
  0x23   :  { %1197 = vmatmul.bf16.vlgmr.msra.gmra.mxu2 %v1515_v35  ;;  %v1547_v6 = vor.u32 %v1993_v0, %v1544_v1  ;;  %v2075_v35 = vld [vmem:[%s3047_s0 + $0x2d8] sm:$0xf0]  ;;  %v2010_v0 = vld [vmem:[%s3047_s0 + $0xd0] sm:$0xf0]  ;;  %v1634_v50 = vld [vmem:[%s3047_s0 + $0xf8] sm:$0xf] }
  0x24   :  { %v1867_v41 = vor.u32 %v2075_v35, %v1866_v34 }
  0x26   :  { %2113 = vmatpush.bf16.msrb.mxu3 %v2203_v4  ;;  %v1543_v4 = vor.u32 %v1994_v61, %v1542_v60  ;;  %v2056_v60 = vld [vmem:[%s3047_s0 + $0x244] sm:$0xf]  ;;  %v1796_v61 = vld [vmem:[%s3047_s0 + $0x24c] sm:$0xf0] }
  0x2a   :  { %2114 = vmatpush.bf16.msrb.mxu3 %v2093_v7 }
  0x2e   :  { %2115 = vmatpush.bf16.msrb.mxu3 %v2229_v10  ;;  %v1842_v10 = vld [vmem:[%s3047_s0 + $0x2a0] sm:$0xf] }
  0x31   :  { %864 = vmatmul.bf16.gmra.mxu0 %v1519_v44  ;;  %984 = vmatmul.bf16.gmra.mxu3 %v1807_v45  ;;  %v1590_v44 = vld [vmem:[%s3047_s0 + $0xa8] sm:$0xf]  ;;  %v2006_v45 = vld [vmem:[%s3047_s0 + $0xb0] sm:$0xf0] }
  0x32   :  { %2116 = vmatpush.bf16.msrb.mxu3 %v2091_v13  ;;  %1033 = vmatmul.bf16.gmra.mxu1 %v1523_v46  ;;  %v1556_v13 = vld [vmem:[%s3047_s0 + $0x6c] sm:$0xf0]  ;;  %v1878_v46 = vld [vmem:[%s3047_s0 + $0x2e8] sm:$0xf]  ;;  %v1591_v52 = vor.u32 %v2006_v45, %v1590_v44  ;;  %v2015_v45 = vld [vmem:[%s3047_s0 + $0xf8] sm:$0xf0] }
  0x33   :  { %1202 = vmatmul.bf16.gmra.mxu2 %v1527_v47  ;;  %v1559_v18 = vor.u32 %v1996_v12, %v1556_v13  ;;  %v2078_v47 = vld [vmem:[%s3047_s0 + $0x2f0] sm:$0xf0]  ;;  %v1626_v44 = vld [vmem:[%s3047_s0 + $0xf0] sm:$0xf] }
  0x34   :  { %v1879_v53 = vor.u32 %v2078_v47, %v1878_v46  ;;  %v2014_v46 = vld [vmem:[%s3047_s0 + $0xf4] sm:$0xf] }
  0x35   :  { %v2062_v47 = vld [vmem:[%s3047_s0 + $0x274] sm:$0xf] }
  0x36   :  { %2117 = vmatpush.bf16.msrb.mxu3 %v2090_v16 }
  0x3a   :  { %2118 = vmatpush.bf16.msrb.mxu3 %v2089_v19 }
  0x3e   :  { %2119 = vmatpush.bf16.msrb.mxu3 %v2088_v22  ;;  %v1854_v22 = vld [vmem:[%s3047_s0 + $0x2b8] sm:$0xf] }
  0x41   :  { %869 = vmatmul.bf16.gmra.mxu0 %v1531_v56  ;;  %989 = vmatmul.bf16.gmra.mxu3 %v1819_v57  ;;  %v2493_v56 = vld [vmem:[%s3049_s2] ss:$0 sm:$0xff] }
  0x42   :  { %2120 = vmatpush.bf16.msra.mxu3 %v2193_v2  ;;  %1038 = vmatmul.bf16.gmra.mxu1 %v1535_v58  ;;  %v1550_v2 = vld [vmem:[%s3047_s0 + $0x50] sm:$0xf]  ;;  %v1602_v57 = vld [vmem:[%s3047_s0 + $0xc0] sm:$0xf]  ;;  %v2009_v58 = vld [vmem:[%s3047_s0 + $0xc8] sm:$0xf0] }
  0x43   :  { %1207 = vmatmul.bf16.gmra.mxu2 %v1539_v59  ;;  %v1551_v7 = vor.u32 %v1995_v3, %v1550_v2  ;;  %v2008_v59 = vld [vmem:[%s3047_s0 + $0xc4] sm:$0xf]  ;;  %v1603_v1 = vor.u32 %v2009_v58, %v1602_v57  ;;  %v1799_v2 = vor.u32 %v2056_v60, %v1796_v61  ;;  %v1823_v57 = vor.u32 %v2062_v47, %v1820_v48  ;;  %v2022_v47 = vld [vmem:[%s3047_s0 + $0x130] sm:$0xf0] }
  0x44   :  { %v1631_v60 = vor.u32 %v2014_v46, %v1628_v49  ;;  %v1635_v61 = vor.u32 %v2016_v51, %v1634_v50  ;;  %v1658_v46 = vld [vmem:[%s3047_s0 + $0x128] sm:$0xf] }
  0x46   :  { %2121 = vmatpush.bf16.msra.mxu3 %v2208_v5  ;;  %v1831_v5 = vor.u32 %v2066_v63, %v1830_v62  ;;  %v1604_v62 = vld [vmem:[%s3047_s0 + $0xcc] sm:$0xf0]  ;;  %v1610_v63 = vld [vmem:[%s3047_s0 + $0xc8] sm:$0xf] }
  0x4a   :  { %2122 = vmatpush.bf16.msra.mxu3 %v2221_v8  ;;  %v1554_v8 = vld [vmem:[%s3047_s0 + $0x60] sm:$0xf] }
  0x4b   :  { %v1555_v16 = vor.u32 %v1997_v9, %v1554_v8 }
  0x4e   :  { %2123 = vmatpush.bf16.msra.mxu3 %v2235_v11  ;;  %v2069_v11 = vld [vmem:[%s3047_s0 + $0x2a8] sm:$0xf0] }
  0x51   :  { %874 = vmatmul.bf16.gmra.mxu0 %v1543_v4  ;;  %994 = vmatmul.bf16.gmra.mxu3 %v1831_v5  ;;  %v1607_v4 = vor.u32 %v2008_v59, %v1604_v62  ;;  %v1611_v5 = vor.u32 %v2010_v0, %v1610_v63 }
  0x52   :  { %2124 = vmatpush.bf16.msra.mxu3 %v2248_v14  ;;  %1043 = vmatmul.bf16.gmra.mxu1 %v1547_v6  ;;  %v1562_v14 = vld [vmem:[%s3047_s0 + $0x68] sm:$0xf] }
  0x53   :  { %1212 = vmatmul.bf16.gmra.mxu2 %v1551_v7  ;;  %v1563_v19 = vor.u32 %v1998_v15, %v1562_v14 }
  0x56   :  { %2125 = vmatpush.bf16.msra.mxu3 %v2260_v17  ;;  %v1843_v17 = vor.u32 %v2069_v11, %v1842_v10 }
  0x5a   :  { %2126 = vmatpush.bf16.msra.mxu3 %v2272_v20  ;;  %v1566_v20 = vld [vmem:[%s3047_s0 + $0x78] sm:$0xf] }
  0x5b   :  { %v1567_v28 = vor.u32 %v2000_v21, %v1566_v20  ;;  %v1808_v20 = vld [vmem:[%s3047_s0 + $0x264] sm:$0xf0] }
  0x5c   :  { %v1616_v21 = vld [vmem:[%s3047_s0 + $0xe4] sm:$0xf0] }
  0x5e   :  { %2127 = vmatpush.bf16.msra.mxu3 %v2283_v23  ;;  %v2072_v23 = vld [vmem:[%s3047_s0 + $0x2c0] sm:$0xf0] }
  0x5f   :  { %v1855_v29 = vor.u32 %v2072_v23, %v1854_v22  ;;  %v1622_v22 = vld [vmem:[%s3047_s0 + $0xe0] sm:$0xf]  ;;  %v2013_v23 = vld [vmem:[%s3047_s0 + $0xe8] sm:$0xf0] }
  0x60   :  { %v1623_v32 = vor.u32 %v2013_v23, %v1622_v22 }
  0x61   :  { %879 = vmatmul.bf16.gmra.mxu0 %v1555_v16  ;;  %999 = vmatmul.bf16.gmra.mxu3 %v1843_v17  ;;  %v1614_v16 = vld [vmem:[%s3047_s0 + $0xd8] sm:$0xf]  ;;  %v2012_v17 = vld [vmem:[%s3047_s0 + $0xe0] sm:$0xf0] }
  0x62   :  { %1048 = vmatmul.bf16.gmra.mxu1 %v1559_v18  ;;  %v2011_v18 = vld [vmem:[%s3047_s0 + $0xdc] sm:$0xf]  ;;  %v1615_v27 = vor.u32 %v2012_v17, %v1614_v16  ;;  %v1646_v16 = vld [vmem:[%s3047_s0 + $0x110] sm:$0xf] }
  0x63   :  { %1217 = vmatmul.bf16.gmra.mxu2 %v1563_v19  ;;  %v2059_v19 = vld [vmem:[%s3047_s0 + $0x25c] sm:$0xf] }
  0x64   :  { %v2019_v17 = vld [vmem:[%s3047_s0 + $0x118] sm:$0xf0] }
  0x71   :  { %884 = vmatmul.bf16.gmra.mxu0 %v1567_v28  ;;  %1004 = vmatmul.bf16.gmra.mxu3 %v1855_v29  ;;  %v1811_v28 = vor.u32 %v2059_v19, %v1808_v20 }
  0x72   :  { %1053 = vmatmul.bf16.gmra.mxu1 %v1571_v30 }
  0x73   :  { %1222 = vmatmul.bf16.gmra.mxu2 %v1575_v31  ;;  %v1619_v31 = vor.u32 %v2011_v18, %v1616_v21 }
  0x81   :  { %889 = vmatmul.bf16.gmra.mxu0 %v1579_v40  ;;  %1009 = vmatmul.bf16.gmra.mxu3 %v1867_v41 }
  0x82   :  { %1058 = vmatmul.bf16.gmra.mxu1 %v1583_v42 }
  0x83   :  { %1227 = vmatmul.bf16.gmra.mxu2 %v1587_v43 }
  0x91   :  { %894 = vmatmul.bf16.gmra.mxu0 %v1591_v52  ;;  %1014 = vmatmul.bf16.gmra.mxu3 %v1879_v53 }
  0x92   :  { %1063 = vmatmul.bf16.gmra.mxu1 %v1595_v54 }
  0x93   :  { %1232 = vmatmul.bf16.gmra.mxu2 %v1599_v55  ;;  %v1627_v55 = vor.u32 %v2015_v45, %v1626_v44  ;;  %v1844_v44 = vld [vmem:[%s3047_s0 + $0x2ac] sm:$0xf0] }
  0x94   :  { %v1652_v45 = vld [vmem:[%s3047_s0 + $0x12c] sm:$0xf0] }
  0x9e   :  { %v860_v3 = vpop.f32.mrf.mxu0 }
  0x9f   :  { %v861_v6 = vadd.f32 %v2493_v56, %v860_v3  ;;  %v1029_v7 = vpop.f32.mrf.mxu1 }
  0xa1   :  { %899 = vmatmul.bf16.gmra.mxu0 %v1603_v1  ;;  %1148 = vmatmul.bf16.vlgmr.msrb.gmra.mxu3 %v1799_v2  ;;  %v1030_v8 = vadd.f32 %v1029_v7, %v861_v6 }
  0xa2   :  { %1068 = vmatmul.bf16.gmra.mxu1 %v1607_v4 }
  0xa3   :  { %1237 = vmatmul.bf16.gmra.mxu2 %v1611_v5 }
  0xa4   :  { %v2520_v9 = vpop.f32.mrf.mxu3 }
  0xa6   :  { %v1198_v10 = vpop.f32.mrf.mxu2  ;;  %v862_v12 = vpop.f32.mrf.mxu0 }
  0xa7   :  { %v1199_v11 = vadd.f32 %v1198_v10, %v1030_v8  ;;  %v1031_v13 = vpop.f32.mrf.mxu1  ;;  %v863_v15 = vadd.f32 %v2493_v56, %v862_v12  ;;  %v1638_v10 = vld [vmem:[%s3047_s0 + $0x108] sm:$0xf]  ;;  %v2017_v12 = vld [vmem:[%s3047_s0 + $0x10c] sm:$0xf] }
  0xa9   :  { %v1358_v14 = vmax.f32 %v1199_v11, 0.0  ;;  %v1032_v24 = vadd.f32 %v1031_v13, %v863_v15  ;;  %v2018_v11 = vld [vmem:[%s3047_s0 + $0x110] sm:$0xf0]  ;;  %v2065_v13 = vld [vmem:[%s3047_s0 + $0x28c] sm:$0xf] }
  0xaa   :  { %v1640_v15 = vld [vmem:[%s3047_s0 + $0x114] sm:$0xf0]  ;;  %v1639_v21 = vor.u32 %v2018_v11, %v1638_v10  ;;  %v2023_v10 = vld [vmem:[%s3047_s0 + $0x13c] sm:$0xf] }
  0xab   :  { %1422 = vst [vmem:[#allocation2] sm:$0xff] %v1358_v14  ;;  %v1832_v14 = vld [vmem:[%s3047_s0 + $0x294] sm:$0xf0]  ;;  %v2071_v11 = vld [vmem:[%s3047_s0 + $0x2bc] sm:$0xf] }
  0xac   :  { %v2547_v25 = vpop.f32.mrf.mxu3  ;;  %v1835_v22 = vor.u32 %v2065_v13, %v1832_v14  ;;  %v1664_v13 = vld [vmem:[%s3047_s0 + $0x144] sm:$0xf0]  ;;  %v1670_v14 = vld [vmem:[%s3047_s0 + $0x140] sm:$0xf] }
  0xae   :  { %v1200_v26 = vpop.f32.mrf.mxu2  ;;  %v865_v30 = vpop.f32.mrf.mxu0 }
  0xaf   :  { %v1201_v29 = vadd.f32 %v1200_v26, %v1032_v24  ;;  %v866_v33 = vadd.f32 %v2493_v56, %v865_v30  ;;  %v1034_v34 = vpop.f32.mrf.mxu1  ;;  %v1643_v26 = vor.u32 %v2017_v12, %v1640_v15  ;;  %v1856_v12 = vld [vmem:[%s3047_s0 + $0x2c4] sm:$0xf0]  ;;  %v2025_v15 = vld [vmem:[%s3047_s0 + $0x148] sm:$0xf0] }
  0xb1   :  { %v1359_v35 = vmax.f32 %v1201_v29, 0.0  ;;  %904 = vmatmul.bf16.gmra.mxu0 %v1615_v27  ;;  %1153 = vmatmul.bf16.gmra.mxu3 %v1811_v28  ;;  %v1035_v36 = vadd.f32 %v1034_v34, %v866_v33  ;;  %v1647_v27 = vor.u32 %v2019_v17, %v1646_v16 }
  0xb2   :  { %1073 = vmatmul.bf16.gmra.mxu1 %v1619_v31 }
  0xb3   :  { %1423 = vst [vmem:[#allocation2 + $0x8] sm:$0xff] %v1359_v35  ;;  %1242 = vmatmul.bf16.gmra.mxu2 %v1623_v32 }
  0xb4   :  { %v2550_v37 = vpop.f32.mrf.mxu3 }
  0xb6   :  { %v1203_v38 = vpop.f32.mrf.mxu2  ;;  %v867_v40 = vpop.f32.mrf.mxu0 }
  0xb7   :  { %v1204_v39 = vadd.f32 %v1203_v38, %v1035_v36  ;;  %v1036_v41 = vpop.f32.mrf.mxu1  ;;  %v868_v43 = vadd.f32 %v2493_v56, %v867_v40  ;;  %v1650_v40 = vld [vmem:[%s3047_s0 + $0x120] sm:$0xf] }
  0xb9   :  { %v1360_v42 = vmax.f32 %v1204_v39, 0.0  ;;  %v1037_v52 = vadd.f32 %v1036_v41, %v868_v43  ;;  %v2021_v41 = vld [vmem:[%s3047_s0 + $0x128] sm:$0xf0]  ;;  %v2068_v43 = vld [vmem:[%s3047_s0 + $0x2a4] sm:$0xf] }
  0xba   :  { %v1651_v51 = vor.u32 %v2021_v41, %v1650_v40  ;;  %v1674_v40 = vld [vmem:[%s3047_s0 + $0x150] sm:$0xf]  ;;  %v2027_v41 = vld [vmem:[%s3047_s0 + $0x158] sm:$0xf0] }
  0xbb   :  { %1424 = vst [vmem:[#allocation2 + $0x10] sm:$0xff] %v1360_v42  ;;  %v2020_v42 = vld [vmem:[%s3047_s0 + $0x124] sm:$0xf] }
  0xbc   :  { %v2577_v53 = vpop.f32.mrf.mxu3 }
  0xbe   :  { %v1205_v54 = vpop.f32.mrf.mxu2  ;;  %v870_v59 = vpop.f32.mrf.mxu0 }
  0xbf   :  { %v1206_v58 = vadd.f32 %v1205_v54, %v1037_v52  ;;  %v871_v62 = vadd.f32 %v2493_v56, %v870_v59  ;;  %v1039_v63 = vpop.f32.mrf.mxu1  ;;  %v1847_v52 = vor.u32 %v2068_v43, %v1844_v44  ;;  %v2074_v43 = vld [vmem:[%s3047_s0 + $0x2d4] sm:$0xf]  ;;  %v1868_v44 = vld [vmem:[%s3047_s0 + $0x2dc] sm:$0xf0] }
  0xc1   :  { %v1361_v0 = vmax.f32 %v1206_v58, 0.0  ;;  %909 = vmatmul.bf16.gmra.mxu0 %v1627_v55  ;;  %1158 = vmatmul.bf16.gmra.mxu3 %v1823_v57  ;;  %v1040_v1 = vadd.f32 %v1039_v63, %v871_v62  ;;  %v1655_v57 = vor.u32 %v2020_v42, %v1652_v45  ;;  %v1659_v58 = vor.u32 %v2022_v47, %v1658_v46  ;;  %v2026_v42 = vld [vmem:[%s3047_s0 + $0x154] sm:$0xf]  ;;  %v1676_v45 = vld [vmem:[%s3047_s0 + $0x15c] sm:$0xf0] }
  0xc2   :  { %1078 = vmatmul.bf16.gmra.mxu1 %v1631_v60  ;;  %v1682_v46 = vld [vmem:[%s3047_s0 + $0x158] sm:$0xf]  ;;  %v2028_v47 = vld [vmem:[%s3047_s0 + $0x160] sm:$0xf0] }
  0xc3   :  { %1425 = vst [vmem:[#allocation2 + $0x18] sm:$0xff] %v1361_v0  ;;  %1247 = vmatmul.bf16.gmra.mxu2 %v1635_v61 }
  0xc4   :  { %v2580_v2 = vpop.f32.mrf.mxu3 }
  0xc6   :  { %v1208_v3 = vpop.f32.mrf.mxu2  ;;  %v872_v5 = vpop.f32.mrf.mxu0 }
  0xc7   :  { %v1209_v4 = vadd.f32 %v1208_v3, %v1040_v1  ;;  %v1041_v6 = vpop.f32.mrf.mxu1  ;;  %v873_v8 = vadd.f32 %v2493_v56, %v872_v5 }
  0xc9   :  { %v1362_v7 = vmax.f32 %v1209_v4, 0.0  ;;  %v1042_v18 = vadd.f32 %v1041_v6, %v873_v8  ;;  %v2024_v8 = vld [vmem:[%s3047_s0 + $0x140] sm:$0xf0] }
  0xcb   :  { %1426 = vst [vmem:[#allocation2 + $0x20] sm:$0xff] %v1362_v7  ;;  %v1662_v7 = vld [vmem:[%s3047_s0 + $0x138] sm:$0xf] }
  0xcc   :  { %v2607_v19 = vpop.f32.mrf.mxu3 }
  0xce   :  { %v1210_v20 = vpop.f32.mrf.mxu2  ;;  %v875_v24 = vpop.f32.mrf.mxu0 }
  0xcf   :  { %v1211_v23 = vadd.f32 %v1210_v20, %v1042_v18  ;;  %v876_v28 = vadd.f32 %v2493_v56, %v875_v24  ;;  %v1044_v29 = vpop.f32.mrf.mxu1  ;;  %v1663_v20 = vor.u32 %v2024_v8, %v1662_v7  ;;  %v1667_v24 = vor.u32 %v2023_v10, %v1664_v13  ;;  %v1686_v10 = vld [vmem:[%s3047_s0 + $0x168] sm:$0xf]  ;;  %v2077_v13 = vld [vmem:[%s3047_s0 + $0x2ec] sm:$0xf] }
  0xd1   :  { %v1363_v30 = vmax.f32 %v1211_v23, 0.0  ;;  %914 = vmatmul.bf16.gmra.mxu0 %v1639_v21  ;;  %1163 = vmatmul.bf16.gmra.mxu3 %v1835_v22  ;;  %v1045_v31 = vadd.f32 %v1044_v29, %v876_v28  ;;  %v1859_v21 = vor.u32 %v2071_v11, %v1856_v12  ;;  %v2030_v11 = vld [vmem:[%s3047_s0 + $0x170] sm:$0xf0]  ;;  %v2029_v12 = vld [vmem:[%s3047_s0 + $0x16c] sm:$0xf] }
  0xd2   :  { %1083 = vmatmul.bf16.gmra.mxu1 %v1643_v26  ;;  %v1671_v26 = vor.u32 %v2025_v15, %v1670_v14  ;;  %v1880_v14 = vld [vmem:[%s3047_s0 + $0x2f4] sm:$0xf0] }
  0xd3   :  { %1427 = vst [vmem:[#allocation2 + $0x28] sm:$0xff] %v1363_v30  ;;  %1252 = vmatmul.bf16.gmra.mxu2 %v1647_v27  ;;  %v1688_v15 = vld [vmem:[%s3047_s0 + $0x174] sm:$0xf0] }
  0xd4   :  { %v2610_v32 = vpop.f32.mrf.mxu3 }
  0xd6   :  { %v1213_v33 = vpop.f32.mrf.mxu2  ;;  %v877_v35 = vpop.f32.mrf.mxu0 }
  0xd7   :  { %v1214_v34 = vadd.f32 %v1213_v33, %v1045_v31  ;;  %v1046_v36 = vpop.f32.mrf.mxu1  ;;  %v878_v39 = vadd.f32 %v2493_v56, %v877_v35 }
  0xd9   :  { %v1364_v38 = vmax.f32 %v1214_v34, 0.0  ;;  %v1047_v48 = vadd.f32 %v1046_v36, %v878_v39 }
  0xdb   :  { %1428 = vst [vmem:[#allocation2 + $0x30] sm:$0xff] %v1364_v38 }
  0xdc   :  { %v2637_v49 = vpop.f32.mrf.mxu3 }
  0xde   :  { %v1215_v50 = vpop.f32.mrf.mxu2  ;;  %v880_v55 = vpop.f32.mrf.mxu0 }
  0xdf   :  { %v1216_v54 = vadd.f32 %v1215_v50, %v1047_v48  ;;  %v881_v59 = vadd.f32 %v2493_v56, %v880_v55  ;;  %v1049_v60 = vpop.f32.mrf.mxu1 }
  0xe1   :  { %v1365_v61 = vmax.f32 %v1216_v54, 0.0  ;;  %919 = vmatmul.bf16.gmra.mxu0 %v1651_v51  ;;  %1168 = vmatmul.bf16.gmra.mxu3 %v1847_v52  ;;  %v1050_v62 = vadd.f32 %v1049_v60, %v881_v59  ;;  %v1675_v52 = vor.u32 %v2027_v41, %v1674_v40  ;;  %v1871_v54 = vor.u32 %v2074_v43, %v1868_v44  ;;  %v1698_v44 = vld [vmem:[%s3047_s0 + $0x180] sm:$0xf] }
  0xe2   :  { %1088 = vmatmul.bf16.gmra.mxu1 %v1655_v57  ;;  %v1683_v59 = vor.u32 %v2028_v47, %v1682_v46  ;;  %v2032_v46 = vld [vmem:[%s3047_s0 + $0x184] sm:$0xf]  ;;  %v1802_v47 = vld [vmem:[%s3047_s0 + $0x248] sm:$0xf] }
  0xe3   :  { %1429 = vst [vmem:[#allocation2 + $0x38] sm:$0xff] %v1365_v61  ;;  %1257 = vmatmul.bf16.gmra.mxu2 %v1659_v58  ;;  %v1679_v58 = vor.u32 %v2026_v42, %v1676_v45  ;;  %v2033_v45 = vld [vmem:[%s3047_s0 + $0x188] sm:$0xf0] }
  0xe4   :  { %v2640_v63 = vpop.f32.mrf.mxu3 }
  0xe6   :  { %v1218_v0 = vpop.f32.mrf.mxu2  ;;  %v882_v3 = vpop.f32.mrf.mxu0 }
  0xe7   :  { %v1219_v1 = vadd.f32 %v1218_v0, %v1050_v62  ;;  %v1051_v4 = vpop.f32.mrf.mxu1  ;;  %v883_v6 = vadd.f32 %v2493_v56, %v882_v3 }
  0xe9   :  { %v1366_v5 = vmax.f32 %v1219_v1, 0.0  ;;  %v1052_v16 = vadd.f32 %v1051_v4, %v883_v6 }
  0xeb   :  { %1430 = vst [vmem:[#allocation2 + $0x40] sm:$0xff] %v1366_v5 }
  0xec   :  { %v2667_v17 = vpop.f32.mrf.mxu3 }
  0xee   :  { %v1220_v18 = vpop.f32.mrf.mxu2  ;;  %v885_v23 = vpop.f32.mrf.mxu0 }
  0xef   :  { %v1221_v22 = vadd.f32 %v1220_v18, %v1052_v16  ;;  %v886_v27 = vadd.f32 %v2493_v56, %v885_v23  ;;  %v1054_v28 = vpop.f32.mrf.mxu1  ;;  %v1694_v16 = vld [vmem:[%s3047_s0 + $0x170] sm:$0xf]  ;;  %v2031_v18 = vld [vmem:[%s3047_s0 + $0x178] sm:$0xf0]  ;;  %v1687_v23 = vor.u32 %v2030_v11, %v1686_v10 }
  0xf1   :  { %v1367_v29 = vmax.f32 %v1221_v22, 0.0  ;;  %924 = vmatmul.bf16.gmra.mxu0 %v1663_v20  ;;  %1173 = vmatmul.bf16.gmra.mxu3 %v1859_v21  ;;  %v1055_v30 = vadd.f32 %v1054_v28, %v886_v27  ;;  %v1691_v28 = vor.u32 %v2029_v12, %v1688_v15 }
  0xf2   :  { %1093 = vmatmul.bf16.gmra.mxu1 %v1667_v24  ;;  %v1883_v24 = vor.u32 %v2077_v13, %v1880_v14 }
  0xf3   :  { %1431 = vst [vmem:[#allocation2 + $0x48] sm:$0xff] %v1367_v29  ;;  %1262 = vmatmul.bf16.gmra.mxu2 %v1671_v26  ;;  %v1695_v29 = vor.u32 %v2031_v18, %v1694_v16 }
  0xf4   :  { %v2670_v31 = vpop.f32.mrf.mxu3 }
  0xf6   :  { %v1223_v33 = vpop.f32.mrf.mxu2  ;;  %v887_v35 = vpop.f32.mrf.mxu0 }
  0xf7   :  { %v1224_v34 = vadd.f32 %v1223_v33, %v1055_v30  ;;  %v1056_v36 = vpop.f32.mrf.mxu1  ;;  %v888_v39 = vadd.f32 %v2493_v56, %v887_v35 }
  0xf9   :  { %v1368_v38 = vmax.f32 %v1224_v34, 0.0  ;;  %v1057_v48 = vadd.f32 %v1056_v36, %v888_v39 }
  0xfb   :  { %1432 = vst [vmem:[#allocation2 + $0x50] sm:$0xff] %v1368_v38 }
  0xfc   :  { %v2697_v50 = vpop.f32.mrf.mxu3 }
  0xfe   :  { %v1225_v51 = vpop.f32.mrf.mxu2  ;;  %v890_v57 = vpop.f32.mrf.mxu0 }
  0xff   :  { %v1226_v55 = vadd.f32 %v1225_v51, %v1057_v48  ;;  %v891_v60 = vadd.f32 %v2493_v56, %v890_v57  ;;  %v1059_v61 = vpop.f32.mrf.mxu1  ;;  %v2058_v48 = vld [vmem:[%s3047_s0 + $0x250] sm:$0xf0]  ;;  %v1700_v51 = vld [vmem:[%s3047_s0 + $0x18c] sm:$0xf0] }
 0x101   :  { %v1369_v62 = vmax.f32 %v1226_v55, 0.0  ;;  %929 = vmatmul.bf16.gmra.mxu0 %v1675_v52  ;;  %1178 = vmatmul.bf16.gmra.mxu3 %v1871_v54  ;;  %v1060_v0 = vadd.f32 %v1059_v61, %v891_v60  ;;  %v1706_v52 = vld [vmem:[%s3047_s0 + $0x188] sm:$0xf]  ;;  %v2034_v54 = vld [vmem:[%s3047_s0 + $0x190] sm:$0xf0]  ;;  %v1803_v60 = vor.u32 %v2058_v48, %v1802_v47  ;;  %v986_v47 = vadd.f32 %v2493_v56, %v2550_v37 }
 0x102   :  { %1098 = vmatmul.bf16.gmra.mxu1 %v1679_v58  ;;  %v2038_v37 = vld [vmem:[%s3047_s0 + $0x1b4] sm:$0xf] }
 0x103   :  { %1433 = vst [vmem:[#allocation2 + $0x58] sm:$0xff] %v1369_v62  ;;  %1267 = vmatmul.bf16.gmra.mxu2 %v1683_v59  ;;  %v1699_v59 = vor.u32 %v2033_v45, %v1698_v44 }
 0x104   :  { %v2700_v1 = vpop.f32.mrf.mxu3 }
 0x106   :  { %v1228_v3 = vpop.f32.mrf.mxu2  ;;  %v892_v5 = vpop.f32.mrf.mxu0 }
 0x107   :  { %v1229_v4 = vadd.f32 %v1228_v3, %v1060_v0  ;;  %v1061_v6 = vpop.f32.mrf.mxu1  ;;  %v893_v8 = vadd.f32 %v2493_v56, %v892_v5  ;;  %v1703_v0 = vor.u32 %v2032_v46, %v1700_v51  ;;  %v1707_v3 = vor.u32 %v2034_v54, %v1706_v52 }
 0x109   :  { %v1370_v7 = vmax.f32 %v1229_v4, 0.0  ;;  %v1062_v20 = vadd.f32 %v1061_v6, %v893_v8  ;;  %v981_v8 = vadd.f32 %v2493_v56, %v2520_v9  ;;  %v2035_v9 = vld [vmem:[%s3047_s0 + $0x19c] sm:$0xf] }
 0x10b   :  { %1434 = vst [vmem:[#allocation2 + $0x60] sm:$0xff] %v1370_v7 }
 0x10c   :  { %v2727_v21 = vpop.f32.mrf.mxu3 }
 0x10e   :  { %v1230_v22 = vpop.f32.mrf.mxu2  ;;  %v895_v27 = vpop.f32.mrf.mxu0 }
 0x10f   :  { %v1231_v26 = vadd.f32 %v1230_v22, %v1062_v20  ;;  %v896_v30 = vadd.f32 %v2493_v56, %v895_v27  ;;  %v1064_v33 = vpop.f32.mrf.mxu1  ;;  %v1710_v20 = vld [vmem:[%s3047_s0 + $0x198] sm:$0xf]  ;;  %v2036_v22 = vld [vmem:[%s3047_s0 + $0x1a0] sm:$0xf0]  ;;  %v1712_v27 = vld [vmem:[%s3047_s0 + $0x1a4] sm:$0xf0] }
 0x111   :  { %v1371_v34 = vmax.f32 %v1231_v26, 0.0  ;;  %934 = vmatmul.bf16.gmra.mxu0 %v1687_v23  ;;  %1183 = vmatmul.bf16.gmra.mxu3 %v1883_v24  ;;  %v1065_v35 = vadd.f32 %v1064_v33, %v896_v30  ;;  %v1814_v23 = vld [vmem:[%s3047_s0 + $0x260] sm:$0xf]  ;;  %v2061_v24 = vld [vmem:[%s3047_s0 + $0x268] sm:$0xf0]  ;;  %v983_v26 = vadd.f32 %v2493_v56, %v2547_v25 }
 0x112   :  { %1103 = vmatmul.bf16.gmra.mxu1 %v1691_v28  ;;  %v1718_v28 = vld [vmem:[%s3047_s0 + $0x1a0] sm:$0xf] }
 0x113   :  { %1435 = vst [vmem:[#allocation2 + $0x68] sm:$0xff] %v1371_v34  ;;  %1272 = vmatmul.bf16.gmra.mxu2 %v1695_v29  ;;  %v2037_v29 = vld [vmem:[%s3047_s0 + $0x1a8] sm:$0xf0] }
 0x114   :  { %v2730_v36 = vpop.f32.mrf.mxu3 }
 0x116   :  { %v1233_v38 = vpop.f32.mrf.mxu2  ;;  %v897_v40 = vpop.f32.mrf.mxu0 }
 0x117   :  { %v1234_v39 = vadd.f32 %v1233_v38, %v1065_v35  ;;  %v1066_v41 = vpop.f32.mrf.mxu1  ;;  %v898_v43 = vadd.f32 %v2493_v56, %v897_v40  ;;  %v1711_v38 = vor.u32 %v2036_v22, %v1710_v20 }
 0x119   :  { %v1372_v42 = vmax.f32 %v1234_v39, 0.0  ;;  %v1067_v55 = vadd.f32 %v1066_v41, %v898_v43  ;;  %v1815_v39 = vor.u32 %v2061_v24, %v1814_v23  ;;  %v1715_v41 = vor.u32 %v2035_v9, %v1712_v27 }
 0x11b   :  { %1436 = vst [vmem:[#allocation2 + $0x70] sm:$0xff] %v1372_v42  ;;  %v1719_v42 = vor.u32 %v2037_v29, %v1718_v28 }
 0x11c   :  { %v2757_v57 = vpop.f32.mrf.mxu3 }
 0x11e   :  { %v1235_v58 = vpop.f32.mrf.mxu2  ;;  %v900_v62 = vpop.f32.mrf.mxu0 }
 0x11f   :  { %v1236_v61 = vadd.f32 %v1235_v58, %v1067_v55  ;;  %v901_v4 = vadd.f32 %v2493_v56, %v900_v62  ;;  %v1069_v5 = vpop.f32.mrf.mxu1  ;;  %v2039_v62 = vld [vmem:[%s3047_s0 + $0x1b8] sm:$0xf0] }
 0x121   :  { %v1373_v6 = vmax.f32 %v1236_v61, 0.0  ;;  %939 = vmatmul.bf16.gmra.mxu0 %v1699_v59  ;;  %1317 = vmatmul.bf16.vlgmr.msra.gmra.mxu3 %v1803_v60  ;;  %v1070_v7 = vadd.f32 %v1069_v5, %v901_v4  ;;  %v1722_v61 = vld [vmem:[%s3047_s0 + $0x1b0] sm:$0xf]  ;;  %v988_v4 = vadd.f32 %v2493_v56, %v2577_v53  ;;  %v1724_v5 = vld [vmem:[%s3047_s0 + $0x1bc] sm:$0xf0] }
 0x122   :  { %1108 = vmatmul.bf16.gmra.mxu1 %v1703_v0  ;;  %v1826_v0 = vld [vmem:[%s3047_s0 + $0x278] sm:$0xf] }
 0x123   :  { %1437 = vst [vmem:[#allocation2 + $0x78] sm:$0xff] %v1373_v6  ;;  %1277 = vmatmul.bf16.gmra.mxu2 %v1707_v3  ;;  %v2064_v3 = vld [vmem:[%s3047_s0 + $0x280] sm:$0xf0]  ;;  %v1730_v6 = vld [vmem:[%s3047_s0 + $0x1b8] sm:$0xf] }
 0x124   :  { %v1149_v10 = vpop.f32.mrf.mxu3 }
 0x125   :  { %v2762_v11 = vadd.f32 %v1149_v10, %v981_v8 }
 0x126   :  { %v1238_v12 = vpop.f32.mrf.mxu2  ;;  %v902_v14 = vpop.f32.mrf.mxu0 }
 0x127   :  { %v1239_v13 = vadd.f32 %v1238_v12, %v1070_v7  ;;  %v1071_v15 = vpop.f32.mrf.mxu1  ;;  %v903_v18 = vadd.f32 %v2493_v56, %v902_v14  ;;  %v2040_v7 = vld [vmem:[%s3047_s0 + $0x1c0] sm:$0xf0]  ;;  %v1723_v14 = vor.u32 %v2039_v62, %v1722_v61 }
 0x128   :  { %v1731_v20 = vor.u32 %v2040_v7, %v1730_v6 }
 0x129   :  { %v1374_v16 = vmax.f32 %v1239_v13, 0.0  ;;  %v1072_v30 = vadd.f32 %v1071_v15, %v903_v18  ;;  %v1827_v15 = vor.u32 %v2064_v3, %v1826_v0  ;;  %v1727_v18 = vor.u32 %v2038_v37, %v1724_v5 }
 0x12b   :  { %1438 = vst [vmem:[#allocation2 + $0x80] sm:$0xff] %v1374_v16 }
 0x12c   :  { %v1151_v33 = vpop.f32.mrf.mxu3 }
 0x12d   :  { %v2791_v34 = vadd.f32 %v1151_v33, %v983_v26  ;;  %v991_v26 = vadd.f32 %v2493_v56, %v2580_v2  ;;  %v2041_v2 = vld [vmem:[%s3047_s0 + $0x1cc] sm:$0xf] }
 0x12e   :  { %v1240_v35 = vpop.f32.mrf.mxu2  ;;  %v905_v40 = vpop.f32.mrf.mxu0 }
 0x12f   :  { %v1241_v25 = vadd.f32 %v1240_v35, %v1072_v30  ;;  %v906_v43 = vadd.f32 %v2493_v56, %v905_v40  ;;  %v1074_v44 = vpop.f32.mrf.mxu1  ;;  %v2042_v40 = vld [vmem:[%s3047_s0 + $0x1d0] sm:$0xf0] }
 0x131   :  { %v1375_v45 = vmax.f32 %v1241_v25, 0.0  ;;  %944 = vmatmul.bf16.gmra.mxu0 %v1711_v38  ;;  %1322 = vmatmul.bf16.gmra.mxu3 %v1815_v39  ;;  %v1075_v46 = vadd.f32 %v1074_v44, %v906_v43  ;;  %v1734_v25 = vld [vmem:[%s3047_s0 + $0x1c8] sm:$0xf]  ;;  %v993_v43 = vadd.f32 %v2493_v56, %v2607_v19  ;;  %v1736_v44 = vld [vmem:[%s3047_s0 + $0x1d4] sm:$0xf0] }
 0x132   :  { %1113 = vmatmul.bf16.gmra.mxu1 %v1715_v41  ;;  %v1838_v41 = vld [vmem:[%s3047_s0 + $0x290] sm:$0xf] }
 0x133   :  { %1439 = vst [vmem:[#allocation2 + $0x88] sm:$0xff] %v1375_v45  ;;  %1282 = vmatmul.bf16.gmra.mxu2 %v1719_v42  ;;  %v2067_v42 = vld [vmem:[%s3047_s0 + $0x298] sm:$0xf0]  ;;  %v1742_v45 = vld [vmem:[%s3047_s0 + $0x1d0] sm:$0xf] }
 0x134   :  { %v1154_v48 = vpop.f32.mrf.mxu3 }
 0x135   :  { %v2796_v51 = vadd.f32 %v1154_v48, %v986_v47 }
 0x136   :  { %v1243_v52 = vpop.f32.mrf.mxu2  ;;  %v907_v55 = vpop.f32.mrf.mxu0 }
 0x137   :  { %v1244_v54 = vadd.f32 %v1243_v52, %v1075_v46  ;;  %v1076_v58 = vpop.f32.mrf.mxu1  ;;  %v908_v60 = vadd.f32 %v2493_v56, %v907_v55  ;;  %v2043_v46 = vld [vmem:[%s3047_s0 + $0x1d8] sm:$0xf0]  ;;  %v1735_v55 = vor.u32 %v2042_v40, %v1734_v25 }
 0x138   :  { %v1743_v61 = vor.u32 %v2043_v46, %v1742_v45 }
 0x139   :  { %v1376_v59 = vmax.f32 %v1244_v54, 0.0  ;;  %v1077_v8 = vadd.f32 %v1076_v58, %v908_v60  ;;  %v1839_v58 = vor.u32 %v2067_v42, %v1838_v41  ;;  %v1739_v60 = vor.u32 %v2041_v2, %v1736_v44 }
 0x13b   :  { %1440 = vst [vmem:[#allocation2 + $0x90] sm:$0xff] %v1376_v59 }
 0x13c   :  { %v1156_v10 = vpop.f32.mrf.mxu3 }
 0x13d   :  { %v2825_v12 = vadd.f32 %v1156_v10, %v988_v4  ;;  %v996_v4 = vadd.f32 %v2493_v56, %v2610_v32  ;;  %v2044_v32 = vld [vmem:[%s3047_s0 + $0x1e4] sm:$0xf] }
 0x13e   :  { %v1245_v13 = vpop.f32.mrf.mxu2  ;;  %v910_v16 = vpop.f32.mrf.mxu0 }
 0x13f   :  { %v1246_v53 = vadd.f32 %v1245_v13, %v1077_v8  ;;  %v911_v22 = vadd.f32 %v2493_v56, %v910_v16  ;;  %v1079_v9 = vpop.f32.mrf.mxu1  ;;  %v2045_v16 = vld [vmem:[%s3047_s0 + $0x1e8] sm:$0xf0] }
 0x141   :  { %v1377_v23 = vmax.f32 %v1246_v53, 0.0  ;;  %949 = vmatmul.bf16.gmra.mxu0 %v1723_v14  ;;  %1327 = vmatmul.bf16.gmra.mxu3 %v1827_v15  ;;  %v1080_v24 = vadd.f32 %v1079_v9, %v911_v22  ;;  %v1746_v53 = vld [vmem:[%s3047_s0 + $0x1e0] sm:$0xf]  ;;  %v998_v22 = vadd.f32 %v2493_v56, %v2637_v49  ;;  %v1748_v9 = vld [vmem:[%s3047_s0 + $0x1ec] sm:$0xf0] }
 0x142   :  { %1118 = vmatmul.bf16.gmra.mxu1 %v1727_v18  ;;  %v1850_v18 = vld [vmem:[%s3047_s0 + $0x2a8] sm:$0xf] }
 0x143   :  { %1441 = vst [vmem:[#allocation2 + $0x98] sm:$0xff] %v1377_v23  ;;  %1287 = vmatmul.bf16.gmra.mxu2 %v1731_v20  ;;  %v2070_v20 = vld [vmem:[%s3047_s0 + $0x2b0] sm:$0xf0]  ;;  %v1754_v23 = vld [vmem:[%s3047_s0 + $0x1e8] sm:$0xf] }
 0x144   :  { %v1159_v27 = vpop.f32.mrf.mxu3 }
 0x145   :  { %v2830_v28 = vadd.f32 %v1159_v27, %v991_v26 }
 0x146   :  { %v1248_v29 = vpop.f32.mrf.mxu2  ;;  %v912_v33 = vpop.f32.mrf.mxu0 }
 0x147   :  { %v1249_v30 = vadd.f32 %v1248_v29, %v1080_v24  ;;  %v1081_v35 = vpop.f32.mrf.mxu1  ;;  %v913_v39 = vadd.f32 %v2493_v56, %v912_v33  ;;  %v2046_v24 = vld [vmem:[%s3047_s0 + $0x1f0] sm:$0xf0]  ;;  %v1747_v33 = vor.u32 %v2045_v16, %v1746_v53 }
 0x148   :  { %v1755_v25 = vor.u32 %v2046_v24, %v1754_v23 }
 0x149   :  { %v1378_v38 = vmax.f32 %v1249_v30, 0.0  ;;  %v1082_v47 = vadd.f32 %v1081_v35, %v913_v39  ;;  %v1851_v35 = vor.u32 %v2070_v20, %v1850_v18  ;;  %v1751_v39 = vor.u32 %v2044_v32, %v1748_v9 }
 0x14b   :  { %1442 = vst [vmem:[#allocation2 + $0xa0] sm:$0xff] %v1378_v38 }
 0x14c   :  { %v1161_v48 = vpop.f32.mrf.mxu3 }
 0x14d   :  { %v2859_v52 = vadd.f32 %v1161_v48, %v993_v43  ;;  %v1001_v43 = vadd.f32 %v2493_v56, %v2640_v63  ;;  %v2047_v63 = vld [vmem:[%s3047_s0 + $0x1fc] sm:$0xf] }
 0x14e   :  { %v1250_v54 = vpop.f32.mrf.mxu2  ;;  %v915_v59 = vpop.f32.mrf.mxu0 }
 0x14f   :  { %v1251_v19 = vadd.f32 %v1250_v54, %v1082_v47  ;;  %v916_v62 = vadd.f32 %v2493_v56, %v915_v59  ;;  %v1084_v37 = vpop.f32.mrf.mxu1  ;;  %v2048_v59 = vld [vmem:[%s3047_s0 + $0x200] sm:$0xf0] }
 0x151   :  { %v1379_v0 = vmax.f32 %v1251_v19, 0.0  ;;  %954 = vmatmul.bf16.gmra.mxu0 %v1735_v55  ;;  %1332 = vmatmul.bf16.gmra.mxu3 %v1839_v58  ;;  %v1085_v3 = vadd.f32 %v1084_v37, %v916_v62  ;;  %v1758_v19 = vld [vmem:[%s3047_s0 + $0x1f8] sm:$0xf]  ;;  %v1003_v62 = vadd.f32 %v2493_v56, %v2667_v17  ;;  %v1760_v37 = vld [vmem:[%s3047_s0 + $0x204] sm:$0xf0] }
 0x152   :  { %1123 = vmatmul.bf16.gmra.mxu1 %v1739_v60  ;;  %v1862_v60 = vld [vmem:[%s3047_s0 + $0x2c0] sm:$0xf] }
 0x153   :  { %1443 = vst [vmem:[#allocation2 + $0xa8] sm:$0xff] %v1379_v0  ;;  %1292 = vmatmul.bf16.gmra.mxu2 %v1743_v61  ;;  %v2073_v61 = vld [vmem:[%s3047_s0 + $0x2c8] sm:$0xf0]  ;;  %v1766_v0 = vld [vmem:[%s3047_s0 + $0x200] sm:$0xf] }
 0x154   :  { %v1164_v5 = vpop.f32.mrf.mxu3 }
 0x155   :  { %v2864_v6 = vadd.f32 %v1164_v5, %v996_v4 }
 0x156   :  { %v1253_v7 = vpop.f32.mrf.mxu2  ;;  %v917_v10 = vpop.f32.mrf.mxu0 }
 0x157   :  { %v1254_v8 = vadd.f32 %v1253_v7, %v1085_v3  ;;  %v1086_v13 = vpop.f32.mrf.mxu1  ;;  %v918_v15 = vadd.f32 %v2493_v56, %v917_v10  ;;  %v2049_v3 = vld [vmem:[%s3047_s0 + $0x208] sm:$0xf0]  ;;  %v1759_v10 = vor.u32 %v2048_v59, %v1758_v19  ;;  %v2966_v19 = vld [vmem:[%s3049_s2] ss:$0 sm:$0xff] }
 0x158   :  { %v1767_v53 = vor.u32 %v2049_v3, %v1766_v0 }
 0x159   :  { %v1380_v14 = vmax.f32 %v1254_v8, 0.0  ;;  %v1087_v26 = vadd.f32 %v1086_v13, %v918_v15  ;;  %v1863_v13 = vor.u32 %v2073_v61, %v1862_v60  ;;  %v1763_v15 = vor.u32 %v2047_v63, %v1760_v37 }
 0x15b   :  { %1444 = vst [vmem:[#allocation2 + $0xb0] sm:$0xff] %v1380_v14 }
 0x15c   :  { %v1166_v27 = vpop.f32.mrf.mxu3 }
 0x15d   :  { %v2893_v29 = vadd.f32 %v1166_v27, %v998_v22  ;;  %v1006_v22 = vadd.f32 %v2493_v56, %v2670_v31  ;;  %v2050_v31 = vld [vmem:[%s3047_s0 + $0x214] sm:$0xf] }
 0x15e   :  { %v1255_v30 = vpop.f32.mrf.mxu2  ;;  %v920_v38 = vpop.f32.mrf.mxu0 }
 0x15f   :  { %v1256_v49 = vadd.f32 %v1255_v30, %v1087_v26  ;;  %v921_v40 = vadd.f32 %v2493_v56, %v920_v38  ;;  %v1089_v2 = vpop.f32.mrf.mxu1  ;;  %v2051_v38 = vld [vmem:[%s3047_s0 + $0x218] sm:$0xf0] }
 0x161   :  { %v1381_v41 = vmax.f32 %v1256_v49, 0.0  ;;  %959 = vmatmul.bf16.gmra.mxu0 %v1747_v33  ;;  %1337 = vmatmul.bf16.gmra.mxu3 %v1851_v35  ;;  %v1090_v42 = vadd.f32 %v1089_v2, %v921_v40  ;;  %v1770_v49 = vld [vmem:[%s3047_s0 + $0x210] sm:$0xf]  ;;  %v1008_v40 = vadd.f32 %v2493_v56, %v2697_v50  ;;  %v1772_v2 = vld [vmem:[%s3047_s0 + $0x21c] sm:$0xf0] }
 0x162   :  { %1128 = vmatmul.bf16.gmra.mxu1 %v1751_v39  ;;  %v1874_v39 = vld [vmem:[%s3047_s0 + $0x2d8] sm:$0xf] }
 0x163   :  { %1445 = vst [vmem:[#allocation2 + $0xb8] sm:$0xff] %v1381_v41  ;;  %1297 = vmatmul.bf16.gmra.mxu2 %v1755_v25  ;;  %v2076_v25 = vld [vmem:[%s3047_s0 + $0x2e0] sm:$0xf0]  ;;  %v1778_v41 = vld [vmem:[%s3047_s0 + $0x218] sm:$0xf] }
 0x164   :  { %v1169_v44 = vpop.f32.mrf.mxu3 }
 0x165   :  { %v2898_v45 = vadd.f32 %v1169_v44, %v1001_v43 }
 0x166   :  { %v1258_v46 = vpop.f32.mrf.mxu2  ;;  %v922_v48 = vpop.f32.mrf.mxu0 }
 0x167   :  { %v1259_v47 = vadd.f32 %v1258_v46, %v1090_v42  ;;  %v1091_v54 = vpop.f32.mrf.mxu1  ;;  %v923_v58 = vadd.f32 %v2493_v56, %v922_v48  ;;  %v2052_v42 = vld [vmem:[%s3047_s0 + $0x220] sm:$0xf0]  ;;  %v1771_v48 = vor.u32 %v2051_v38, %v1770_v49 }
 0x169   :  { %v1382_v55 = vmax.f32 %v1259_v47, 0.0  ;;  %v1092_v4 = vadd.f32 %v1091_v54, %v923_v58  ;;  %v1875_v54 = vor.u32 %v2076_v25, %v1874_v39  ;;  %v1779_v58 = vor.u32 %v2052_v42, %v1778_v41 }
 0x16b   :  { %1446 = vst [vmem:[#allocation2 + $0xc0] sm:$0xff] %v1382_v55  ;;  %v1775_v55 = vor.u32 %v2050_v31, %v1772_v2 }
 0x16c   :  { %v1171_v5 = vpop.f32.mrf.mxu3 }
 0x16d   :  { %v2927_v7 = vadd.f32 %v1171_v5, %v1003_v62  ;;  %v1011_v62 = vadd.f32 %v2966_v19, %v2700_v1  ;;  %v2053_v1 = vld [vmem:[%s3047_s0 + $0x22c] sm:$0xf] }
 0x16e   :  { %v1260_v8 = vpop.f32.mrf.mxu2  ;;  %v925_v14 = vpop.f32.mrf.mxu0 }
 0x16f   :  { %v1261_v17 = vadd.f32 %v1260_v8, %v1092_v4  ;;  %v926_v16 = vadd.f32 %v2493_v56, %v925_v14  ;;  %v1094_v32 = vpop.f32.mrf.mxu1  ;;  %v2054_v14 = vld [vmem:[%s3047_s0 + $0x230] sm:$0xf0] }
 0x171   :  { %v1383_v18 = vmax.f32 %v1261_v17, 0.0  ;;  %964 = vmatmul.bf16.gmra.mxu0 %v1759_v10  ;;  %1342 = vmatmul.bf16.gmra.mxu3 %v1863_v13  ;;  %v1095_v20 = vadd.f32 %v1094_v32, %v926_v16  ;;  %v1782_v17 = vld [vmem:[%s3047_s0 + $0x228] sm:$0xf]  ;;  %v1013_v16 = vadd.f32 %v2966_v19, %v2727_v21  ;;  %v1784_v32 = vld [vmem:[%s3047_s0 + $0x234] sm:$0xf0] }
 0x172   :  { %1133 = vmatmul.bf16.gmra.mxu1 %v1763_v15  ;;  %v1886_v15 = vld [vmem:[%s3047_s0 + $0x2f0] sm:$0xf] }
 0x173   :  { %1447 = vst [vmem:[#allocation2 + $0xc8] sm:$0xff] %v1383_v18  ;;  %1302 = vmatmul.bf16.gmra.mxu2 %v1767_v53  ;;  %v2079_v53 = vld [vmem:[%s3047_s0 + $0x2f8] sm:$0xf0]  ;;  %v1790_v18 = vld [vmem:[%s3047_s0 + $0x230] sm:$0xf] }
 0x174   :  { %v1174_v9 = vpop.f32.mrf.mxu3 }
 0x175   :  { %v2932_v23 = vadd.f32 %v1174_v9, %v1006_v22 }
 0x176   :  { %v1263_v24 = vpop.f32.mrf.mxu2  ;;  %v927_v27 = vpop.f32.mrf.mxu0 }
 0x177   :  { %v1264_v26 = vadd.f32 %v1263_v24, %v1095_v20  ;;  %v1096_v30 = vpop.f32.mrf.mxu1  ;;  %v928_v35 = vadd.f32 %v2493_v56, %v927_v27  ;;  %v2055_v20 = vld [vmem:[%s3047_s0 + $0x238] sm:$0xf0]  ;;  %v1783_v27 = vor.u32 %v2054_v14, %v1782_v17  ;;  %s2159_s0 = smov [#allocation2]  }
 0x178   :  { %v1791_v49 = vor.u32 %v2055_v20, %v1790_v18  ;;  %s1490_s28 = sshll.u32 %s2159_s0, 4  ;;  %s1491_s28 = int_to_ptr.vmem [resolvable:$true] %s1490_s28 }
 0x179   :  { %v1384_v33 = vmax.f32 %v1264_v26, 0.0  ;;  %v1097_v43 = vadd.f32 %v1096_v30, %v928_v35  ;;  %v1887_v30 = vor.u32 %v2079_v53, %v1886_v15  ;;  %v1787_v35 = vor.u32 %v2053_v1, %v1784_v32 }
 0x17b   :  { %1448 = vst [vmem:[#allocation2 + $0xd0] sm:$0xff] %v1384_v33 }
 0x17c   :  { %v1176_v44 = vpop.f32.mrf.mxu3 }
 0x17d   :  { %v2961_v46 = vadd.f32 %v1176_v44, %v1008_v40  ;;  %v1016_v40 = vadd.f32 %v2966_v19, %v2730_v36 }
 0x17e   :  { %v1265_v47 = vpop.f32.mrf.mxu2  ;;  %v930_v50 = vpop.f32.mrf.mxu0 }
 0x17f   :  { %v1266_v56 = vadd.f32 %v1265_v47, %v1097_v43  ;;  %v931_v59 = vadd.f32 %v2966_v19, %v930_v50  ;;  %v1099_v63 = vpop.f32.mrf.mxu1 }
 0x181   :  { %v1385_v60 = vmax.f32 %v1266_v56, 0.0  ;;  %969 = vmatmul.bf16.gmra.mxu0 %v1771_v48  ;;  %1347 = vmatmul.bf16.gmra.mxu3 %v1875_v54  ;;  %v1100_v61 = vadd.f32 %v1099_v63, %v931_v59  ;;  %v1018_v56 = vadd.f32 %v2966_v19, %v2757_v57 }
 0x182   :  { %1138 = vmatmul.bf16.gmra.mxu1 %v1775_v55 }
 0x183   :  { %1449 = vst [vmem:[#allocation2 + $0xd8] sm:$0xff] %v1385_v60  ;;  %1307 = vmatmul.bf16.gmra.mxu2 %v1779_v58 }
 0x184   :  { %v1179_v37 = vpop.f32.mrf.mxu3 }
 0x185   :  { %v2971_v0 = vadd.f32 %v1179_v37, %v1011_v62 }
 0x186   :  { %v1268_v3 = vpop.f32.mrf.mxu2  ;;  %v932_v5 = vpop.f32.mrf.mxu0 }
 0x187   :  { %v1269_v4 = vadd.f32 %v1268_v3, %v1100_v61  ;;  %v1101_v8 = vpop.f32.mrf.mxu1  ;;  %v933_v13 = vadd.f32 %v2966_v19, %v932_v5 }
 0x189   :  { %v1386_v10 = vmax.f32 %v1269_v4, 0.0  ;;  %v1102_v22 = vadd.f32 %v1101_v8, %v933_v13 }
 0x18b   :  { %1450 = vst [vmem:[#allocation2 + $0xe0] sm:$0xff] %v1386_v10 }
 0x18c   :  { %v1181_v9 = vpop.f32.mrf.mxu3 }
 0x18d   :  { %v3000_v24 = vadd.f32 %v1181_v9, %v1013_v16 }
 0x18e   :  { %v1270_v26 = vpop.f32.mrf.mxu2  ;;  %v935_v33 = vpop.f32.mrf.mxu0 }
 0x18f   :  { %v1271_v21 = vadd.f32 %v1270_v26, %v1102_v22  ;;  %v936_v38 = vadd.f32 %v2966_v19, %v935_v33  ;;  %v1104_v31 = vpop.f32.mrf.mxu1 }
 0x191   :  { %v1387_v39 = vmax.f32 %v1271_v21, 0.0  ;;  %974 = vmatmul.bf16.gmra.mxu0 %v1783_v27  ;;  %1352 = vmatmul.bf16.gmra.mxu3 %v1887_v30  ;;  %v1105_v25 = vadd.f32 %v1104_v31, %v936_v38 }
 0x192   :  { %1143 = vmatmul.bf16.gmra.mxu1 %v1787_v35 }
 0x193   :  { %1451 = vst [vmem:[#allocation2 + $0xe8] sm:$0xff] %v1387_v39  ;;  %1312 = vmatmul.bf16.gmra.mxu2 %v1791_v49 }
 0x194   :  { %v1184_v2 = vpop.f32.mrf.mxu3 }
 0x195   :  { %v3005_v41 = vadd.f32 %v1184_v2, %v1016_v40 }
 0x196   :  { %v1273_v42 = vpop.f32.mrf.mxu2  ;;  %v937_v44 = vpop.f32.mrf.mxu0 }
 0x197   :  { %v1274_v43 = vadd.f32 %v1273_v42, %v1105_v25  ;;  %v1106_v47 = vpop.f32.mrf.mxu1  ;;  %v938_v54 = vadd.f32 %v2966_v19, %v937_v44 }
 0x199   :  { %v1388_v48 = vmax.f32 %v1274_v43, 0.0  ;;  %v1107_v50 = vadd.f32 %v1106_v47, %v938_v54 }
 0x19b   :  { %1452 = vst [vmem:[#allocation2 + $0xf0] sm:$0xff] %v1388_v48 }
 0x19c   :  { %v1186_v55 = vpop.f32.mrf.mxu3 }
 0x19d   :  { %v3010_v58 = vadd.f32 %v1186_v55, %v1018_v56 }
 0x19e   :  { %v1275_v59 = vpop.f32.mrf.mxu2  ;;  %v940_v63 = vpop.f32.mrf.mxu0 }
 0x19f   :  { %v1276_v36 = vadd.f32 %v1275_v59, %v1107_v50  ;;  %v941_v60 = vadd.f32 %v2966_v19, %v940_v63  ;;  %v1109_v61 = vpop.f32.mrf.mxu1 }
 0x1a1   :  { %v1389_v62 = vmax.f32 %v1276_v36, 0.0  ;;  %v1110_v37 = vadd.f32 %v1109_v61, %v941_v60 }
 0x1a3   :  { %1453 = vst [vmem:[#allocation2 + $0xf8] sm:$0xff] %v1389_v62 }
 0x1a4   :  { %v1318_v3 = vpop.f32.mrf.mxu3 }
 0x1a5   :  { %v1319_v5 = vadd.f32 %v1318_v3, %v2762_v11 }
 0x1a6   :  { %v1278_v4 = vpop.f32.mrf.mxu2  ;;  %v942_v10 = vpop.f32.mrf.mxu0 }
 0x1a7   :  { %v1279_v8 = vadd.f32 %v1278_v4, %v1110_v37  ;;  %v1406_v57 = vmax.f32 %v1319_v5, 0.0  ;;  %v1111_v13 = vpop.f32.mrf.mxu1  ;;  %v943_v14 = vadd.f32 %v2966_v19, %v942_v10 }
 0x1a9   :  { %v1390_v17 = vmax.f32 %v1279_v8, 0.0  ;;  %1470 = vst [vmem:[#allocation2 + $0x180] sm:$0xff] %v1406_v57  ;;  %v1112_v1 = vadd.f32 %v1111_v13, %v943_v14 }
 0x1ab   :  { %1454 = vst [vmem:[#allocation2 + $0x100] sm:$0xff] %v1390_v17 }
 0x1ac   :  { %v1320_v15 = vpop.f32.mrf.mxu3 }
 0x1ad   :  { %v1321_v16 = vadd.f32 %v1320_v15, %v2791_v34 }
 0x1ae   :  { %v1280_v53 = vpop.f32.mrf.mxu2  ;;  %v945_v18 = vpop.f32.mrf.mxu0 }
 0x1af   :  { %v1281_v32 = vadd.f32 %v1280_v53, %v1112_v1  ;;  %v1407_v20 = vmax.f32 %v1321_v16, 0.0  ;;  %v946_v22 = vadd.f32 %v2966_v19, %v945_v18  ;;  %v1114_v11 = vpop.f32.mrf.mxu1 }
 0x1b1   :  { %v1391_v9 = vmax.f32 %v1281_v32, 0.0  ;;  %1471 = vst [vmem:[#allocation2 + $0x188] sm:$0xff] %v1407_v20  ;;  %v1115_v26 = vadd.f32 %v1114_v11, %v946_v22 }
 0x1b3   :  { %1455 = vst [vmem:[#allocation2 + $0x108] sm:$0xff] %v1391_v9 }
 0x1b4   :  { %v1323_v27 = vpop.f32.mrf.mxu3 }
 0x1b5   :  { %v1324_v21 = vadd.f32 %v1323_v27, %v2796_v51 }
 0x1b6   :  { %v1283_v30 = vpop.f32.mrf.mxu2  ;;  %v947_v35 = vpop.f32.mrf.mxu0 }
 0x1b7   :  { %v1284_v33 = vadd.f32 %v1283_v30, %v1115_v26  ;;  %v1408_v49 = vmax.f32 %v1324_v21, 0.0  ;;  %v1116_v38 = vpop.f32.mrf.mxu1  ;;  %v948_v34 = vadd.f32 %v2966_v19, %v947_v35 }
 0x1b9   :  { %v1392_v31 = vmax.f32 %v1284_v33, 0.0  ;;  %1472 = vst [vmem:[#allocation2 + $0x190] sm:$0xff] %v1408_v49  ;;  %v1117_v39 = vadd.f32 %v1116_v38, %v948_v34 }
 0x1bb   :  { %1456 = vst [vmem:[#allocation2 + $0x110] sm:$0xff] %v1392_v31 }
 0x1bc   :  { %v1325_v25 = vpop.f32.mrf.mxu3 }
 0x1bd   :  { %v1326_v2 = vadd.f32 %v1325_v25, %v2825_v12 }
 0x1be   :  { %v1285_v40 = vpop.f32.mrf.mxu2  ;;  %v950_v43 = vpop.f32.mrf.mxu0 }
 0x1bf   :  { %v1286_v42 = vadd.f32 %v1285_v40, %v1117_v39  ;;  %v1409_v44 = vmax.f32 %v1326_v2, 0.0  ;;  %v951_v47 = vadd.f32 %v2966_v19, %v950_v43  ;;  %v1119_v51 = vpop.f32.mrf.mxu1 }
 0x1c1   :  { %v1393_v48 = vmax.f32 %v1286_v42, 0.0  ;;  %1473 = vst [vmem:[#allocation2 + $0x198] sm:$0xff] %v1409_v44  ;;  %v1120_v54 = vadd.f32 %v1119_v51, %v951_v47 }
 0x1c3   :  { %1457 = vst [vmem:[#allocation2 + $0x118] sm:$0xff] %v1393_v48 }
 0x1c4   :  { %v1328_v56 = vpop.f32.mrf.mxu3 }
 0x1c5   :  { %v1329_v55 = vadd.f32 %v1328_v56, %v2830_v28 }
 0x1c6   :  { %v1288_v50 = vpop.f32.mrf.mxu2  ;;  %v952_v36 = vpop.f32.mrf.mxu0 }
 0x1c7   :  { %v1289_v59 = vadd.f32 %v1288_v50, %v1120_v54  ;;  %v1410_v63 = vmax.f32 %v1329_v55, 0.0  ;;  %v1121_v60 = vpop.f32.mrf.mxu1  ;;  %v953_v12 = vadd.f32 %v2966_v19, %v952_v36 }
 0x1c9   :  { %v1394_v61 = vmax.f32 %v1289_v59, 0.0  ;;  %1474 = vst [vmem:[#allocation2 + $0x1a0] sm:$0xff] %v1410_v63  ;;  %v1122_v62 = vadd.f32 %v1121_v60, %v953_v12 }
 0x1cb   :  { %1458 = vst [vmem:[#allocation2 + $0x120] sm:$0xff] %v1394_v61 }
 0x1cc   :  { %v1330_v37 = vpop.f32.mrf.mxu3 }
 0x1cd   :  { %v1331_v4 = vadd.f32 %v1330_v37, %v2859_v52 }
 0x1ce   :  { %v1290_v3 = vpop.f32.mrf.mxu2  ;;  %v955_v8 = vpop.f32.mrf.mxu0 }
 0x1cf   :  { %v1291_v5 = vadd.f32 %v1290_v3, %v1122_v62  ;;  %v1411_v10 = vmax.f32 %v1331_v4, 0.0  ;;  %v956_v57 = vadd.f32 %v2966_v19, %v955_v8  ;;  %v1124_v28 = vpop.f32.mrf.mxu1 }
 0x1d1   :  { %v1395_v13 = vmax.f32 %v1291_v5, 0.0  ;;  %1475 = vst [vmem:[#allocation2 + $0x1a8] sm:$0xff] %v1411_v10  ;;  %v1125_v17 = vadd.f32 %v1124_v28, %v956_v57 }
 0x1d3   :  { %1459 = vst [vmem:[#allocation2 + $0x128] sm:$0xff] %v1395_v13 }
 0x1d4   :  { %v1333_v14 = vpop.f32.mrf.mxu3 }
 0x1d5   :  { %v1334_v15 = vadd.f32 %v1333_v14, %v2864_v6 }
 0x1d6   :  { %v1293_v1 = vpop.f32.mrf.mxu2  ;;  %v957_v16 = vpop.f32.mrf.mxu0 }
 0x1d7   :  { %v1294_v53 = vadd.f32 %v1293_v1, %v1125_v17  ;;  %v1412_v32 = vmax.f32 %v1334_v15, 0.0  ;;  %v1126_v18 = vpop.f32.mrf.mxu1  ;;  %v958_v52 = vadd.f32 %v2966_v19, %v957_v16 }
 0x1d9   :  { %v1396_v20 = vmax.f32 %v1294_v53, 0.0  ;;  %1476 = vst [vmem:[#allocation2 + $0x1b0] sm:$0xff] %v1412_v32  ;;  %v1127_v22 = vadd.f32 %v1126_v18, %v958_v52 }
 0x1db   :  { %1460 = vst [vmem:[#allocation2 + $0x130] sm:$0xff] %v1396_v20 }
 0x1dc   :  { %v1335_v11 = vpop.f32.mrf.mxu3 }
 0x1dd   :  { %v1336_v26 = vadd.f32 %v1335_v11, %v2893_v29 }
 0x1de   :  { %v1295_v9 = vpop.f32.mrf.mxu2  ;;  %v960_v30 = vpop.f32.mrf.mxu0 }
 0x1df   :  { %v1296_v27 = vadd.f32 %v1295_v9, %v1127_v22  ;;  %v1413_v21 = vmax.f32 %v1336_v26, 0.0  ;;  %v961_v33 = vadd.f32 %v2966_v19, %v960_v30  ;;  %v1129_v6 = vpop.f32.mrf.mxu1 }
 0x1e1   :  { %v1397_v35 = vmax.f32 %v1296_v27, 0.0  ;;  %1477 = vst [vmem:[#allocation2 + $0x1b8] sm:$0xff] %v1413_v21  ;;  %v1130_v49 = vadd.f32 %v1129_v6, %v961_v33 }
 0x1e3   :  { %1461 = vst [vmem:[#allocation2 + $0x138] sm:$0xff] %v1397_v35 }
 0x1e4   :  { %v1338_v38 = vpop.f32.mrf.mxu3 }
 0x1e5   :  { %v1339_v34 = vadd.f32 %v1338_v38, %v2898_v45 }
 0x1e6   :  { %v1298_v31 = vpop.f32.mrf.mxu2  ;;  %v962_v25 = vpop.f32.mrf.mxu0 }
 0x1e7   :  { %v1299_v39 = vadd.f32 %v1298_v31, %v1130_v49  ;;  %v1414_v40 = vmax.f32 %v1339_v34, 0.0  ;;  %v1131_v2 = vpop.f32.mrf.mxu1  ;;  %v963_v29 = vadd.f32 %v2966_v19, %v962_v25 }
 0x1e9   :  { %v1398_v42 = vmax.f32 %v1299_v39, 0.0  ;;  %1478 = vst [vmem:[#allocation2 + $0x1c0] sm:$0xff] %v1414_v40  ;;  %v1132_v43 = vadd.f32 %v1131_v2, %v963_v29 }
 0x1eb   :  { %1462 = vst [vmem:[#allocation2 + $0x140] sm:$0xff] %v1398_v42 }
 0x1ec   :  { %v1340_v44 = vpop.f32.mrf.mxu3 }
 0x1ed   :  { %v1341_v51 = vadd.f32 %v1340_v44, %v2927_v7 }
 0x1ee   :  { %v1300_v47 = vpop.f32.mrf.mxu2  ;;  %v965_v54 = vpop.f32.mrf.mxu0 }
 0x1ef   :  { %v1301_v48 = vadd.f32 %v1300_v47, %v1132_v43  ;;  %v1415_v56 = vmax.f32 %v1341_v51, 0.0  ;;  %v966_v50 = vadd.f32 %v2966_v19, %v965_v54  ;;  %v1134_v45 = vpop.f32.mrf.mxu1 }
 0x1f1   :  { %v1399_v55 = vmax.f32 %v1301_v48, 0.0  ;;  %1479 = vst [vmem:[#allocation2 + $0x1c8] sm:$0xff] %v1415_v56  ;;  %v1135_v59 = vadd.f32 %v1134_v45, %v966_v50 }
 0x1f3   :  { %1463 = vst [vmem:[#allocation2 + $0x148] sm:$0xff] %v1399_v55 }
 0x1f4   :  { %v1343_v36 = vpop.f32.mrf.mxu3 }
 0x1f5   :  { %v1344_v60 = vadd.f32 %v1343_v36, %v2932_v23 }
 0x1f6   :  { %v1303_v63 = vpop.f32.mrf.mxu2  ;;  %v967_v12 = vpop.f32.mrf.mxu0 }
 0x1f7   :  { %v1304_v61 = vadd.f32 %v1303_v63, %v1135_v59  ;;  %v1416_v62 = vmax.f32 %v1344_v60, 0.0  ;;  %v1136_v37 = vpop.f32.mrf.mxu1  ;;  %v968_v7 = vadd.f32 %v2966_v19, %v967_v12 }
 0x1f9   :  { %v1400_v3 = vmax.f32 %v1304_v61, 0.0  ;;  %1480 = vst [vmem:[#allocation2 + $0x1d0] sm:$0xff] %v1416_v62  ;;  %v1137_v4 = vadd.f32 %v1136_v37, %v968_v7 }
 0x1fb   :  { %1464 = vst [vmem:[#allocation2 + $0x150] sm:$0xff] %v1400_v3 }
 0x1fc   :  { %v1345_v5 = vpop.f32.mrf.mxu3 }
 0x1fd   :  { %v1346_v10 = vadd.f32 %v1345_v5, %v2961_v46 }
 0x1fe   :  { %v1305_v8 = vpop.f32.mrf.mxu2  ;;  %v970_v28 = vpop.f32.mrf.mxu0 }
 0x1ff   :  { %v1306_v57 = vadd.f32 %v1305_v8, %v1137_v4  ;;  %v1417_v13 = vmax.f32 %v1346_v10, 0.0  ;;  %v971_v17 = vadd.f32 %v2966_v19, %v970_v28  ;;  %v1139_v23 = vpop.f32.mrf.mxu1 }
 0x201   :  { %v1401_v14 = vmax.f32 %v1306_v57, 0.0  ;;  %1481 = vst [vmem:[#allocation2 + $0x1d8] sm:$0xff] %v1417_v13  ;;  %v1140_v1 = vadd.f32 %v1139_v23, %v971_v17 }
 0x203   :  { %1465 = vst [vmem:[#allocation2 + $0x158] sm:$0xff] %v1401_v14 }
 0x204   :  { %v1348_v15 = vpop.f32.mrf.mxu3 }
 0x205   :  { %v1349_v16 = vadd.f32 %v1348_v15, %v2971_v0 }
 0x206   :  { %v1308_v53 = vpop.f32.mrf.mxu2  ;;  %v972_v18 = vpop.f32.mrf.mxu0 }
 0x207   :  { %v1309_v32 = vadd.f32 %v1308_v53, %v1140_v1  ;;  %v1418_v20 = vmax.f32 %v1349_v16, 0.0  ;;  %v1141_v52 = vpop.f32.mrf.mxu1  ;;  %v973_v46 = vadd.f32 %v2966_v19, %v972_v18 }
 0x209   :  { %v1402_v22 = vmax.f32 %v1309_v32, 0.0  ;;  %1482 = vst [vmem:[#allocation2 + $0x1e0] sm:$0xff] %v1418_v20  ;;  %v1142_v11 = vadd.f32 %v1141_v52, %v973_v46 }
 0x20b   :  { %1466 = vst [vmem:[#allocation2 + $0x160] sm:$0xff] %v1402_v22 }
 0x20c   :  { %v1350_v9 = vpop.f32.mrf.mxu3 }
 0x20d   :  { %v1351_v27 = vadd.f32 %v1350_v9, %v3000_v24 }
 0x20e   :  { %v1310_v26 = vpop.f32.mrf.mxu2  ;;  %v975_v21 = vpop.f32.mrf.mxu0 }
 0x20f   :  { %v1311_v30 = vadd.f32 %v1310_v26, %v1142_v11  ;;  %v1419_v33 = vmax.f32 %v1351_v27, 0.0  ;;  %v976_v6 = vadd.f32 %v2966_v19, %v975_v21  ;;  %v1144_v35 = vpop.f32.mrf.mxu1 }
 0x211   :  { %v1403_v0 = vmax.f32 %v1311_v30, 0.0  ;;  %1483 = vst [vmem:[#allocation2 + $0x1e8] sm:$0xff] %v1419_v33  ;;  %v1145_v49 = vadd.f32 %v1144_v35, %v976_v6 }
 0x213   :  { %1467 = vst [vmem:[#allocation2 + $0x168] sm:$0xff] %v1403_v0 }
 0x214   :  { %v1353_v38 = vpop.f32.mrf.mxu3 }
 0x215   :  { %v1354_v34 = vadd.f32 %v1353_v38, %v3005_v41 }
 0x216   :  { %v1313_v31 = vpop.f32.mrf.mxu2  ;;  %v977_v25 = vpop.f32.mrf.mxu0 }
 0x217   :  { %v1314_v39 = vadd.f32 %v1313_v31, %v1145_v49  ;;  %v1420_v40 = vmax.f32 %v1354_v34, 0.0  ;;  %v978_v24 = vadd.f32 %v2966_v19, %v977_v25  ;;  %v1146_v42 = vpop.f32.mrf.mxu1 }
 0x219   :  { %v1404_v2 = vmax.f32 %v1314_v39, 0.0  ;;  %1484 = vst [vmem:[#allocation2 + $0x1f0] sm:$0xff] %v1420_v40  ;;  %v1147_v29 = vadd.f32 %v1146_v42, %v978_v24 }
 0x21b   :  { %1468 = vst [vmem:[#allocation2 + $0x170] sm:$0xff] %v1404_v2 }
 0x21c   :  { %v1355_v43 = vpop.f32.mrf.mxu3 }
 0x21d   :  { %v1356_v41 = vadd.f32 %v1355_v43, %v3010_v58 }
 0x21e   :  { %v1315_v44 = vpop.f32.mrf.mxu2 }
 0x21f   :  { %v1316_v47 = vadd.f32 %v1315_v44, %v1147_v29  ;;  %v1421_v51 = vmax.f32 %v1356_v41, 0.0 }
 0x221   :  { %v1405_v48 = vmax.f32 %v1316_v47, 0.0  ;;  %1485 = vst [vmem:[#allocation2 + $0x1f8] sm:$0xff] %v1421_v51 }
 0x223   :  { %1469 = vst [vmem:[#allocation2 + $0x178] sm:$0xff] %v1405_v48 }
 0x224   :  { %1498 = dma.vmem_to_hbm [thread:$0]  %s1491_s28, 8192, %s1493_s4, [#allocation3], %s2160_s5, %s2160_s5, %s2161_s6  }
 0x225   :  { %2157 = dma.done.wait [#allocation3], 8192  }
 0x226   :  { %2158 = vsyncadd [#allocation3], 4294959104 }
 0x227   :  { %1503 = vsyncpa [#allocation3], 1 }

</bundles_post_ra>
